<compile_context>
chip_gen: v7x
topology: tpu7x:2x2x1
jax: 0.10.0
libtpu: 0.0.40
codegen_flags: <defaults>
</compile_context>

<pallas_src>
import functools
import math

import jax
import jax.numpy as jnp
from jax.experimental import pallas as pl
from jax.experimental.pallas import tpu as pltpu


# ----------------------------------------------------------------------------
# In-kernel helpers (pure functions on values)
# ----------------------------------------------------------------------------

def _layernorm(x, g, b, eps):
    mu = jnp.mean(x, axis=-1, keepdims=True)
    xc = x - mu
    var = jnp.mean(xc * xc, axis=-1, keepdims=True)
    return xc * jax.lax.rsqrt(var + eps) * g + b


def _gelu(y):
    # tanh-approx GELU (lowers cleanly on Mosaic).
    # TODO(synk): exact erf-based GELU to match nn.GELU bit-for-bit.
    c = math.sqrt(2.0 / math.pi)
    return 0.5 * y * (1.0 + jnp.tanh(c * (y + 0.044715 * y * y * y)))


# ----------------------------------------------------------------------------
# Pallas kernels
# ----------------------------------------------------------------------------

def _embed_ln_kernel(we_ref, pos_ref, tok_ref, g_ref, b_ref, o_ref, *, eps):
    # Fused embedding sum (word + position + token-type) + layernorm, no
    # zero residual slab.
    x = (we_ref[...].astype(jnp.float32)
         + pos_ref[...].astype(jnp.float32)
         + tok_ref[...].astype(jnp.float32))
    o_ref[...] = _layernorm(x, g_ref[...], b_ref[...], eps).astype(o_ref.dtype)


def _encoder_layer_kernel(x_ref, wqkv_ref, bqkv_ref, wo_ref, bo_ref,
                          ln1g_ref, ln1b_ref, w1_ref, b1_ref,
                          w2_ref, b2_ref, ln2g_ref, ln2b_ref, o_ref,
                          *, heads, eps):
    # One full BERT encoder layer for one batch element (block = (seq, hidden)).
    x = x_ref[...].astype(jnp.float32)                       # (S, H) f32
    hidden = x.shape[-1]
    dh = hidden // heads
    scale = 1.0 / math.sqrt(dh)

    # Fused QKV projection: one (S,H) @ (H,3H) matmul (bf16 MXU, f32 acc).
    qkv = (jnp.dot(x.astype(jnp.bfloat16), wqkv_ref[...],
                   preferred_element_type=jnp.float32)
           + bqkv_ref[...])                                  # (S, 3H)
    q = qkv[:, :hidden]
    k = qkv[:, hidden:2 * hidden]
    v = qkv[:, 2 * hidden:]

    # Per-head attention (static unroll; head_dim = 128 -> lane-aligned slices).
    ctx_heads = []
    for h in range(heads):
        sl = slice(h * dh, (h + 1) * dh)
        qh = q[:, sl].astype(jnp.bfloat16)
        kh = k[:, sl].astype(jnp.bfloat16)
        vh = v[:, sl].astype(jnp.bfloat16)
        s = jnp.einsum("qd,kd->qk", qh, kh,
                       preferred_element_type=jnp.float32) * scale
        s = s - jnp.max(s, axis=-1, keepdims=True)
        p = jnp.exp(s)
        p = p * pl.reciprocal(jnp.sum(p, axis=-1, keepdims=True), approx=True)
        ctx_heads.append(jnp.dot(p.astype(jnp.bfloat16), vh,
                                 preferred_element_type=jnp.float32))
    ctx = jnp.concatenate(ctx_heads, axis=-1)                # (S, H)

    # Output projection + residual + LN1 (fused epilogue).
    attn = (jnp.dot(ctx.astype(jnp.bfloat16), wo_ref[...],
                    preferred_element_type=jnp.float32) + bo_ref[...])
    h1 = _layernorm(attn + x, ln1g_ref[...], ln1b_ref[...], eps)

    # FFN: linear + GELU, linear + residual + LN2 (fused epilogues).
    ff = (jnp.dot(h1.astype(jnp.bfloat16), w1_ref[...],
                  preferred_element_type=jnp.float32) + b1_ref[...])
    ff = _gelu(ff)
    ff2 = (jnp.dot(ff.astype(jnp.bfloat16), w2_ref[...],
                   preferred_element_type=jnp.float32) + b2_ref[...])
    out = _layernorm(ff2 + h1, ln2g_ref[...], ln2b_ref[...], eps)
    o_ref[...] = out.astype(o_ref.dtype)


def _pooler_fc_kernel(cls_ref, pw_ref, pb_ref, fw_ref, fb_ref, o_ref):
    # pooled = tanh(W_p @ h_[CLS] + b_p); dropout (eval) = identity; fc.
    cls = cls_ref[...].astype(jnp.bfloat16)
    pooled = jnp.tanh(jnp.dot(cls, pw_ref[...],
                              preferred_element_type=jnp.float32) + pb_ref[...])
    logits = (jnp.dot(pooled.astype(jnp.bfloat16), fw_ref[...],
                      preferred_element_type=jnp.float32) + fb_ref[...])
    o_ref[...] = logits.astype(o_ref.dtype)                  # (B, 128) padded


# ----------------------------------------------------------------------------
# pallas_call wrappers
# ----------------------------------------------------------------------------

def _rep_spec(shape):
    # Weight/bias block replicated across the batch grid axis.
    return pl.BlockSpec(shape, lambda b: (0,) * len(shape))


def pallas_embed_layernorm(word_slab, pos_emb, tok_row, gamma, beta, batch, seq):
    m, hidden = word_slab.shape
    return pl.pallas_call(
        functools.partial(_embed_ln_kernel, eps=1e-12),
        grid=(batch,),
        out_shape=jax.ShapeDtypeStruct((m, hidden), jnp.float32),
        in_specs=[pl.BlockSpec((seq, hidden), lambda b: (b, 0)),
                  _rep_spec((seq, hidden)),
                  _rep_spec((1, hidden)),
                  _rep_spec((1, hidden)),
                  _rep_spec((1, hidden))],
        out_specs=pl.BlockSpec((seq, hidden), lambda b: (b, 0)),
        compiler_params=pltpu.CompilerParams(dimension_semantics=("parallel",)),
    )(word_slab, pos_emb, tok_row, gamma, beta)


def pallas_encoder_layer(x, p, batch, seq, heads):
    m, hidden = x.shape
    inter = p["w1"].shape[1]
    return pl.pallas_call(
        functools.partial(_encoder_layer_kernel, heads=heads, eps=1e-12),
        grid=(batch,),
        out_shape=jax.ShapeDtypeStruct((m, hidden), jnp.float32),
        in_specs=[pl.BlockSpec((seq, hidden), lambda b: (b, 0)),
                  _rep_spec((hidden, 3 * hidden)), _rep_spec((1, 3 * hidden)),
                  _rep_spec((hidden, hidden)), _rep_spec((1, hidden)),
                  _rep_spec((1, hidden)), _rep_spec((1, hidden)),
                  _rep_spec((hidden, inter)), _rep_spec((1, inter)),
                  _rep_spec((inter, hidden)), _rep_spec((1, hidden)),
                  _rep_spec((1, hidden)), _rep_spec((1, hidden))],
        out_specs=pl.BlockSpec((seq, hidden), lambda b: (b, 0)),
        compiler_params=pltpu.CompilerParams(dimension_semantics=("parallel",)),
    )(x, p["wqkv"], p["bqkv"], p["wo"], p["bo"], p["ln1_g"], p["ln1_b"],
      p["w1"], p["b1"], p["w2"], p["b2"], p["ln2_g"], p["ln2_b"])


def pallas_pooler_fc(cls, pooler_w, pooler_b, fc_w, fc_b):
    b, hidden = cls.shape
    n_pad = fc_w.shape[1]
    return pl.pallas_call(
        _pooler_fc_kernel,
        out_shape=jax.ShapeDtypeStruct((b, n_pad), jnp.float32),
        in_specs=[pl.BlockSpec((b, hidden)),
                  pl.BlockSpec((hidden, hidden)),
                  pl.BlockSpec((1, hidden)),
                  pl.BlockSpec((hidden, n_pad)),
                  pl.BlockSpec((1, n_pad))],
        out_specs=pl.BlockSpec((b, n_pad)),
    )(cls, pooler_w, pooler_b, fc_w, fc_b)


# ----------------------------------------------------------------------------
# BertClassifier forward (glue in plain JAX, compute in Pallas)
# ----------------------------------------------------------------------------

def bert_classifier_forward(text, params, cfg):
    # text: (seq_len, batch) int32, like PyTorch batch.text
    ids = text.T                                   # == x_in.permute(1, 0)
    batch, seq = ids.shape
    hidden = cfg["hidden"]

    # Embedding gather is glue (tiny table, no clean Pallas gather);
    # the sum + layernorm runs fused in a Pallas kernel.
    word = params["word_emb"][ids].reshape(batch * seq, hidden)
    x = pallas_embed_layernorm(word, params["pos_emb"][:seq],
                               params["type_emb"][0:1],
                               params["emb_ln_g"], params["emb_ln_b"],
                               batch, seq)

    for layer_params in params["layers"]:
        x = pallas_encoder_layer(x, layer_params, batch, seq, cfg["heads"])

    # [CLS] rows (glue slice), then fused pooler(tanh) + dropout(eval) + fc.
    cls = x.reshape(batch, seq, hidden)[:, 0, :]
    logits_padded = pallas_pooler_fc(cls, params["pooler_w"], params["pooler_b"],
                                     params["fc_w"], params["fc_b"])
    return logits_padded[:, :cfg["output_dim"]]


# ----------------------------------------------------------------------------
# Deterministic parameter init (synthetic BERT at toy, lane-dense size)
# ----------------------------------------------------------------------------

def init_params(key, cfg):
    H, I = cfg["hidden"], cfg["intermediate"]
    V, P, O = cfg["vocab"], cfg["max_pos"], cfg["output_dim"]
    Opad = cfg["fc_pad"]
    keys = iter(jax.random.split(key, 64))

    def nrm(shape, std=0.02, dtype=jnp.bfloat16):
        return (std * jax.random.normal(next(keys), shape, jnp.float32)).astype(dtype)

    def zeros(shape):
        return jnp.zeros(shape, jnp.float32)

    def ones(shape):
        return jnp.ones(shape, jnp.float32)

    params = {
        "word_emb": nrm((V, H), dtype=jnp.float32),
        "pos_emb": nrm((P, H), dtype=jnp.float32),
        "type_emb": nrm((2, H), dtype=jnp.float32),
        "emb_ln_g": ones((1, H)), "emb_ln_b": zeros((1, H)),
        "layers": [],
        "pooler_w": nrm((H, H)), "pooler_b": zeros((1, H)),
    }
    for _ in range(cfg["layers"]):
        params["layers"].append({
            "wqkv": nrm((H, 3 * H)), "bqkv": zeros((1, 3 * H)),   # fused QKV
            "wo": nrm((H, H)), "bo": zeros((1, H)),
            "ln1_g": ones((1, H)), "ln1_b": zeros((1, H)),
            "w1": nrm((H, I)), "b1": zeros((1, I)),
            "w2": nrm((I, H)), "b2": zeros((1, H)),
            "ln2_g": ones((1, H)), "ln2_b": zeros((1, H)),
        })
    # fc = nn.Linear(hidden, output_dim) with xavier_normal_ weight,
    # zero-padded on N to 128 lanes (sliced back in the wrapper).
    xav_std = math.sqrt(2.0 / (H + O))
    fc_w = xav_std * jax.random.normal(next(keys), (H, O), jnp.float32)
    params["fc_w"] = jnp.pad(fc_w, ((0, 0), (0, Opad - O))).astype(jnp.bfloat16)
    params["fc_b"] = zeros((1, Opad))
    return params


# ----------------------------------------------------------------------------

if __name__ == "__main__":
    # Lane-dense toy config: hidden / intermediate / head_dim multiples of 128.
    cfg = dict(vocab=64, hidden=256, heads=2, layers=2, intermediate=1024,
               max_pos=16, output_dim=3, fc_pad=128)

    root = jax.random.PRNGKey(0)
    k_params, k_ids = jax.random.split(root)
    params = init_params(k_params, cfg)

    seq_len, batch = 8, 2
    text = jax.random.randint(k_ids, (seq_len, batch), 0, cfg["vocab"],
                              dtype=jnp.int32)

    fwd = jax.jit(functools.partial(bert_classifier_forward, cfg=cfg))
    logits = fwd(text, params)
    jax.block_until_ready(logits)

    assert logits.shape == (batch, cfg["output_dim"]), logits.shape
    assert logits.dtype == jnp.float32
    assert bool(jnp.all(jnp.isfinite(logits)))
    print("KERNEL_OK")
</pallas_src>

<mosaic_0001>
module attributes {stable_mosaic.version = 11 : i64} {
  func.func @_embed_ln_kernel(%arg0: i32, %arg1: memref<8x256xf32, #tpu.memory_space<vmem>>, %arg2: memref<8x256xf32, #tpu.memory_space<vmem>>, %arg3: memref<1x256xf32, #tpu.memory_space<vmem>>, %arg4: memref<1x256xf32, #tpu.memory_space<vmem>>, %arg5: memref<1x256xf32, #tpu.memory_space<vmem>>, %arg6: memref<8x256xf32, #tpu.memory_space<vmem>>) attributes {dimension_semantics = [#tpu.dimension_semantics<parallel>], iteration_bounds = array<i64: 2>, scalar_prefetch = 0 : i64, scratch_operands = 0 : i64, tpu.core_type = #tpu.core_type<tc>, window_params = [{transform_indices = @transform_0, window_bounds = array<i64: 8, 256>}, {pipeline_mode = #tpu.pipeline_mode<synchronous>, transform_indices = @transform_1, window_bounds = array<i64: 8, 256>}, {pipeline_mode = #tpu.pipeline_mode<synchronous>, transform_indices = @transform_2, window_bounds = array<i64: 1, 256>}, {pipeline_mode = #tpu.pipeline_mode<synchronous>, transform_indices = @transform_3, window_bounds = array<i64: 1, 256>}, {pipeline_mode = #tpu.pipeline_mode<synchronous>, transform_indices = @transform_4, window_bounds = array<i64: 1, 256>}, {transform_indices = @transform_5, window_bounds = array<i64: 8, 256>}]} {
    %c0 = arith.constant 0 : index
    %c0_0 = arith.constant 0 : index
    %0 = vector.load %arg1[%c0, %c0_0] : memref<8x256xf32, #tpu.memory_space<vmem>>, vector<8x256xf32>
    %c0_1 = arith.constant 0 : index
    %c0_2 = arith.constant 0 : index
    %1 = vector.load %arg2[%c0_1, %c0_2] : memref<8x256xf32, #tpu.memory_space<vmem>>, vector<8x256xf32>
    %2 = arith.addf %0, %1 : vector<8x256xf32>
    %c0_3 = arith.constant 0 : index
    %c0_4 = arith.constant 0 : index
    %3 = vector.load %arg3[%c0_3, %c0_4] : memref<1x256xf32, #tpu.memory_space<vmem>>, vector<1x256xf32>
    %4 = vector.broadcast %3 : vector<1x256xf32> to vector<8x256xf32>
    %5 = arith.addf %2, %4 : vector<8x256xf32>
    %c0_5 = arith.constant 0 : index
    %c0_6 = arith.constant 0 : index
    %6 = vector.load %arg4[%c0_5, %c0_6] : memref<1x256xf32, #tpu.memory_space<vmem>>, vector<1x256xf32>
    %c0_7 = arith.constant 0 : index
    %c0_8 = arith.constant 0 : index
    %7 = vector.load %arg5[%c0_7, %c0_8] : memref<1x256xf32, #tpu.memory_space<vmem>>, vector<1x256xf32>
    %cst = arith.constant dense<0.000000e+00> : vector<8xf32>
    %8 = vector.multi_reduction <add>, %5, %cst [1] : vector<8x256xf32> to vector<8xf32>
    %9 = vector.shape_cast %8 : vector<8xf32> to vector<8x1xf32>
    %cst_9 = arith.constant 2.560000e+02 : f32
    %10 = vector.broadcast %cst_9 : f32 to vector<8x1xf32>
    %11 = arith.divf %9, %10 : vector<8x1xf32>
    %12 = vector.broadcast %11 : vector<8x1xf32> to vector<8x256xf32>
    %13 = arith.subf %5, %12 : vector<8x256xf32>
    %14 = arith.mulf %13, %13 : vector<8x256xf32>
    %cst_10 = arith.constant dense<0.000000e+00> : vector<8xf32>
    %15 = vector.multi_reduction <add>, %14, %cst_10 [1] : vector<8x256xf32> to vector<8xf32>
    %16 = vector.shape_cast %15 : vector<8xf32> to vector<8x1xf32>
    %cst_11 = arith.constant 2.560000e+02 : f32
    %17 = vector.broadcast %cst_11 : f32 to vector<8x1xf32>
    %18 = arith.divf %16, %17 : vector<8x1xf32>
    %cst_12 = arith.constant 9.99999996E-13 : f32
    %19 = vector.broadcast %cst_12 : f32 to vector<8x1xf32>
    %20 = arith.addf %18, %19 : vector<8x1xf32>
    %21 = math.rsqrt %20 : vector<8x1xf32>
    %22 = vector.broadcast %21 : vector<8x1xf32> to vector<8x256xf32>
    %23 = arith.mulf %13, %22 : vector<8x256xf32>
    %24 = vector.broadcast %6 : vector<1x256xf32> to vector<8x256xf32>
    %25 = arith.mulf %23, %24 : vector<8x256xf32>
    %26 = vector.broadcast %7 : vector<1x256xf32> to vector<8x256xf32>
    %27 = arith.addf %25, %26 : vector<8x256xf32>
    %c0_13 = arith.constant 0 : index
    %c0_14 = arith.constant 0 : index
    %28 = vector.load %arg6[%c0_13, %c0_14] : memref<8x256xf32, #tpu.memory_space<vmem>>, vector<8x256xf32>
    tpu.vector_store %arg6[%c0_13, %c0_14], %27 {strides = array<i32>} : memref<8x256xf32, #tpu.memory_space<vmem>>, vector<8x256xf32>,
    return
  }
  func.func @transform_0(%arg0: i32) -> (i32, i32) {
    %c0_i32 = arith.constant 0 : i32
    %c0_i32_0 = arith.constant 0 : i32
    return %arg0, %c0_i32 : i32, i32
  }
  func.func @transform_1(%arg0: i32) -> (i32, i32) {
    %c0_i32 = arith.constant 0 : i32
    %c0_i32_0 = arith.constant 0 : i32
    %c0_i32_1 = arith.constant 0 : i32
    return %c0_i32, %c0_i32_0 : i32, i32
  }
  func.func @transform_2(%arg0: i32) -> (i32, i32) {
    %c0_i32 = arith.constant 0 : i32
    %c0_i32_0 = arith.constant 0 : i32
    %c0_i32_1 = arith.constant 0 : i32
    return %c0_i32, %c0_i32_0 : i32, i32
  }
  func.func @transform_3(%arg0: i32) -> (i32, i32) {
    %c0_i32 = arith.constant 0 : i32
    %c0_i32_0 = arith.constant 0 : i32
    %c0_i32_1 = arith.constant 0 : i32
    return %c0_i32, %c0_i32_0 : i32, i32
  }
  func.func @transform_4(%arg0: i32) -> (i32, i32) {
    %c0_i32 = arith.constant 0 : i32
    %c0_i32_0 = arith.constant 0 : i32
    %c0_i32_1 = arith.constant 0 : i32
    return %c0_i32, %c0_i32_0 : i32, i32
  }
  func.func @transform_5(%arg0: i32) -> (i32, i32) {
    %c0_i32 = arith.constant 0 : i32
    %c0_i32_0 = arith.constant 0 : i32
    return %arg0, %c0_i32 : i32, i32
  }
}

module attributes {stable_mosaic.version = 11 : i64} {
  func.func @_encoder_layer_kernel(%arg0: i32, %arg1: memref<8x256xf32, #tpu.memory_space<vmem>>, %arg2: memref<256x768xbf16, #tpu.memory_space<vmem>>, %arg3: memref<1x768xf32, #tpu.memory_space<vmem>>, %arg4: memref<256x256xbf16, #tpu.memory_space<vmem>>, %arg5: memref<1x256xf32, #tpu.memory_space<vmem>>, %arg6: memref<1x256xf32, #tpu.memory_space<vmem>>, %arg7: memref<1x256xf32, #tpu.memory_space<vmem>>, %arg8: memref<256x1024xbf16, #tpu.memory_space<vmem>>, %arg9: memref<1x1024xf32, #tpu.memory_space<vmem>>, %arg10: memref<1024x256xbf16, #tpu.memory_space<vmem>>, %arg11: memref<1x256xf32, #tpu.memory_space<vmem>>, %arg12: memref<1x256xf32, #tpu.memory_space<vmem>>, %arg13: memref<1x256xf32, #tpu.memory_space<vmem>>, %arg14: memref<8x256xf32, #tpu.memory_space<vmem>>) attributes {dimension_semantics = [#tpu.dimension_semantics<parallel>], iteration_bounds = array<i64: 2>, scalar_prefetch = 0 : i64, scratch_operands = 0 : i64, tpu.core_type = #tpu.core_type<tc>, window_params = [{transform_indices = @transform_0, window_bounds = array<i64: 8, 256>}, {pipeline_mode = #tpu.pipeline_mode<synchronous>, transform_indices = @transform_1, window_bounds = array<i64: 256, 768>}, {pipeline_mode = #tpu.pipeline_mode<synchronous>, transform_indices = @transform_2, window_bounds = array<i64: 1, 768>}, {pipeline_mode = #tpu.pipeline_mode<synchronous>, transform_indices = @transform_3, window_bounds = array<i64: 256, 256>}, {pipeline_mode = #tpu.pipeline_mode<synchronous>, transform_indices = @transform_4, window_bounds = array<i64: 1, 256>}, {pipeline_mode = #tpu.pipeline_mode<synchronous>, transform_indices = @transform_5, window_bounds = array<i64: 1, 256>}, {pipeline_mode = #tpu.pipeline_mode<synchronous>, transform_indices = @transform_6, window_bounds = array<i64: 1, 256>}, {pipeline_mode = #tpu.pipeline_mode<synchronous>, transform_indices = @transform_7, window_bounds = array<i64: 256, 1024>}, {pipeline_mode = #tpu.pipeline_mode<synchronous>, transform_indices = @transform_8, window_bounds = array<i64: 1, 1024>}, {pipeline_mode = #tpu.pipeline_mode<synchronous>, transform_indices = @transform_9, window_bounds = array<i64: 1024, 256>}, {pipeline_mode = #tpu.pipeline_mode<synchronous>, transform_indices = @transform_10, window_bounds = array<i64: 1, 256>}, {pipeline_mode = #tpu.pipeline_mode<synchronous>, transform_indices = @transform_11, window_bounds = array<i64: 1, 256>}, {pipeline_mode = #tpu.pipeline_mode<synchronous>, transform_indices = @transform_12, window_bounds = array<i64: 1, 256>}, {transform_indices = @transform_13, window_bounds = array<i64: 8, 256>}]} {
    %c0 = arith.constant 0 : index
    %c0_0 = arith.constant 0 : index
    %0 = vector.load %arg1[%c0, %c0_0] : memref<8x256xf32, #tpu.memory_space<vmem>>, vector<8x256xf32>
    %1 = arith.truncf %0 : vector<8x256xf32> to vector<8x256xbf16>
    %c0_1 = arith.constant 0 : index
    %c0_2 = arith.constant 0 : index
    %2 = vector.load %arg2[%c0_1, %c0_2] : memref<256x768xbf16, #tpu.memory_space<vmem>>, vector<256x768xbf16>
    %cst = arith.constant dense<0.000000e+00> : vector<8x768xf32>
    %3 = tpu.matmul %1, %2, %cst {dimension_numbers = #tpu.dot_dimension_numbers<[1], [0], [0], [1], [0, 0, 1, 1], [], []>} : vector<8x256xbf16>, vector<256x768xbf16>, vector<8x768xf32> -> vector<8x768xf32>
    %c0_3 = arith.constant 0 : index
    %c0_4 = arith.constant 0 : index
    %4 = vector.load %arg3[%c0_3, %c0_4] : memref<1x768xf32, #tpu.memory_space<vmem>>, vector<1x768xf32>
    %5 = vector.broadcast %4 : vector<1x768xf32> to vector<8x768xf32>
    %6 = arith.addf %3, %5 : vector<8x768xf32>
    %7 = vector.extract_strided_slice %6 {offsets = [0, 0], sizes = [8, 256], strides = [1, 1]} : vector<8x768xf32> to vector<8x256xf32>
    %8 = vector.extract_strided_slice %6 {offsets = [0, 256], sizes = [8, 256], strides = [1, 1]} : vector<8x768xf32> to vector<8x256xf32>
    %9 = vector.extract_strided_slice %6 {offsets = [0, 512], sizes = [8, 256], strides = [1, 1]} : vector<8x768xf32> to vector<8x256xf32>
    %10 = vector.extract_strided_slice %7 {offsets = [0, 0], sizes = [8, 128], strides = [1, 1]} : vector<8x256xf32> to vector<8x128xf32>
    %11 = arith.truncf %10 : vector<8x128xf32> to vector<8x128xbf16>
    %12 = vector.extract_strided_slice %8 {offsets = [0, 0], sizes = [8, 128], strides = [1, 1]} : vector<8x256xf32> to vector<8x128xf32>
    %13 = arith.truncf %12 : vector<8x128xf32> to vector<8x128xbf16>
    %14 = vector.extract_strided_slice %9 {offsets = [0, 0], sizes = [8, 128], strides = [1, 1]} : vector<8x256xf32> to vector<8x128xf32>
    %15 = arith.truncf %14 : vector<8x128xf32> to vector<8x128xbf16>
    "tpu.trace_start"() <{level = 10 : i32, message = "qd,kd->qk"}> : () -> ()
    %cst_5 = arith.constant dense<0.000000e+00> : vector<8x8xf32>
    %16 = tpu.matmul %11, %13, %cst_5 {dimension_numbers = #tpu.dot_dimension_numbers<[1], [1], [0], [0], [0, 0, 1, 0], [], []>} : vector<8x128xbf16>, vector<8x128xbf16>, vector<8x8xf32> -> vector<8x8xf32>
    "tpu.trace_stop"() : () -> ()
    %cst_6 = arith.constant 0.0883883461 : f32
    %17 = vector.broadcast %cst_6 : f32 to vector<8x8xf32>
    %18 = arith.mulf %16, %17 : vector<8x8xf32>
    %cst_7 = arith.constant dense<0xFF800000> : vector<8xf32>
    %19 = vector.multi_reduction <maximumf>, %18, %cst_7 [1] : vector<8x8xf32> to vector<8xf32>
    %20 = vector.shape_cast %19 : vector<8xf32> to vector<8x1xf32>
    %21 = vector.broadcast %20 : vector<8x1xf32> to vector<8x8xf32>
    %22 = arith.subf %18, %21 : vector<8x8xf32>
    %23 = math.exp %22 : vector<8x8xf32>
    %cst_8 = arith.constant dense<0.000000e+00> : vector<8xf32>
    %24 = vector.multi_reduction <add>, %23, %cst_8 [1] : vector<8x8xf32> to vector<8xf32>
    %25 = vector.shape_cast %24 : vector<8xf32> to vector<8x1xf32>
    %26 = tpu.reciprocal %25 {approx = true} : vector<8x1xf32> -> vector<8x1xf32>
    %27 = vector.broadcast %26 : vector<8x1xf32> to vector<8x8xf32>
    %28 = arith.mulf %23, %27 : vector<8x8xf32>
    %29 = arith.truncf %28 : vector<8x8xf32> to vector<8x8xbf16>
    %cst_9 = arith.constant dense<0.000000e+00> : vector<8x128xf32>
    %30 = tpu.matmul %29, %15, %cst_9 {dimension_numbers = #tpu.dot_dimension_numbers<[1], [0], [0], [1], [0, 0, 1, 1], [], []>} : vector<8x8xbf16>, vector<8x128xbf16>, vector<8x128xf32> -> vector<8x128xf32>
    %31 = vector.extract_strided_slice %7 {offsets = [0, 128], sizes = [8, 128], strides = [1, 1]} : vector<8x256xf32> to vector<8x128xf32>
    %32 = arith.truncf %31 : vector<8x128xf32> to vector<8x128xbf16>
    %33 = vector.extract_strided_slice %8 {offsets = [0, 128], sizes = [8, 128], strides = [1, 1]} : vector<8x256xf32> to vector<8x128xf32>
    %34 = arith.truncf %33 : vector<8x128xf32> to vector<8x128xbf16>
    %35 = vector.extract_strided_slice %9 {offsets = [0, 128], sizes = [8, 128], strides = [1, 1]} : vector<8x256xf32> to vector<8x128xf32>
    %36 = arith.truncf %35 : vector<8x128xf32> to vector<8x128xbf16>
    "tpu.trace_start"() <{level = 10 : i32, message = "qd,kd->qk"}> : () -> ()
    %cst_10 = arith.constant dense<0.000000e+00> : vector<8x8xf32>
    %37 = tpu.matmul %32, %34, %cst_10 {dimension_numbers = #tpu.dot_dimension_numbers<[1], [1], [0], [0], [0, 0, 1, 0], [], []>} : vector<8x128xbf16>, vector<8x128xbf16>, vector<8x8xf32> -> vector<8x8xf32>
    "tpu.trace_stop"() : () -> ()
    %cst_11 = arith.constant 0.0883883461 : f32
    %38 = vector.broadcast %cst_11 : f32 to vector<8x8xf32>
    %39 = arith.mulf %37, %38 : vector<8x8xf32>
    %cst_12 = arith.constant dense<0xFF800000> : vector<8xf32>
    %40 = vector.multi_reduction <maximumf>, %39, %cst_12 [1] : vector<8x8xf32> to vector<8xf32>
    %41 = vector.shape_cast %40 : vector<8xf32> to vector<8x1xf32>
    %42 = vector.broadcast %41 : vector<8x1xf32> to vector<8x8xf32>
    %43 = arith.subf %39, %42 : vector<8x8xf32>
    %44 = math.exp %43 : vector<8x8xf32>
    %cst_13 = arith.constant dense<0.000000e+00> : vector<8xf32>
    %45 = vector.multi_reduction <add>, %44, %cst_13 [1] : vector<8x8xf32> to vector<8xf32>
    %46 = vector.shape_cast %45 : vector<8xf32> to vector<8x1xf32>
    %47 = tpu.reciprocal %46 {approx = true} : vector<8x1xf32> -> vector<8x1xf32>
    %48 = vector.broadcast %47 : vector<8x1xf32> to vector<8x8xf32>
    %49 = arith.mulf %44, %48 : vector<8x8xf32>
    %50 = arith.truncf %49 : vector<8x8xf32> to vector<8x8xbf16>
    %cst_14 = arith.constant dense<0.000000e+00> : vector<8x128xf32>
    %51 = tpu.matmul %50, %36, %cst_14 {dimension_numbers = #tpu.dot_dimension_numbers<[1], [0], [0], [1], [0, 0, 1, 1], [], []>} : vector<8x8xbf16>, vector<8x128xbf16>, vector<8x128xf32> -> vector<8x128xf32>
    %52 = tpu.concatenate %30, %51 in 1 : vector<8x128xf32>, vector<8x128xf32> -> vector<8x256xf32>
    %53 = arith.truncf %52 : vector<8x256xf32> to vector<8x256xbf16>
    %c0_15 = arith.constant 0 : index
    %c0_16 = arith.constant 0 : index
    %54 = vector.load %arg4[%c0_15, %c0_16] : memref<256x256xbf16, #tpu.memory_space<vmem>>, vector<256x256xbf16>
    %cst_17 = arith.constant dense<0.000000e+00> : vector<8x256xf32>
    %55 = tpu.matmul %53, %54, %cst_17 {dimension_numbers = #tpu.dot_dimension_numbers<[1], [0], [0], [1], [0, 0, 1, 1], [], []>} : vector<8x256xbf16>, vector<256x256xbf16>, vector<8x256xf32> -> vector<8x256xf32>
    %c0_18 = arith.constant 0 : index
    %c0_19 = arith.constant 0 : index
    %56 = vector.load %arg5[%c0_18, %c0_19] : memref<1x256xf32, #tpu.memory_space<vmem>>, vector<1x256xf32>
    %57 = vector.broadcast %56 : vector<1x256xf32> to vector<8x256xf32>
    %58 = arith.addf %55, %57 : vector<8x256xf32>
    %59 = arith.addf %58, %0 : vector<8x256xf32>
    %c0_20 = arith.constant 0 : index
    %c0_21 = arith.constant 0 : index
    %60 = vector.load %arg6[%c0_20, %c0_21] : memref<1x256xf32, #tpu.memory_space<vmem>>, vector<1x256xf32>
    %c0_22 = arith.constant 0 : index
    %c0_23 = arith.constant 0 : index
    %61 = vector.load %arg7[%c0_22, %c0_23] : memref<1x256xf32, #tpu.memory_space<vmem>>, vector<1x256xf32>
    %cst_24 = arith.constant dense<0.000000e+00> : vector<8xf32>
    %62 = vector.multi_reduction <add>, %59, %cst_24 [1] : vector<8x256xf32> to vector<8xf32>
    %63 = vector.shape_cast %62 : vector<8xf32> to vector<8x1xf32>
    %cst_25 = arith.constant 2.560000e+02 : f32
    %64 = vector.broadcast %cst_25 : f32 to vector<8x1xf32>
    %65 = arith.divf %63, %64 : vector<8x1xf32>
    %66 = vector.broadcast %65 : vector<8x1xf32> to vector<8x256xf32>
    %67 = arith.subf %59, %66 : vector<8x256xf32>
    %68 = arith.mulf %67, %67 : vector<8x256xf32>
    %cst_26 = arith.constant dense<0.000000e+00> : vector<8xf32>
    %69 = vector.multi_reduction <add>, %68, %cst_26 [1] : vector<8x256xf32> to vector<8xf32>
    %70 = vector.shape_cast %69 : vector<8xf32> to vector<8x1xf32>
    %cst_27 = arith.constant 2.560000e+02 : f32
    %71 = vector.broadcast %cst_27 : f32 to vector<8x1xf32>
    %72 = arith.divf %70, %71 : vector<8x1xf32>
    %cst_28 = arith.constant 9.99999996E-13 : f32
    %73 = vector.broadcast %cst_28 : f32 to vector<8x1xf32>
    %74 = arith.addf %72, %73 : vector<8x1xf32>
    %75 = math.rsqrt %74 : vector<8x1xf32>
    %76 = vector.broadcast %75 : vector<8x1xf32> to vector<8x256xf32>
    %77 = arith.mulf %67, %76 : vector<8x256xf32>
    %78 = vector.broadcast %60 : vector<1x256xf32> to vector<8x256xf32>
    %79 = arith.mulf %77, %78 : vector<8x256xf32>
    %80 = vector.broadcast %61 : vector<1x256xf32> to vector<8x256xf32>
    %81 = arith.addf %79, %80 : vector<8x256xf32>
    %82 = arith.truncf %81 : vector<8x256xf32> to vector<8x256xbf16>
    %c0_29 = arith.constant 0 : index
    %c0_30 = arith.constant 0 : index
    %83 = vector.load %arg8[%c0_29, %c0_30] : memref<256x1024xbf16, #tpu.memory_space<vmem>>, vector<256x1024xbf16>
    %cst_31 = arith.constant dense<0.000000e+00> : vector<8x1024xf32>
    %84 = tpu.matmul %82, %83, %cst_31 {dimension_numbers = #tpu.dot_dimension_numbers<[1], [0], [0], [1], [0, 0, 1, 1], [], []>} : vector<8x256xbf16>, vector<256x1024xbf16>, vector<8x1024xf32> -> vector<8x1024xf32>
    %c0_32 = arith.constant 0 : index
    %c0_33 = arith.constant 0 : index
    %85 = vector.load %arg9[%c0_32, %c0_33] : memref<1x1024xf32, #tpu.memory_space<vmem>>, vector<1x1024xf32>
    %86 = vector.broadcast %85 : vector<1x1024xf32> to vector<8x1024xf32>
    %87 = arith.addf %84, %86 : vector<8x1024xf32>
    %cst_34 = arith.constant 5.000000e-01 : f32
    %88 = vector.broadcast %cst_34 : f32 to vector<8x1024xf32>
    %89 = arith.mulf %88, %87 : vector<8x1024xf32>
    %cst_35 = arith.constant 4.471500e-02 : f32
    %90 = vector.broadcast %cst_35 : f32 to vector<8x1024xf32>
    %91 = arith.mulf %90, %87 : vector<8x1024xf32>
    %92 = arith.mulf %91, %87 : vector<8x1024xf32>
    %93 = arith.mulf %92, %87 : vector<8x1024xf32>
    %94 = arith.addf %87, %93 : vector<8x1024xf32>
    %cst_36 = arith.constant 0.797884583 : f32
    %95 = vector.broadcast %cst_36 : f32 to vector<8x1024xf32>
    %96 = arith.mulf %95, %94 : vector<8x1024xf32>
    %97 = math.tanh %96 : vector<8x1024xf32>
    %cst_37 = arith.constant 1.000000e+00 : f32
    %98 = vector.broadcast %cst_37 : f32 to vector<8x1024xf32>
    %99 = arith.addf %98, %97 : vector<8x1024xf32>
    %100 = arith.mulf %89, %99 : vector<8x1024xf32>
    %101 = arith.truncf %100 : vector<8x1024xf32> to vector<8x1024xbf16>
    %c0_38 = arith.constant 0 : index
    %c0_39 = arith.constant 0 : index
    %102 = vector.load %arg10[%c0_38, %c0_39] : memref<1024x256xbf16, #tpu.memory_space<vmem>>, vector<1024x256xbf16>
    %cst_40 = arith.constant dense<0.000000e+00> : vector<8x256xf32>
    %103 = tpu.matmul %101, %102, %cst_40 {dimension_numbers = #tpu.dot_dimension_numbers<[1], [0], [0], [1], [0, 0, 1, 1], [], []>} : vector<8x1024xbf16>, vector<1024x256xbf16>, vector<8x256xf32> -> vector<8x256xf32>
    %c0_41 = arith.constant 0 : index
    %c0_42 = arith.constant 0 : index
    %104 = vector.load %arg11[%c0_41, %c0_42] : memref<1x256xf32, #tpu.memory_space<vmem>>, vector<1x256xf32>
    %105 = vector.broadcast %104 : vector<1x256xf32> to vector<8x256xf32>
    %106 = arith.addf %103, %105 : vector<8x256xf32>
    %107 = arith.addf %106, %81 : vector<8x256xf32>
    %c0_43 = arith.constant 0 : index
    %c0_44 = arith.constant 0 : index
    %108 = vector.load %arg12[%c0_43, %c0_44] : memref<1x256xf32, #tpu.memory_space<vmem>>, vector<1x256xf32>
    %c0_45 = arith.constant 0 : index
    %c0_46 = arith.constant 0 : index
    %109 = vector.load %arg13[%c0_45, %c0_46] : memref<1x256xf32, #tpu.memory_space<vmem>>, vector<1x256xf32>
    %cst_47 = arith.constant dense<0.000000e+00> : vector<8xf32>
    %110 = vector.multi_reduction <add>, %107, %cst_47 [1] : vector<8x256xf32> to vector<8xf32>
    %111 = vector.shape_cast %110 : vector<8xf32> to vector<8x1xf32>
    %cst_48 = arith.constant 2.560000e+02 : f32
    %112 = vector.broadcast %cst_48 : f32 to vector<8x1xf32>
    %113 = arith.divf %111, %112 : vector<8x1xf32>
    %114 = vector.broadcast %113 : vector<8x1xf32> to vector<8x256xf32>
    %115 = arith.subf %107, %114 : vector<8x256xf32>
    %116 = arith.mulf %115, %115 : vector<8x256xf32>
    %cst_49 = arith.constant dense<0.000000e+00> : vector<8xf32>
    %117 = vector.multi_reduction <add>, %116, %cst_49 [1] : vector<8x256xf32> to vector<8xf32>
    %118 = vector.shape_cast %117 : vector<8xf32> to vector<8x1xf32>
    %cst_50 = arith.constant 2.560000e+02 : f32
    %119 = vector.broadcast %cst_50 : f32 to vector<8x1xf32>
    %120 = arith.divf %118, %119 : vector<8x1xf32>
    %cst_51 = arith.constant 9.99999996E-13 : f32
    %121 = vector.broadcast %cst_51 : f32 to vector<8x1xf32>
    %122 = arith.addf %120, %121 : vector<8x1xf32>
    %123 = math.rsqrt %122 : vector<8x1xf32>
    %124 = vector.broadcast %123 : vector<8x1xf32> to vector<8x256xf32>
    %125 = arith.mulf %115, %124 : vector<8x256xf32>
    %126 = vector.broadcast %108 : vector<1x256xf32> to vector<8x256xf32>
    %127 = arith.mulf %125, %126 : vector<8x256xf32>
    %128 = vector.broadcast %109 : vector<1x256xf32> to vector<8x256xf32>
    %129 = arith.addf %127, %128 : vector<8x256xf32>
    %c0_52 = arith.constant 0 : index
    %c0_53 = arith.constant 0 : index
    %130 = vector.load %arg14[%c0_52, %c0_53] : memref<8x256xf32, #tpu.memory_space<vmem>>, vector<8x256xf32>
    tpu.vector_store %arg14[%c0_52, %c0_53], %129 {strides = array<i32>} : memref<8x256xf32, #tpu.memory_space<vmem>>, vector<8x256xf32>,
    return
  }
  func.func @transform_0(%arg0: i32) -> (i32, i32) {
    %c0_i32 = arith.constant 0 : i32
    %c0_i32_0 = arith.constant 0 : i32
    return %arg0, %c0_i32 : i32, i32
  }
  func.func @transform_1(%arg0: i32) -> (i32, i32) {
    %c0_i32 = arith.constant 0 : i32
    %c0_i32_0 = arith.constant 0 : i32
    %c0_i32_1 = arith.constant 0 : i32
    return %c0_i32, %c0_i32_0 : i32, i32
  }
  func.func @transform_2(%arg0: i32) -> (i32, i32) {
    %c0_i32 = arith.constant 0 : i32
    %c0_i32_0 = arith.constant 0 : i32
    %c0_i32_1 = arith.constant 0 : i32
    return %c0_i32, %c0_i32_0 : i32, i32
  }
  func.func @transform_3(%arg0: i32) -> (i32, i32) {
    %c0_i32 = arith.constant 0 : i32
    %c0_i32_0 = arith.constant 0 : i32
    %c0_i32_1 = arith.constant 0 : i32
    return %c0_i32, %c0_i32_0 : i32, i32
  }
  func.func @transform_4(%arg0: i32) -> (i32, i32) {
    %c0_i32 = arith.constant 0 : i32
    %c0_i32_0 = arith.constant 0 : i32
    %c0_i32_1 = arith.constant 0 : i32
    return %c0_i32, %c0_i32_0 : i32, i32
  }
  func.func @transform_5(%arg0: i32) -> (i32, i32) {
    %c0_i32 = arith.constant 0 : i32
    %c0_i32_0 = arith.constant 0 : i32
    %c0_i32_1 = arith.constant 0 : i32
    return %c0_i32, %c0_i32_0 : i32, i32
  }
  func.func @transform_6(%arg0: i32) -> (i32, i32) {
    %c0_i32 = arith.constant 0 : i32
    %c0_i32_0 = arith.constant 0 : i32
    %c0_i32_1 = arith.constant 0 : i32
    return %c0_i32, %c0_i32_0 : i32, i32
  }
  func.func @transform_7(%arg0: i32) -> (i32, i32) {
    %c0_i32 = arith.constant 0 : i32
    %c0_i32_0 = arith.constant 0 : i32
    %c0_i32_1 = arith.constant 0 : i32
    return %c0_i32, %c0_i32_0 : i32, i32
  }
  func.func @transform_8(%arg0: i32) -> (i32, i32) {
    %c0_i32 = arith.constant 0 : i32
    %c0_i32_0 = arith.constant 0 : i32
    %c0_i32_1 = arith.constant 0 : i32
    return %c0_i32, %c0_i32_0 : i32, i32
  }
  func.func @transform_9(%arg0: i32) -> (i32, i32) {
    %c0_i32 = arith.constant 0 : i32
    %c0_i32_0 = arith.constant 0 : i32
    %c0_i32_1 = arith.constant 0 : i32
    return %c0_i32, %c0_i32_0 : i32, i32
  }
  func.func @transform_10(%arg0: i32) -> (i32, i32) {
    %c0_i32 = arith.constant 0 : i32
    %c0_i32_0 = arith.constant 0 : i32
    %c0_i32_1 = arith.constant 0 : i32
    return %c0_i32, %c0_i32_0 : i32, i32
  }
  func.func @transform_11(%arg0: i32) -> (i32, i32) {
    %c0_i32 = arith.constant 0 : i32
    %c0_i32_0 = arith.constant 0 : i32
    %c0_i32_1 = arith.constant 0 : i32
    return %c0_i32, %c0_i32_0 : i32, i32
  }
  func.func @transform_12(%arg0: i32) -> (i32, i32) {
    %c0_i32 = arith.constant 0 : i32
    %c0_i32_0 = arith.constant 0 : i32
    %c0_i32_1 = arith.constant 0 : i32
    return %c0_i32, %c0_i32_0 : i32, i32
  }
  func.func @transform_13(%arg0: i32) -> (i32, i32) {
    %c0_i32 = arith.constant 0 : i32
    %c0_i32_0 = arith.constant 0 : i32
    return %arg0, %c0_i32 : i32, i32
  }
}

module attributes {stable_mosaic.version = 11 : i64} {
  func.func @_encoder_layer_kernel(%arg0: i32, %arg1: memref<8x256xf32, #tpu.memory_space<vmem>>, %arg2: memref<256x768xbf16, #tpu.memory_space<vmem>>, %arg3: memref<1x768xf32, #tpu.memory_space<vmem>>, %arg4: memref<256x256xbf16, #tpu.memory_space<vmem>>, %arg5: memref<1x256xf32, #tpu.memory_space<vmem>>, %arg6: memref<1x256xf32, #tpu.memory_space<vmem>>, %arg7: memref<1x256xf32, #tpu.memory_space<vmem>>, %arg8: memref<256x1024xbf16, #tpu.memory_space<vmem>>, %arg9: memref<1x1024xf32, #tpu.memory_space<vmem>>, %arg10: memref<1024x256xbf16, #tpu.memory_space<vmem>>, %arg11: memref<1x256xf32, #tpu.memory_space<vmem>>, %arg12: memref<1x256xf32, #tpu.memory_space<vmem>>, %arg13: memref<1x256xf32, #tpu.memory_space<vmem>>, %arg14: memref<8x256xf32, #tpu.memory_space<vmem>>) attributes {dimension_semantics = [#tpu.dimension_semantics<parallel>], iteration_bounds = array<i64: 2>, scalar_prefetch = 0 : i64, scratch_operands = 0 : i64, tpu.core_type = #tpu.core_type<tc>, window_params = [{transform_indices = @transform_0, window_bounds = array<i64: 8, 256>}, {pipeline_mode = #tpu.pipeline_mode<synchronous>, transform_indices = @transform_1, window_bounds = array<i64: 256, 768>}, {pipeline_mode = #tpu.pipeline_mode<synchronous>, transform_indices = @transform_2, window_bounds = array<i64: 1, 768>}, {pipeline_mode = #tpu.pipeline_mode<synchronous>, transform_indices = @transform_3, window_bounds = array<i64: 256, 256>}, {pipeline_mode = #tpu.pipeline_mode<synchronous>, transform_indices = @transform_4, window_bounds = array<i64: 1, 256>}, {pipeline_mode = #tpu.pipeline_mode<synchronous>, transform_indices = @transform_5, window_bounds = array<i64: 1, 256>}, {pipeline_mode = #tpu.pipeline_mode<synchronous>, transform_indices = @transform_6, window_bounds = array<i64: 1, 256>}, {pipeline_mode = #tpu.pipeline_mode<synchronous>, transform_indices = @transform_7, window_bounds = array<i64: 256, 1024>}, {pipeline_mode = #tpu.pipeline_mode<synchronous>, transform_indices = @transform_8, window_bounds = array<i64: 1, 1024>}, {pipeline_mode = #tpu.pipeline_mode<synchronous>, transform_indices = @transform_9, window_bounds = array<i64: 1024, 256>}, {pipeline_mode = #tpu.pipeline_mode<synchronous>, transform_indices = @transform_10, window_bounds = array<i64: 1, 256>}, {pipeline_mode = #tpu.pipeline_mode<synchronous>, transform_indices = @transform_11, window_bounds = array<i64: 1, 256>}, {pipeline_mode = #tpu.pipeline_mode<synchronous>, transform_indices = @transform_12, window_bounds = array<i64: 1, 256>}, {transform_indices = @transform_13, window_bounds = array<i64: 8, 256>}]} {
    %c0 = arith.constant 0 : index
    %c0_0 = arith.constant 0 : index
    %0 = vector.load %arg1[%c0, %c0_0] : memref<8x256xf32, #tpu.memory_space<vmem>>, vector<8x256xf32>
    %1 = arith.truncf %0 : vector<8x256xf32> to vector<8x256xbf16>
    %c0_1 = arith.constant 0 : index
    %c0_2 = arith.constant 0 : index
    %2 = vector.load %arg2[%c0_1, %c0_2] : memref<256x768xbf16, #tpu.memory_space<vmem>>, vector<256x768xbf16>
    %cst = arith.constant dense<0.000000e+00> : vector<8x768xf32>
    %3 = tpu.matmul %1, %2, %cst {dimension_numbers = #tpu.dot_dimension_numbers<[1], [0], [0], [1], [0, 0, 1, 1], [], []>} : vector<8x256xbf16>, vector<256x768xbf16>, vector<8x768xf32> -> vector<8x768xf32>
    %c0_3 = arith.constant 0 : index
    %c0_4 = arith.constant 0 : index
    %4 = vector.load %arg3[%c0_3, %c0_4] : memref<1x768xf32, #tpu.memory_space<vmem>>, vector<1x768xf32>
    %5 = vector.broadcast %4 : vector<1x768xf32> to vector<8x768xf32>
    %6 = arith.addf %3, %5 : vector<8x768xf32>
    %7 = vector.extract_strided_slice %6 {offsets = [0, 0], sizes = [8, 256], strides = [1, 1]} : vector<8x768xf32> to vector<8x256xf32>
    %8 = vector.extract_strided_slice %6 {offsets = [0, 256], sizes = [8, 256], strides = [1, 1]} : vector<8x768xf32> to vector<8x256xf32>
    %9 = vector.extract_strided_slice %6 {offsets = [0, 512], sizes = [8, 256], strides = [1, 1]} : vector<8x768xf32> to vector<8x256xf32>
    %10 = vector.extract_strided_slice %7 {offsets = [0, 0], sizes = [8, 128], strides = [1, 1]} : vector<8x256xf32> to vector<8x128xf32>
    %11 = arith.truncf %10 : vector<8x128xf32> to vector<8x128xbf16>
    %12 = vector.extract_strided_slice %8 {offsets = [0, 0], sizes = [8, 128], strides = [1, 1]} : vector<8x256xf32> to vector<8x128xf32>
    %13 = arith.truncf %12 : vector<8x128xf32> to vector<8x128xbf16>
    %14 = vector.extract_strided_slice %9 {offsets = [0, 0], sizes = [8, 128], strides = [1, 1]} : vector<8x256xf32> to vector<8x128xf32>
    %15 = arith.truncf %14 : vector<8x128xf32> to vector<8x128xbf16>
    "tpu.trace_start"() <{level = 10 : i32, message = "qd,kd->qk"}> : () -> ()
    %cst_5 = arith.constant dense<0.000000e+00> : vector<8x8xf32>
    %16 = tpu.matmul %11, %13, %cst_5 {dimension_numbers = #tpu.dot_dimension_numbers<[1], [1], [0], [0], [0, 0, 1, 0], [], []>} : vector<8x128xbf16>, vector<8x128xbf16>, vector<8x8xf32> -> vector<8x8xf32>
    "tpu.trace_stop"() : () -> ()
    %cst_6 = arith.constant 0.0883883461 : f32
    %17 = vector.broadcast %cst_6 : f32 to vector<8x8xf32>
    %18 = arith.mulf %16, %17 : vector<8x8xf32>
    %cst_7 = arith.constant dense<0xFF800000> : vector<8xf32>
    %19 = vector.multi_reduction <maximumf>, %18, %cst_7 [1] : vector<8x8xf32> to vector<8xf32>
    %20 = vector.shape_cast %19 : vector<8xf32> to vector<8x1xf32>
    %21 = vector.broadcast %20 : vector<8x1xf32> to vector<8x8xf32>
    %22 = arith.subf %18, %21 : vector<8x8xf32>
    %23 = math.exp %22 : vector<8x8xf32>
    %cst_8 = arith.constant dense<0.000000e+00> : vector<8xf32>
    %24 = vector.multi_reduction <add>, %23, %cst_8 [1] : vector<8x8xf32> to vector<8xf32>
    %25 = vector.shape_cast %24 : vector<8xf32> to vector<8x1xf32>
    %26 = tpu.reciprocal %25 {approx = true} : vector<8x1xf32> -> vector<8x1xf32>
    %27 = vector.broadcast %26 : vector<8x1xf32> to vector<8x8xf32>
    %28 = arith.mulf %23, %27 : vector<8x8xf32>
    %29 = arith.truncf %28 : vector<8x8xf32> to vector<8x8xbf16>
    %cst_9 = arith.constant dense<0.000000e+00> : vector<8x128xf32>
    %30 = tpu.matmul %29, %15, %cst_9 {dimension_numbers = #tpu.dot_dimension_numbers<[1], [0], [0], [1], [0, 0, 1, 1], [], []>} : vector<8x8xbf16>, vector<8x128xbf16>, vector<8x128xf32> -> vector<8x128xf32>
    %31 = vector.extract_strided_slice %7 {offsets = [0, 128], sizes = [8, 128], strides = [1, 1]} : vector<8x256xf32> to vector<8x128xf32>
    %32 = arith.truncf %31 : vector<8x128xf32> to vector<8x128xbf16>
    %33 = vector.extract_strided_slice %8 {offsets = [0, 128], sizes = [8, 128], strides = [1, 1]} : vector<8x256xf32> to vector<8x128xf32>
    %34 = arith.truncf %33 : vector<8x128xf32> to vector<8x128xbf16>
    %35 = vector.extract_strided_slice %9 {offsets = [0, 128], sizes = [8, 128], strides = [1, 1]} : vector<8x256xf32> to vector<8x128xf32>
    %36 = arith.truncf %35 : vector<8x128xf32> to vector<8x128xbf16>
    "tpu.trace_start"() <{level = 10 : i32, message = "qd,kd->qk"}> : () -> ()
    %cst_10 = arith.constant dense<0.000000e+00> : vector<8x8xf32>
    %37 = tpu.matmul %32, %34, %cst_10 {dimension_numbers = #tpu.dot_dimension_numbers<[1], [1], [0], [0], [0, 0, 1, 0], [], []>} : vector<8x128xbf16>, vector<8x128xbf16>, vector<8x8xf32> -> vector<8x8xf32>
    "tpu.trace_stop"() : () -> ()
    %cst_11 = arith.constant 0.0883883461 : f32
    %38 = vector.broadcast %cst_11 : f32 to vector<8x8xf32>
    %39 = arith.mulf %37, %38 : vector<8x8xf32>
    %cst_12 = arith.constant dense<0xFF800000> : vector<8xf32>
    %40 = vector.multi_reduction <maximumf>, %39, %cst_12 [1] : vector<8x8xf32> to vector<8xf32>
    %41 = vector.shape_cast %40 : vector<8xf32> to vector<8x1xf32>
    %42 = vector.broadcast %41 : vector<8x1xf32> to vector<8x8xf32>
    %43 = arith.subf %39, %42 : vector<8x8xf32>
    %44 = math.exp %43 : vector<8x8xf32>
    %cst_13 = arith.constant dense<0.000000e+00> : vector<8xf32>
    %45 = vector.multi_reduction <add>, %44, %cst_13 [1] : vector<8x8xf32> to vector<8xf32>
    %46 = vector.shape_cast %45 : vector<8xf32> to vector<8x1xf32>
    %47 = tpu.reciprocal %46 {approx = true} : vector<8x1xf32> -> vector<8x1xf32>
    %48 = vector.broadcast %47 : vector<8x1xf32> to vector<8x8xf32>
    %49 = arith.mulf %44, %48 : vector<8x8xf32>
    %50 = arith.truncf %49 : vector<8x8xf32> to vector<8x8xbf16>
    %cst_14 = arith.constant dense<0.000000e+00> : vector<8x128xf32>
    %51 = tpu.matmul %50, %36, %cst_14 {dimension_numbers = #tpu.dot_dimension_numbers<[1], [0], [0], [1], [0, 0, 1, 1], [], []>} : vector<8x8xbf16>, vector<8x128xbf16>, vector<8x128xf32> -> vector<8x128xf32>
    %52 = tpu.concatenate %30, %51 in 1 : vector<8x128xf32>, vector<8x128xf32> -> vector<8x256xf32>
    %53 = arith.truncf %52 : vector<8x256xf32> to vector<8x256xbf16>
    %c0_15 = arith.constant 0 : index
    %c0_16 = arith.constant 0 : index
    %54 = vector.load %arg4[%c0_15, %c0_16] : memref<256x256xbf16, #tpu.memory_space<vmem>>, vector<256x256xbf16>
    %cst_17 = arith.constant dense<0.000000e+00> : vector<8x256xf32>
    %55 = tpu.matmul %53, %54, %cst_17 {dimension_numbers = #tpu.dot_dimension_numbers<[1], [0], [0], [1], [0, 0, 1, 1], [], []>} : vector<8x256xbf16>, vector<256x256xbf16>, vector<8x256xf32> -> vector<8x256xf32>
    %c0_18 = arith.constant 0 : index
    %c0_19 = arith.constant 0 : index
    %56 = vector.load %arg5[%c0_18, %c0_19] : memref<1x256xf32, #tpu.memory_space<vmem>>, vector<1x256xf32>
    %57 = vector.broadcast %56 : vector<1x256xf32> to vector<8x256xf32>
    %58 = arith.addf %55, %57 : vector<8x256xf32>
    %59 = arith.addf %58, %0 : vector<8x256xf32>
    %c0_20 = arith.constant 0 : index
    %c0_21 = arith.constant 0 : index
    %60 = vector.load %arg6[%c0_20, %c0_21] : memref<1x256xf32, #tpu.memory_space<vmem>>, vector<1x256xf32>
    %c0_22 = arith.constant 0 : index
    %c0_23 = arith.constant 0 : index
    %61 = vector.load %arg7[%c0_22, %c0_23] : memref<1x256xf32, #tpu.memory_space<vmem>>, vector<1x256xf32>
    %cst_24 = arith.constant dense<0.000000e+00> : vector<8xf32>
    %62 = vector.multi_reduction <add>, %59, %cst_24 [1] : vector<8x256xf32> to vector<8xf32>
    %63 = vector.shape_cast %62 : vector<8xf32> to vector<8x1xf32>
    %cst_25 = arith.constant 2.560000e+02 : f32
    %64 = vector.broadcast %cst_25 : f32 to vector<8x1xf32>
    %65 = arith.divf %63, %64 : vector<8x1xf32>
    %66 = vector.broadcast %65 : vector<8x1xf32> to vector<8x256xf32>
    %67 = arith.subf %59, %66 : vector<8x256xf32>
    %68 = arith.mulf %67, %67 : vector<8x256xf32>
    %cst_26 = arith.constant dense<0.000000e+00> : vector<8xf32>
    %69 = vector.multi_reduction <add>, %68, %cst_26 [1] : vector<8x256xf32> to vector<8xf32>
    %70 = vector.shape_cast %69 : vector<8xf32> to vector<8x1xf32>
    %cst_27 = arith.constant 2.560000e+02 : f32
    %71 = vector.broadcast %cst_27 : f32 to vector<8x1xf32>
    %72 = arith.divf %70, %71 : vector<8x1xf32>
    %cst_28 = arith.constant 9.99999996E-13 : f32
    %73 = vector.broadcast %cst_28 : f32 to vector<8x1xf32>
    %74 = arith.addf %72, %73 : vector<8x1xf32>
    %75 = math.rsqrt %74 : vector<8x1xf32>
    %76 = vector.broadcast %75 : vector<8x1xf32> to vector<8x256xf32>
    %77 = arith.mulf %67, %76 : vector<8x256xf32>
    %78 = vector.broadcast %60 : vector<1x256xf32> to vector<8x256xf32>
    %79 = arith.mulf %77, %78 : vector<8x256xf32>
    %80 = vector.broadcast %61 : vector<1x256xf32> to vector<8x256xf32>
    %81 = arith.addf %79, %80 : vector<8x256xf32>
    %82 = arith.truncf %81 : vector<8x256xf32> to vector<8x256xbf16>
    %c0_29 = arith.constant 0 : index
    %c0_30 = arith.constant 0 : index
    %83 = vector.load %arg8[%c0_29, %c0_30] : memref<256x1024xbf16, #tpu.memory_space<vmem>>, vector<256x1024xbf16>
    %cst_31 = arith.constant dense<0.000000e+00> : vector<8x1024xf32>
    %84 = tpu.matmul %82, %83, %cst_31 {dimension_numbers = #tpu.dot_dimension_numbers<[1], [0], [0], [1], [0, 0, 1, 1], [], []>} : vector<8x256xbf16>, vector<256x1024xbf16>, vector<8x1024xf32> -> vector<8x1024xf32>
    %c0_32 = arith.constant 0 : index
    %c0_33 = arith.constant 0 : index
    %85 = vector.load %arg9[%c0_32, %c0_33] : memref<1x1024xf32, #tpu.memory_space<vmem>>, vector<1x1024xf32>
    %86 = vector.broadcast %85 : vector<1x1024xf32> to vector<8x1024xf32>
    %87 = arith.addf %84, %86 : vector<8x1024xf32>
    %cst_34 = arith.constant 5.000000e-01 : f32
    %88 = vector.broadcast %cst_34 : f32 to vector<8x1024xf32>
    %89 = arith.mulf %88, %87 : vector<8x1024xf32>
    %cst_35 = arith.constant 4.471500e-02 : f32
    %90 = vector.broadcast %cst_35 : f32 to vector<8x1024xf32>
    %91 = arith.mulf %90, %87 : vector<8x1024xf32>
    %92 = arith.mulf %91, %87 : vector<8x1024xf32>
    %93 = arith.mulf %92, %87 : vector<8x1024xf32>
    %94 = arith.addf %87, %93 : vector<8x1024xf32>
    %cst_36 = arith.constant 0.797884583 : f32
    %95 = vector.broadcast %cst_36 : f32 to vector<8x1024xf32>
    %96 = arith.mulf %95, %94 : vector<8x1024xf32>
    %97 = math.tanh %96 : vector<8x1024xf32>
    %cst_37 = arith.constant 1.000000e+00 : f32
    %98 = vector.broadcast %cst_37 : f32 to vector<8x1024xf32>
    %99 = arith.addf %98, %97 : vector<8x1024xf32>
    %100 = arith.mulf %89, %99 : vector<8x1024xf32>
    %101 = arith.truncf %100 : vector<8x1024xf32> to vector<8x1024xbf16>
    %c0_38 = arith.constant 0 : index
    %c0_39 = arith.constant 0 : index
    %102 = vector.load %arg10[%c0_38, %c0_39] : memref<1024x256xbf16, #tpu.memory_space<vmem>>, vector<1024x256xbf16>
    %cst_40 = arith.constant dense<0.000000e+00> : vector<8x256xf32>
    %103 = tpu.matmul %101, %102, %cst_40 {dimension_numbers = #tpu.dot_dimension_numbers<[1], [0], [0], [1], [0, 0, 1, 1], [], []>} : vector<8x1024xbf16>, vector<1024x256xbf16>, vector<8x256xf32> -> vector<8x256xf32>
    %c0_41 = arith.constant 0 : index
    %c0_42 = arith.constant 0 : index
    %104 = vector.load %arg11[%c0_41, %c0_42] : memref<1x256xf32, #tpu.memory_space<vmem>>, vector<1x256xf32>
    %105 = vector.broadcast %104 : vector<1x256xf32> to vector<8x256xf32>
    %106 = arith.addf %103, %105 : vector<8x256xf32>
    %107 = arith.addf %106, %81 : vector<8x256xf32>
    %c0_43 = arith.constant 0 : index
    %c0_44 = arith.constant 0 : index
    %108 = vector.load %arg12[%c0_43, %c0_44] : memref<1x256xf32, #tpu.memory_space<vmem>>, vector<1x256xf32>
    %c0_45 = arith.constant 0 : index
    %c0_46 = arith.constant 0 : index
    %109 = vector.load %arg13[%c0_45, %c0_46] : memref<1x256xf32, #tpu.memory_space<vmem>>, vector<1x256xf32>
    %cst_47 = arith.constant dense<0.000000e+00> : vector<8xf32>
    %110 = vector.multi_reduction <add>, %107, %cst_47 [1] : vector<8x256xf32> to vector<8xf32>
    %111 = vector.shape_cast %110 : vector<8xf32> to vector<8x1xf32>
    %cst_48 = arith.constant 2.560000e+02 : f32
    %112 = vector.broadcast %cst_48 : f32 to vector<8x1xf32>
    %113 = arith.divf %111, %112 : vector<8x1xf32>
    %114 = vector.broadcast %113 : vector<8x1xf32> to vector<8x256xf32>
    %115 = arith.subf %107, %114 : vector<8x256xf32>
    %116 = arith.mulf %115, %115 : vector<8x256xf32>
    %cst_49 = arith.constant dense<0.000000e+00> : vector<8xf32>
    %117 = vector.multi_reduction <add>, %116, %cst_49 [1] : vector<8x256xf32> to vector<8xf32>
    %118 = vector.shape_cast %117 : vector<8xf32> to vector<8x1xf32>
    %cst_50 = arith.constant 2.560000e+02 : f32
    %119 = vector.broadcast %cst_50 : f32 to vector<8x1xf32>
    %120 = arith.divf %118, %119 : vector<8x1xf32>
    %cst_51 = arith.constant 9.99999996E-13 : f32
    %121 = vector.broadcast %cst_51 : f32 to vector<8x1xf32>
    %122 = arith.addf %120, %121 : vector<8x1xf32>
    %123 = math.rsqrt %122 : vector<8x1xf32>
    %124 = vector.broadcast %123 : vector<8x1xf32> to vector<8x256xf32>
    %125 = arith.mulf %115, %124 : vector<8x256xf32>
    %126 = vector.broadcast %108 : vector<1x256xf32> to vector<8x256xf32>
    %127 = arith.mulf %125, %126 : vector<8x256xf32>
    %128 = vector.broadcast %109 : vector<1x256xf32> to vector<8x256xf32>
    %129 = arith.addf %127, %128 : vector<8x256xf32>
    %c0_52 = arith.constant 0 : index
    %c0_53 = arith.constant 0 : index
    %130 = vector.load %arg14[%c0_52, %c0_53] : memref<8x256xf32, #tpu.memory_space<vmem>>, vector<8x256xf32>
    tpu.vector_store %arg14[%c0_52, %c0_53], %129 {strides = array<i32>} : memref<8x256xf32, #tpu.memory_space<vmem>>, vector<8x256xf32>,
    return
  }
  func.func @transform_0(%arg0: i32) -> (i32, i32) {
    %c0_i32 = arith.constant 0 : i32
    %c0_i32_0 = arith.constant 0 : i32
    return %arg0, %c0_i32 : i32, i32
  }
  func.func @transform_1(%arg0: i32) -> (i32, i32) {
    %c0_i32 = arith.constant 0 : i32
    %c0_i32_0 = arith.constant 0 : i32
    %c0_i32_1 = arith.constant 0 : i32
    return %c0_i32, %c0_i32_0 : i32, i32
  }
  func.func @transform_2(%arg0: i32) -> (i32, i32) {
    %c0_i32 = arith.constant 0 : i32
    %c0_i32_0 = arith.constant 0 : i32
    %c0_i32_1 = arith.constant 0 : i32
    return %c0_i32, %c0_i32_0 : i32, i32
  }
  func.func @transform_3(%arg0: i32) -> (i32, i32) {
    %c0_i32 = arith.constant 0 : i32
    %c0_i32_0 = arith.constant 0 : i32
    %c0_i32_1 = arith.constant 0 : i32
    return %c0_i32, %c0_i32_0 : i32, i32
  }
  func.func @transform_4(%arg0: i32) -> (i32, i32) {
    %c0_i32 = arith.constant 0 : i32
    %c0_i32_0 = arith.constant 0 : i32
    %c0_i32_1 = arith.constant 0 : i32
    return %c0_i32, %c0_i32_0 : i32, i32
  }
  func.func @transform_5(%arg0: i32) -> (i32, i32) {
    %c0_i32 = arith.constant 0 : i32
    %c0_i32_0 = arith.constant 0 : i32
    %c0_i32_1 = arith.constant 0 : i32
    return %c0_i32, %c0_i32_0 : i32, i32
  }
  func.func @transform_6(%arg0: i32) -> (i32, i32) {
    %c0_i32 = arith.constant 0 : i32
    %c0_i32_0 = arith.constant 0 : i32
    %c0_i32_1 = arith.constant 0 : i32
    return %c0_i32, %c0_i32_0 : i32, i32
  }
  func.func @transform_7(%arg0: i32) -> (i32, i32) {
    %c0_i32 = arith.constant 0 : i32
    %c0_i32_0 = arith.constant 0 : i32
    %c0_i32_1 = arith.constant 0 : i32
    return %c0_i32, %c0_i32_0 : i32, i32
  }
  func.func @transform_8(%arg0: i32) -> (i32, i32) {
    %c0_i32 = arith.constant 0 : i32
    %c0_i32_0 = arith.constant 0 : i32
    %c0_i32_1 = arith.constant 0 : i32
    return %c0_i32, %c0_i32_0 : i32, i32
  }
  func.func @transform_9(%arg0: i32) -> (i32, i32) {
    %c0_i32 = arith.constant 0 : i32
    %c0_i32_0 = arith.constant 0 : i32
    %c0_i32_1 = arith.constant 0 : i32
    return %c0_i32, %c0_i32_0 : i32, i32
  }
  func.func @transform_10(%arg0: i32) -> (i32, i32) {
    %c0_i32 = arith.constant 0 : i32
    %c0_i32_0 = arith.constant 0 : i32
    %c0_i32_1 = arith.constant 0 : i32
    return %c0_i32, %c0_i32_0 : i32, i32
  }
  func.func @transform_11(%arg0: i32) -> (i32, i32) {
    %c0_i32 = arith.constant 0 : i32
    %c0_i32_0 = arith.constant 0 : i32
    %c0_i32_1 = arith.constant 0 : i32
    return %c0_i32, %c0_i32_0 : i32, i32
  }
  func.func @transform_12(%arg0: i32) -> (i32, i32) {
    %c0_i32 = arith.constant 0 : i32
    %c0_i32_0 = arith.constant 0 : i32
    %c0_i32_1 = arith.constant 0 : i32
    return %c0_i32, %c0_i32_0 : i32, i32
  }
  func.func @transform_13(%arg0: i32) -> (i32, i32) {
    %c0_i32 = arith.constant 0 : i32
    %c0_i32_0 = arith.constant 0 : i32
    return %arg0, %c0_i32 : i32, i32
  }
}

module attributes {stable_mosaic.version = 11 : i64} {
  func.func @_pooler_fc_kernel(%arg0: memref<2x256xf32, #tpu.memory_space<vmem>>, %arg1: memref<256x256xbf16, #tpu.memory_space<vmem>>, %arg2: memref<1x256xf32, #tpu.memory_space<vmem>>, %arg3: memref<256x128xbf16, #tpu.memory_space<vmem>>, %arg4: memref<1x128xf32, #tpu.memory_space<vmem>>, %arg5: memref<2x128xf32, #tpu.memory_space<vmem>>) attributes {dimension_semantics = [], scalar_prefetch = 0 : i64, scratch_operands = 0 : i64, tpu.core_type = #tpu.core_type<tc>} {
    %c0 = arith.constant 0 : index
    %c0_0 = arith.constant 0 : index
    %0 = vector.load %arg0[%c0, %c0_0] : memref<2x256xf32, #tpu.memory_space<vmem>>, vector<2x256xf32>
    %1 = arith.truncf %0 : vector<2x256xf32> to vector<2x256xbf16>
    %c0_1 = arith.constant 0 : index
    %c0_2 = arith.constant 0 : index
    %2 = vector.load %arg1[%c0_1, %c0_2] : memref<256x256xbf16, #tpu.memory_space<vmem>>, vector<256x256xbf16>
    %cst = arith.constant dense<0.000000e+00> : vector<2x256xf32>
    %3 = tpu.matmul %1, %2, %cst {dimension_numbers = #tpu.dot_dimension_numbers<[1], [0], [0], [1], [0, 0, 1, 1], [], []>} : vector<2x256xbf16>, vector<256x256xbf16>, vector<2x256xf32> -> vector<2x256xf32>
    %c0_3 = arith.constant 0 : index
    %c0_4 = arith.constant 0 : index
    %4 = vector.load %arg2[%c0_3, %c0_4] : memref<1x256xf32, #tpu.memory_space<vmem>>, vector<1x256xf32>
    %5 = vector.broadcast %4 : vector<1x256xf32> to vector<2x256xf32>
    %6 = arith.addf %3, %5 : vector<2x256xf32>
    %7 = math.tanh %6 : vector<2x256xf32>
    %8 = arith.truncf %7 : vector<2x256xf32> to vector<2x256xbf16>
    %c0_5 = arith.constant 0 : index
    %c0_6 = arith.constant 0 : index
    %9 = vector.load %arg3[%c0_5, %c0_6] : memref<256x128xbf16, #tpu.memory_space<vmem>>, vector<256x128xbf16>
    %cst_7 = arith.constant dense<0.000000e+00> : vector<2x128xf32>
    %10 = tpu.matmul %8, %9, %cst_7 {dimension_numbers = #tpu.dot_dimension_numbers<[1], [0], [0], [1], [0, 0, 1, 1], [], []>} : vector<2x256xbf16>, vector<256x128xbf16>, vector<2x128xf32> -> vector<2x128xf32>
    %c0_8 = arith.constant 0 : index
    %c0_9 = arith.constant 0 : index
    %11 = vector.load %arg4[%c0_8, %c0_9] : memref<1x128xf32, #tpu.memory_space<vmem>>, vector<1x128xf32>
    %12 = vector.broadcast %11 : vector<1x128xf32> to vector<2x128xf32>
    %13 = arith.addf %10, %12 : vector<2x128xf32>
    %c0_10 = arith.constant 0 : index
    %c0_11 = arith.constant 0 : index
    %14 = vector.load %arg5[%c0_10, %c0_11] : memref<2x128xf32, #tpu.memory_space<vmem>>, vector<2x128xf32>
    tpu.vector_store %arg5[%c0_10, %c0_11], %13 {strides = array<i32>} : memref<2x128xf32, #tpu.memory_space<vmem>>, vector<2x128xf32>,
    return
  }
}

</mosaic_0001>

<bundles_post_ra>
// kernel: bert_classifier_forward.4
= control target key start
LH: loop header
LB: loop body
LE: loop exit
PB: predicated region body
PF: predicated region fallthrough
CT: control target
= control target key end

     0   :  { %s408_s18 = smov 0   ;;  %s447_s0 = inlined_call_operand.vmem [shape: f32[16,256], index: 0, kind: input, shape index: {}]   ;;  %s448_s1 = inlined_call_operand.vmem [shape: f32[8,256], index: 1, kind: input, shape index: {}]   ;;  %s449_s2 = inlined_call_operand.vmem [shape: f32[1,256], index: 2, kind: input, shape index: {}]   ;;  %s450_s3 = inlined_call_operand.vmem [shape: f32[1,256], index: 3, kind: input, shape index: {}]   ;;  %s451_s4 = inlined_call_operand.vmem [shape: f32[1,256], index: 4, kind: input, shape index: {}]   ;;  %s452_s5 = inlined_call_operand.vmem [shape: f32[16,256], index: 5, kind: output, shape index: {}]  }
   0x1 LB: > { %s347_s19 = sadd.s32 4294967295, %s376_s18   ;;  %p351_p0 = scmp.ge.s32.totalorder %s376_s18, 1  ;;  %s376_s18 = sphi %s408_s18, %s15_s18  }
   0x2   : > { %p187_p1 = scmp.lt.s32.totalorder %s376_s18, 3 }
   0x4   : > { %p188_p2 = pnand %p351_p0, %p187_p1 }
   0x5   : > { %p215_p3 = scmp.lt.s32.totalorder (!%p188_p2), %s347_s19, 1  ;;  %v233_v0 = vlaneseq (!%p188_p2)  ;;  %v231_v2 = vld [vmem:[%s449_s2] sm:$0x3] (!%p188_p2)  ;;  %v228_v4 = vld [vmem:[%s448_s1 + $0x8] sm:$0xff] (!%p188_p2) }
   0x6   : > { %191 = sbr.rel (%p188_p2) target bundleno = 337 (0x151), region = 40  ;;  %v227_v3 = vld [vmem:[%s448_s1] sm:$0xff] (!%p188_p2) }
   0x7   : > { %v234_v1 = vshrl.u32 (!%p188_p2), %v233_v0, 7  ;;  %v245_v26 = vld [vmem:[%s450_s3] sm:$0x3] (!%p188_p2) }
   0x8   : > { %v246_v27 = vld [vmem:[%s451_s4] sm:$0x3] (!%p188_p2) }
   0x9   : > { %v235_v5 = vsub.s32 (!%p188_p2), 0, %v234_v1  ;;  %v239_v6 = vsub.s32 (!%p188_p2), 1, %v234_v1 }
   0xb   : > { %v236_v9 = vrot.slane (!%p188_p2), %v231_v2, %v235_v5  ;;  %v240_v10 = vrot.slane (!%p188_p2), %v231_v2, %v239_v6  ;;  %v268_v28 = vrot.slane (!%p188_p2), %v245_v26, %v235_v5  ;;  %v272_v29 = vrot.slane (!%p188_p2), %v245_v26, %v239_v6 }
   0xc   : > { %v281_v31 = vrot.slane (!%p188_p2), %v246_v27, %v235_v5  ;;  %v285_v32 = vrot.slane (!%p188_p2), %v246_v27, %v239_v6 }
   0xd   : > { %s454_s19 = smov (!%p215_p3, %s347_s19), 1 }
   0xe   : > { %s358_s22 = sshll.u32 %s454_s19, 4 }
   0xf   : > { %s219_s29 = scalar_lea.vmem %s447_s0, %s358_s22  ;;  %s224_s11 = scalar_lea.vmem %s452_s5, %s358_s22 }
  0x10   : > { %v225_v7 = vld [vmem:[%s219_s29] sm:$0xff]  ;;  %v226_v8 = vld [vmem:[%s219_s29 + $0x8] sm:$0xff] }
  0x11   : > { %v229_v11 = vadd.f32 %v227_v3, %v225_v7  ;;  %v230_v12 = vadd.f32 %v228_v4, %v226_v8 }
  0x13   : > { %v243_v13 = vadd.f32 %v236_v9, %v229_v11  ;;  %v244_v14 = vadd.f32 %v240_v10, %v230_v12 }
  0x15   : > { %v247_v15 = vadd.f32 %v244_v14, %v243_v13 }
  0x17   : > { %248 = vadd.xlane.f32.xlu0 %v247_v15 }
  0xa4   : > { %v249_v16 = vpop.xlane.xlu0 %248 }
  0xa5   : > { %v251_v17 = vmul.f32 0.00390625, %v249_v16 }
  0xa7   : > { %v252_v18 = vsub.f32 %v243_v13, %v251_v17  ;;  %v253_v19 = vsub.f32 %v244_v14, %v251_v17 }
  0xa9   : > { %v254_v20 = vmul.f32 %v252_v18, %v252_v18  ;;  %v255_v21 = vmul.f32 %v253_v19, %v253_v19 }
  0xab   : > { %v256_v22 = vadd.f32 %v255_v21, %v254_v20 }
  0xad   : > { %257 = vadd.xlane.f32.xlu0 %v256_v22 }
 0x13a   : > { %v258_v23 = vpop.xlane.xlu0 %257 }
 0x13b   : > { %v259_v24 = vmul.f32 0.00390625, %v258_v23 }
 0x13d   : > { %v260_v25 = vadd.f32 1e-12, %v259_v24 }
 0x13f   : > { %368 = vrsqrt.f32 %v260_v25 }
 0x149   : > { %v369_v30 = vpop.eup %368 }
 0x14a   : > { %v262_v33 = vmul.f32 %v369_v30, %v252_v18  ;;  %v263_v34 = vmul.f32 %v369_v30, %v253_v19 }
 0x14c   : > { %v275_v35 = vmul.f32 %v268_v28, %v262_v33  ;;  %v276_v36 = vmul.f32 %v272_v29, %v263_v34 }
 0x14e   : > { %v288_v37 = vadd.f32 %v281_v31, %v275_v35  ;;  %v289_v38 = vadd.f32 %v285_v32, %v276_v36 }
 0x150   : > { %290 = vst [vmem:[%s224_s11] sm:$0xff] %v288_v37  ;;  %291 = vst [vmem:[%s224_s11 + $0x8] sm:$0xff] %v289_v38 }
 0x151 PF: > { %s15_s18 = sadd.s32 1, %s376_s18  }
 0x152   : > { %p12_p4 = scmp.ge.s32.totalorder %s15_s18, 4  }
 0x154   :  { %14 = sbr.rel (!%p12_p4) target bundleno = 1 (0x1), region = 70 }

// kernel: bert_classifier_forward.7
= control target key start
LH: loop header
LB: loop body
LE: loop exit
PB: predicated region body
PF: predicated region fallthrough
CT: control target
= control target key end

     0   :  { %s836_s0 = inlined_call_operand.vmem [shape: f32[2,256], index: 0, kind: input, shape index: {}]   ;;  %s837_s1 = inlined_call_operand.vmem [shape: bf16[256,256], index: 1, kind: input, shape index: {}]   ;;  %s838_s2 = inlined_call_operand.vmem [shape: f32[1,256], index: 2, kind: input, shape index: {}]   ;;  %s839_s3 = inlined_call_operand.vmem [shape: bf16[256,128], index: 3, kind: input, shape index: {}]   ;;  %s840_s4 = inlined_call_operand.vmem [shape: f32[1,128], index: 4, kind: input, shape index: {}]   ;;  %s841_s5 = inlined_call_operand.hbm [shape: f32[2,128], index: 5, kind: output, shape index: {}]  }
   0x1   :  { %v548_v0 = vld [vmem:[%s837_s1 + $0x4] ss:$8 sps:$4 sm:$0xff]   ;;  %v550_v1 = vld [vmem:[%s837_s1] ss:$8 sps:$4 sm:$0xff]   ;;  %v551_v2 = vld [vmem:[%s837_s1 + $0x14] ss:$8 sps:$4 sm:$0xff]  }
   0x2   :  { %240 = vmatprep.subr.bf16.mxu0 %v548_v0  ;;  %v553_v3 = vld [vmem:[%s837_s1 + $0x10] ss:$8 sps:$4 sm:$0xff]   ;;  %v554_v4 = vld [vmem:[%s837_s1 + $0x24] ss:$8 sps:$4 sm:$0xff]   ;;  %v556_v5 = vld [vmem:[%s837_s1 + $0x20] ss:$8 sps:$4 sm:$0xff]  }
   0x3   :  { %241 = vmatpush1.bf16.msra.mxu0 %v550_v1  ;;  %v557_v6 = vld [vmem:[%s837_s1 + $0x34] ss:$8 sps:$4 sm:$0xff]   ;;  %v559_v7 = vld [vmem:[%s837_s1 + $0x30] ss:$8 sps:$4 sm:$0xff]   ;;  %v560_v8 = vld [vmem:[%s837_s1 + $0x44] ss:$8 sps:$4 sm:$0xff]  }
   0x4   :  { %242 = vmatprep.subr.bf16.mxu0 %v551_v2  ;;  %v562_v9 = vld [vmem:[%s837_s1 + $0x40] ss:$8 sps:$4 sm:$0xff]   ;;  %v563_v10 = vld [vmem:[%s837_s1 + $0x54] ss:$8 sps:$4 sm:$0xff]   ;;  %v565_v11 = vld [vmem:[%s837_s1 + $0x50] ss:$8 sps:$4 sm:$0xff]  }
   0x5   :  { %v566_v12 = vld [vmem:[%s837_s1 + $0x64] ss:$8 sps:$4 sm:$0xff]   ;;  %v568_v13 = vld [vmem:[%s837_s1 + $0x60] ss:$8 sps:$4 sm:$0xff]   ;;  %v569_v15 = vld [vmem:[%s837_s1 + $0x74] ss:$8 sps:$4 sm:$0xff]  }
   0x6   :  { %v475_v14 = vld.sshfl [vmem:[%s836_s0] sm:$0x33 pattern:$0x76325410]  ;;  %v598_v20 = vld [vmem:[%s839_s3 + $0x48] sm:$0xff]   ;;  %v600_v22 = vld [vmem:[%s839_s3 + $0x50] sm:$0xff]  }
   0x7   :  { %243 = vmatpush1.bf16.msra.mxu0 %v553_v3  ;;  %v31_v16 = vcombine.high %v475_v14, %v475_v14  ;;  %v596_v17 = vld [vmem:[%s839_s3 + $0x40] sm:$0xff]   ;;  %v599_v21 = vld [vmem:[%s839_s3 + $0x8] sm:$0xff]   ;;  %v571_v23 = vld [vmem:[%s837_s1 + $0x70] ss:$8 sps:$4 sm:$0xff]  }
   0x8   :  { %244 = vmatprep.subr.bf16.mxu0 %v554_v4  ;;  %v597_v18 = vld [vmem:[%s839_s3] sm:$0xff]   ;;  %525 = vmatprep.subr.bf16.mxu1 %v596_v17  ;;  %v601_v26 = vld [vmem:[%s839_s3 + $0x10] sm:$0xff]   ;;  %v602_v28 = vld [vmem:[%s839_s3 + $0x58] sm:$0xff]  }
   0x9   :  { %v35_v19 = vpack.c.bf16 %v31_v16, %v31_v16  ;;  %526 = vmatpush3.bf16.msra.mxu1 %v597_v18  ;;  %v572_v24 = vld [vmem:[%s837_s1 + $0x84] ss:$8 sps:$4 sm:$0xff]   ;;  %v574_v25 = vld [vmem:[%s837_s1 + $0x80] ss:$8 sps:$4 sm:$0xff]   ;;  %v575_v27 = vld [vmem:[%s837_s1 + $0x94] ss:$8 sps:$4 sm:$0xff]  }
   0xa   :  { %527 = vmatprep.subr.bf16.mxu1 %v598_v20  ;;  %v603_v29 = vld [vmem:[%s839_s3 + $0x18] sm:$0xff]  }
   0xb   :  { %245 = vmatpush1.bf16.msra.mxu0 %v556_v5  ;;  %272 = vmatprep.mubr.bf16.mxu0 %v35_v19  ;;  %v577_v30 = vld [vmem:[%s837_s1 + $0x90] ss:$8 sps:$4 sm:$0xff]  }
   0xc   :  { %246 = vmatprep.subr.bf16.mxu0 %v557_v6 }
   0xd   :  { %528 = vmatpush3.bf16.msra.mxu1 %v599_v21 }
   0xe   :  { %529 = vmatprep.subr.bf16.mxu1 %v600_v22 }
   0xf   :  { %247 = vmatpush1.bf16.msra.mxu0 %v559_v7 }
  0x10   :  { %248 = vmatprep.subr.bf16.mxu0 %v560_v8 }
  0x11   :  { %530 = vmatpush3.bf16.msra.mxu1 %v601_v26 }
  0x12   :  { %531 = vmatprep.subr.bf16.mxu1 %v602_v28 }
  0x13   :  { %249 = vmatpush1.bf16.msra.mxu0 %v562_v9 }
  0x14   :  { %250 = vmatprep.subr.bf16.mxu0 %v563_v10 }
  0x17   :  { %251 = vmatpush1.bf16.msra.mxu0 %v565_v11 }
  0x18   :  { %252 = vmatprep.subr.bf16.mxu0 %v566_v12 }
  0x1b   :  { %253 = vmatpush1.bf16.msra.mxu0 %v568_v13 }
  0x1c   :  { %254 = vmatprep.subr.bf16.mxu0 %v569_v15 }
  0x1f   :  { %255 = vmatpush1.bf16.msra.mxu0 %v571_v23 }
  0x20   :  { %256 = vmatprep.subr.bf16.mxu0 %v572_v24 }
  0x23   :  { %257 = vmatpush1.bf16.msra.mxu0 %v574_v25 }
  0x24   :  { %10 = vsyncpa [#allocation3], 0  ;;  %258 = vmatprep.subr.bf16.mxu0 %v575_v27  ;;  %v578_v31 = vld [vmem:[%s837_s1 + $0xa4] ss:$8 sps:$4 sm:$0xff]   ;;  %532 = vmatpush3.bf16.msra.mxu1 %v603_v29  ;;  %v580_v32 = vld [vmem:[%s837_s1 + $0xa0] ss:$8 sps:$4 sm:$0xff]   ;;  %v34_v43 = vpack.c.bf16 %v475_v14, %v475_v14  ;;  %v70_v52 = vlaneseq }
  0x25   :  { %v581_v33 = vld [vmem:[%s837_s1 + $0xb4] ss:$8 sps:$4 sm:$0xff]   ;;  %v583_v34 = vld [vmem:[%s837_s1 + $0xb0] ss:$8 sps:$4 sm:$0xff]   ;;  %v584_v35 = vld [vmem:[%s837_s1 + $0xc4] ss:$8 sps:$4 sm:$0xff]  }
  0x26   :  { %v586_v36 = vld [vmem:[%s837_s1 + $0xc0] ss:$8 sps:$4 sm:$0xff]   ;;  %v587_v37 = vld [vmem:[%s837_s1 + $0xd4] ss:$8 sps:$4 sm:$0xff]   ;;  %v589_v38 = vld [vmem:[%s837_s1 + $0xd0] ss:$8 sps:$4 sm:$0xff]  }
  0x27   :  { %259 = vmatpush1.bf16.msra.mxu0 %v577_v30  ;;  %v590_v39 = vld [vmem:[%s837_s1 + $0xe4] ss:$8 sps:$4 sm:$0xff]   ;;  %v592_v40 = vld [vmem:[%s837_s1 + $0xe0] ss:$8 sps:$4 sm:$0xff]   ;;  %v593_v41 = vld [vmem:[%s837_s1 + $0xf4] ss:$8 sps:$4 sm:$0xff]  }
  0x28   :  { %260 = vmatprep.subr.bf16.mxu0 %v578_v31  ;;  %v595_v42 = vld [vmem:[%s837_s1 + $0xf0] ss:$8 sps:$4 sm:$0xff]   ;;  %v604_v44 = vld [vmem:[%s839_s3 + $0x60] sm:$0xff]   ;;  %v606_v46 = vld [vmem:[%s839_s3 + $0x68] sm:$0xff]   ;;  %v71_v53 = vshrl.u32 %v70_v52, 7  ;;  %s640_s14 = smov [#allocation2]  }
  0x29   :  { %v605_v45 = vld [vmem:[%s839_s3 + $0x20] sm:$0xff]   ;;  %533 = vmatprep.subr.bf16.mxu1 %v604_v44  ;;  %v607_v47 = vld [vmem:[%s839_s3 + $0x28] sm:$0xff]   ;;  %v608_v48 = vld [vmem:[%s839_s3 + $0x70] sm:$0xff]   ;;  %s467_s15 = sshll.u32 %s640_s14, 4  ;;  %s468_s15 = int_to_ptr.vmem [resolvable:$true] %s467_s15 }
  0x2a   :  { %534 = vmatpush3.bf16.msra.mxu1 %v605_v45  ;;  %v609_v49 = vld [vmem:[%s839_s3 + $0x30] sm:$0xff]   ;;  %v610_v50 = vld [vmem:[%s839_s3 + $0x78] sm:$0xff]   ;;  %v72_v54 = vsub.s32 0, %v71_v53  ;;  %v68_v55 = vld [vmem:[%s838_s2] sm:$0x3]  ;;  %v76_v56 = vsub.s32 1, %v71_v53  ;;  %p621_p1 = scmp.lt.s32.totalorder %s468_s15, %s468_s15 }
  0x2b   :  { %261 = vmatpush1.bf16.msra.mxu0 %v580_v32  ;;  %535 = vmatprep.subr.bf16.mxu1 %v606_v46  ;;  %v611_v51 = vld [vmem:[%s839_s3 + $0x38] sm:$0xff]   ;;  %v508_v7 = vld [vmem:[%s840_s4] ss:$0 sm:$0xff]  ;;  %s616_s16 = scalar_lea.vmem %s468_s15, 32 }
  0x2c   :  { %262 = vmatprep.subr.bf16.mxu0 %v581_v33  ;;  %v73_v57 = vrot.slane %v68_v55, %v72_v54  ;;  %v77_v58 = vrot.slane %v68_v55, %v76_v56  ;;  %p617_p0 = scmp.ne.s32.totalorder %s468_s15, %s616_s16  ;;  %p622_p2 = scmp.lt.s32.totalorder %s616_s16, %s616_s16 }
  0x2e   :  { %536 = vmatpush3.bf16.msra.mxu1 %v607_v47  ;;  %p623_p3 = por %p622_p2, %p621_p1 }
  0x2f   :  { %263 = vmatpush1.bf16.msra.mxu0 %v583_v34  ;;  %537 = vmatprep.subr.bf16.mxu1 %v608_v48 }
  0x30   :  { %264 = vmatprep.subr.bf16.mxu0 %v584_v35  ;;  %p624_p4 = pnand %p623_p3, %p617_p0 }
  0x32   :  { %538 = vmatpush3.bf16.msra.mxu1 %v609_v49 }
  0x33   :  { %265 = vmatpush1.bf16.msra.mxu0 %v586_v36  ;;  %539 = vmatprep.subr.bf16.mxu1 %v610_v50 }
  0x34   :  { %266 = vmatprep.subr.bf16.mxu0 %v587_v37 }
  0x36   :  { %540 = vmatpush3.bf16.msra.mxu1 %v611_v51 }
  0x37   :  { %267 = vmatpush1.bf16.msra.mxu0 %v589_v38 }
  0x38   :  { %268 = vmatprep.subr.bf16.mxu0 %v590_v39 }
  0x3b   :  { %269 = vmatpush1.bf16.msra.mxu0 %v592_v40 }
  0x3c   :  { %270 = vmatprep.subr.bf16.mxu0 %v593_v41 }
  0x3f   :  { %271 = vmatpush1.bf16.msra.mxu0 %v595_v42 }
  0x42   :  { %273 = vmatmul.mubr.bf16.vlgmr.msra.gmra.mrb[0].mxu0 %v34_v43 }
 0x115   :  { %v274_v59 = vpop.f32.mrb[0].mxu0 }
 0x116   :  { %v275_v60 = vadd.f32 %v274_v59, %v73_v57  ;;  %v276_v61 = vpop.f32.mrb[1].mxu0 }
 0x117   :  { %v277_v62 = vadd.f32 %v276_v61, %v77_v58  ;;  %v278_v63 = vpop.f32.mrb[2].mxu0 }
 0x118   :  { %612 = vtanh.f32 %v275_v60  ;;  %v279_v0 = vpop.f32.mrb[3].mxu0 }
 0x119   :  { %614 = vtanh.f32 %v277_v62 }
 0x122   :  { %v613_v1 = vpop.eup %612 }
 0x123   :  { %v615_v2 = vpop.eup %614  ;;  %v283_v4 = vpack.c.bf16 %v613_v1, %v613_v1 }
 0x124   :  { %v284_v3 = vpack.c.bf16 %v615_v2, %v615_v2 }
 0x126   :  { %452 = vmatprep.mubr.bf16.mxu1 %v284_v3 }
 0x127   :  { %453 = vmatmul.mubr.bf16.vlgmr.msra.gmra.mrb[0].mxu1 %v283_v4 }
 0x1fa   :  { %v541_v5 = vpop.f32.mrb[0].mxu1 }
 0x1fb   :  { %v542_v6 = vpop.f32.mrb[1].mxu1 }
 0x1fc   :  { %v543_v8 = vadd.f32 %v542_v6, %v541_v5  ;;  %v544_v9 = vpop.f32.mrb[2].mxu1 }
 0x1fd   :  { %v545_v10 = vpop.f32.mrb[3].mxu1 }
 0x1fe   :  { %v455_v11 = vadd.f32 %v543_v8, %v508_v7 }
 0x200   :  { %460 = vst [vmem:[#allocation2] sm:$0x3] %v455_v11 }
 0x201   :  { %627 = shalt.err (!%p624_p4)
}
 0x202   :  { %s628_s19 = scalar_lea.hbm %s841_s5, 32 }
 0x203   :  { %p629_p5 = scmp.ne.s32.totalorder %s841_s5, %s628_s19  ;;  %p632_p6 = scmp.lt.u32.totalorder %s628_s19, %s841_s5 }
 0x205   :  { %p634_p7 = pnand %p632_p6, %p629_p5 }
 0x207   :  { %637 = shalt.err (!%p634_p7)
}
 0x208   :  { %470 = dma.vmem_to_hbm [thread:$0]  %s468_s15, 32, %s841_s5, [#allocation3]  }
 0x209   :  { %638 = dma.done.wait [#allocation3], 32  }
 0x20a   :  { %639 = vsyncadd [#allocation3], 4294967264 }
 0x20b   :  { %474 = vsyncpa [#allocation3], 1 }

// kernel: bert_classifier_forward.6
= control target key start
LH: loop header
LB: loop body
LE: loop exit
PB: predicated region body
PF: predicated region fallthrough
CT: control target
= control target key end

     0   :  { %s4713_s25 = smov 0   ;;  %s6064_s0 = inlined_call_operand.vmem [shape: f32[16,256], index: 0, kind: input, shape index: {}]   ;;  %s6065_s1 = inlined_call_operand.vmem [shape: bf16[256,768], index: 1, kind: input, shape index: {}]   ;;  %s6066_s2 = inlined_call_operand.vmem [shape: f32[1,768], index: 2, kind: input, shape index: {}]   ;;  %s6067_s3 = inlined_call_operand.vmem [shape: bf16[256,256], index: 3, kind: input, shape index: {}]   ;;  %s6068_s4 = inlined_call_operand.vmem [shape: f32[1,256], index: 4, kind: input, shape index: {}]   ;;  %s6069_s5 = inlined_call_operand.vmem [shape: f32[1,256], index: 5, kind: input, shape index: {}]   ;;  %s6070_s6 = inlined_call_operand.vmem [shape: f32[1,256], index: 6, kind: input, shape index: {}]   ;;  %s6071_s7 = inlined_call_operand.vmem [shape: bf16[256,1024], index: 7, kind: input, shape index: {}]   ;;  %s6072_s8 = inlined_call_operand.vmem [shape: f32[1,1024], index: 8, kind: input, shape index: {}]   ;;  %s6073_s9 = inlined_call_operand.vmem [shape: bf16[1024,256], index: 9, kind: input, shape index: {}]   ;;  %s6074_s10 = inlined_call_operand.vmem [shape: f32[1,256], index: 10, kind: input, shape index: {}]   ;;  %s6075_s11 = inlined_call_operand.vmem [shape: f32[1,256], index: 11, kind: input, shape index: {}]   ;;  %s6076_s12 = inlined_call_operand.vmem [shape: f32[1,256], index: 12, kind: input, shape index: {}]   ;;  %s6077_s13 = inlined_call_operand.vmem [shape: f32[16,256], index: 13, kind: output, shape index: {}]  }
   0x1 LB: > { %s3780_s26 = sadd.s32 4294967295, %s4639_s25   ;;  %p3784_p0 = scmp.ge.s32.totalorder %s4639_s25, 1  ;;  %s4639_s25 = sphi %s4713_s25, %s23_s25  }
   0x2   : > { %p387_p1 = scmp.lt.s32.totalorder %s4639_s25, 3 }
   0x4   : > { %p388_p2 = pnand %p3784_p0, %p387_p1 }
   0x5   : > { %v4221_v0 = vld [vmem:[%s6065_s1 + $0xc] ss:$24 sps:$4 sm:$0xff] (!%p388_p2)   ;;  %v4223_v1 = vld [vmem:[%s6065_s1 + $0x8] ss:$24 sps:$4 sm:$0xff] (!%p388_p2)   ;;  %v4224_v2 = vld [vmem:[%s6065_s1 + $0x3c] ss:$24 sps:$4 sm:$0xff] (!%p388_p2)  }
   0x6   : > { %391 = sbr.rel (%p388_p2) target bundleno = 2419 (0x973), region = 72  ;;  %1095 = vmatprep.subr.bf16.mxu1 (!%p388_p2), %v4221_v0  ;;  %v4226_v3 = vld [vmem:[%s6065_s1 + $0x4] ss:$24 sps:$4 sm:$0xff] (!%p388_p2)   ;;  %v4228_v4 = vld [vmem:[%s6065_s1 + $0x38] ss:$24 sps:$4 sm:$0xff] (!%p388_p2)   ;;  %p431_p3 = scmp.lt.s32.totalorder (!%p388_p2), %s3780_s26, 1 }
   0x7   : > { %1096 = vmatpush1.bf16.msra.mxu1 (!%p388_p2), %v4223_v1  ;;  %v4229_v5 = vld [vmem:[%s6065_s1] ss:$24 sps:$4 sm:$0xff] (!%p388_p2)   ;;  %v4230_v6 = vld [vmem:[%s6065_s1 + $0x6c] ss:$24 sps:$4 sm:$0xff] (!%p388_p2)   ;;  %1054 = vmatprep.subr.bf16.mxu0 (!%p388_p2), %v4226_v3  ;;  %v4235_v8 = vld [vmem:[%s6065_s1 + $0x30] ss:$24 sps:$4 sm:$0xff] (!%p388_p2)  }
   0x8   : > { %1097 = vmatprep.subr.bf16.mxu1 (!%p388_p2), %v4224_v2  ;;  %v4232_v7 = vld [vmem:[%s6065_s1 + $0x34] ss:$24 sps:$4 sm:$0xff] (!%p388_p2)   ;;  %1055 = vmatpush1.bf16.msra.mxu0 (!%p388_p2), %v4229_v5  ;;  %v4234_v9 = vld [vmem:[%s6065_s1 + $0x68] ss:$24 sps:$4 sm:$0xff] (!%p388_p2)   ;;  %v4238_v11 = vld [vmem:[%s6065_s1 + $0x64] ss:$24 sps:$4 sm:$0xff] (!%p388_p2)  }
   0x9   : > { %1056 = vmatprep.subr.bf16.mxu0 (!%p388_p2), %v4232_v7  ;;  %v4236_v10 = vld [vmem:[%s6065_s1 + $0x9c] ss:$24 sps:$4 sm:$0xff] (!%p388_p2)   ;;  %v4241_v12 = vld [vmem:[%s6065_s1 + $0x60] ss:$24 sps:$4 sm:$0xff] (!%p388_p2)   ;;  %v4242_v15 = vld [vmem:[%s6065_s1 + $0xcc] ss:$24 sps:$4 sm:$0xff] (!%p388_p2)  }
   0xa   : > { %v4240_v13 = vld [vmem:[%s6065_s1 + $0x98] ss:$24 sps:$4 sm:$0xff] (!%p388_p2)   ;;  %v4244_v14 = vld [vmem:[%s6065_s1 + $0x94] ss:$24 sps:$4 sm:$0xff] (!%p388_p2)   ;;  %v4246_v16 = vld [vmem:[%s6065_s1 + $0xc8] ss:$24 sps:$4 sm:$0xff] (!%p388_p2)  }
   0xb   : > { %1098 = vmatpush1.bf16.msra.mxu1 (!%p388_p2), %v4228_v4  ;;  %v4247_v17 = vld [vmem:[%s6065_s1 + $0x90] ss:$24 sps:$4 sm:$0xff] (!%p388_p2)   ;;  %v4250_v18 = vld [vmem:[%s6065_s1 + $0xc4] ss:$24 sps:$4 sm:$0xff] (!%p388_p2)   ;;  %v4253_v20 = vld [vmem:[%s6065_s1 + $0xc0] ss:$24 sps:$4 sm:$0xff] (!%p388_p2)  }
   0xc   : > { %1099 = vmatprep.subr.bf16.mxu1 (!%p388_p2), %v4230_v6  ;;  %1057 = vmatpush1.bf16.msra.mxu0 (!%p388_p2), %v4235_v8  ;;  %v4248_v19 = vld [vmem:[%s6065_s1 + $0xfc] ss:$24 sps:$4 sm:$0xff] (!%p388_p2)   ;;  %v4252_v21 = vld [vmem:[%s6065_s1 + $0xf8] ss:$24 sps:$4 sm:$0xff] (!%p388_p2)   ;;  %v4254_v23 = vld [vmem:[%s6065_s1 + $0x12c] ss:$24 sps:$4 sm:$0xff] (!%p388_p2)  }
   0xd   : > { %1058 = vmatprep.subr.bf16.mxu0 %v4238_v11  ;;  %v4256_v22 = vld [vmem:[%s6065_s1 + $0xf4] ss:$24 sps:$4 sm:$0xff]   ;;  %v4258_v24 = vld [vmem:[%s6065_s1 + $0x128] ss:$24 sps:$4 sm:$0xff]   ;;  %v4262_v26 = vld [vmem:[%s6065_s1 + $0x124] ss:$24 sps:$4 sm:$0xff]  }
   0xe   : > { %v4259_v25 = vld [vmem:[%s6065_s1 + $0xf0] ss:$24 sps:$4 sm:$0xff]   ;;  %v4260_v27 = vld [vmem:[%s6065_s1 + $0x15c] ss:$24 sps:$4 sm:$0xff]   ;;  %v4265_v28 = vld [vmem:[%s6065_s1 + $0x120] ss:$24 sps:$4 sm:$0xff]  }
   0xf   : > { %1100 = vmatpush1.bf16.msra.mxu1 %v4234_v9  ;;  %v4264_v29 = vld [vmem:[%s6065_s1 + $0x158] ss:$24 sps:$4 sm:$0xff]   ;;  %v4268_v30 = vld [vmem:[%s6065_s1 + $0x154] ss:$24 sps:$4 sm:$0xff]   ;;  %v4270_v32 = vld [vmem:[%s6065_s1 + $0x188] ss:$24 sps:$4 sm:$0xff]  }
  0x10   : > { %1101 = vmatprep.subr.bf16.mxu1 %v4236_v10  ;;  %1059 = vmatpush1.bf16.msra.mxu0 %v4241_v12  ;;  %v4266_v31 = vld [vmem:[%s6065_s1 + $0x18c] ss:$24 sps:$4 sm:$0xff]   ;;  %v4271_v33 = vld [vmem:[%s6065_s1 + $0x150] ss:$24 sps:$4 sm:$0xff]   ;;  %s6079_s26 = smov (!%p431_p3, %s3780_s26), 1  ;;  %vm4642_vm0 = vmmov 0  }
  0x11   : > { %1060 = vmatprep.subr.bf16.mxu0 %v4244_v14  ;;  %v4274_v34 = vld [vmem:[%s6065_s1 + $0x184] ss:$24 sps:$4 sm:$0xff]   ;;  %v4277_v36 = vld [vmem:[%s6065_s1 + $0x180] ss:$24 sps:$4 sm:$0xff]   ;;  %v4280_v38 = vld [vmem:[%s6065_s1 + $0x1b4] ss:$24 sps:$4 sm:$0xff]  }
  0x12   : > { %v4272_v35 = vld [vmem:[%s6065_s1 + $0x1bc] ss:$24 sps:$4 sm:$0xff]   ;;  %v4276_v37 = vld [vmem:[%s6065_s1 + $0x1b8] ss:$24 sps:$4 sm:$0xff]   ;;  %s4177_s30 = sshll.u32 %s6079_s26, 4  ;;  %vm1237_vm1 = vcmask 1043456  }
  0x13   : > { %1102 = vmatpush1.bf16.msra.mxu1 %v4240_v13  ;;  %v4278_v39 = vld [vmem:[%s6065_s1 + $0x1ec] ss:$24 sps:$4 sm:$0xff]   ;;  %v4282_v40 = vld [vmem:[%s6065_s1 + $0x1e8] ss:$24 sps:$4 sm:$0xff]   ;;  %s4859_s22 = scalar_lea.vmem %s6064_s0, %s4177_s30  ;;  %v4284_v43 = vld [vmem:[%s6065_s1 + $0x21c] ss:$24 sps:$4 sm:$0xff]  }
  0x14   : > { %1103 = vmatprep.subr.bf16.mxu1 %v4242_v15  ;;  %1061 = vmatpush1.bf16.msra.mxu0 %v4247_v17  ;;  %v4283_v41 = vld [vmem:[%s6065_s1 + $0x1b0] ss:$24 sps:$4 sm:$0xff]   ;;  %v4286_v42 = vld [vmem:[%s6065_s1 + $0x1e4] ss:$24 sps:$4 sm:$0xff]   ;;  %v4289_v46 = vld [vmem:[%s6065_s1 + $0x1e0] ss:$24 sps:$4 sm:$0xff]  }
  0x15   : > { %1062 = vmatprep.subr.bf16.mxu0 %v4250_v18  ;;  %v4288_v44 = vld [vmem:[%s6065_s1 + $0x218] ss:$24 sps:$4 sm:$0xff]   ;;  %v4871_v45 = vld [vmem:[%s4859_s22 + $0x8] sm:$0xff]  ;;  %v4298_v52 = vld [vmem:[%s6065_s1 + $0x244] ss:$24 sps:$4 sm:$0xff]   ;;  %vm1221_vm2 = vcmask 64512  }
  0x16   : > { %v445_v47 = vpack.c.bf16 %v4871_v45, %v4871_v45  ;;  %v4292_v48 = vld [vmem:[%s6065_s1 + $0x214] ss:$24 sps:$4 sm:$0xff]   ;;  %v4294_v50 = vld [vmem:[%s6065_s1 + $0x248] ss:$24 sps:$4 sm:$0xff]   ;;  %v4300_v54 = vld [vmem:[%s6065_s1 + $0x278] ss:$24 sps:$4 sm:$0xff]  }
  0x17   : > { %1104 = vmatpush1.bf16.msra.mxu1 %v4246_v16  ;;  %v4290_v49 = vld [vmem:[%s6065_s1 + $0x24c] ss:$24 sps:$4 sm:$0xff]   ;;  %v4295_v51 = vld [vmem:[%s6065_s1 + $0x210] ss:$24 sps:$4 sm:$0xff]   ;;  %v4296_v53 = vld [vmem:[%s6065_s1 + $0x27c] ss:$24 sps:$4 sm:$0xff]  }
  0x18   : > { %1105 = vmatprep.subr.bf16.mxu1 %v4248_v19  ;;  %1063 = vmatpush1.bf16.msra.mxu0 %v4253_v20  ;;  %v4301_v55 = vld [vmem:[%s6065_s1 + $0x240] ss:$24 sps:$4 sm:$0xff]   ;;  %v4304_v56 = vld [vmem:[%s6065_s1 + $0x274] ss:$24 sps:$4 sm:$0xff]   ;;  %v4307_v59 = vld [vmem:[%s6065_s1 + $0x270] ss:$24 sps:$4 sm:$0xff]  }
  0x19   : > { %1064 = vmatprep.subr.bf16.mxu0 %v4256_v22  ;;  %1127 = vmatprep.mubr.bf16.mxu1 %v445_v47  ;;  %v4302_v57 = vld [vmem:[%s6065_s1 + $0x2ac] ss:$24 sps:$4 sm:$0xff]   ;;  %v4306_v58 = vld [vmem:[%s6065_s1 + $0x2a8] ss:$24 sps:$4 sm:$0xff]   ;;  %v4308_v61 = vld [vmem:[%s6065_s1 + $0x2dc] ss:$24 sps:$4 sm:$0xff]  }
  0x1a   : > { %1086 = vmatprep.mubr.bf16.mxu0 %v445_v47  ;;  %v4310_v60 = vld [vmem:[%s6065_s1 + $0x2a4] ss:$24 sps:$4 sm:$0xff]   ;;  %v4312_v62 = vld [vmem:[%s6065_s1 + $0x2d8] ss:$24 sps:$4 sm:$0xff]   ;;  %v4314_v1 = vld [vmem:[%s6065_s1 + $0x2d4] ss:$24 sps:$4 sm:$0xff]  }
  0x1b   : > { %1106 = vmatpush1.bf16.msra.mxu1 %v4252_v21  ;;  %v4313_v63 = vld [vmem:[%s6065_s1 + $0x2a0] ss:$24 sps:$4 sm:$0xff]   ;;  %v4316_v3 = vld [vmem:[%s6065_s1 + $0x2d0] ss:$24 sps:$4 sm:$0xff]   ;;  %v4319_v4 = vld [vmem:[%s6065_s1 + $0x14] ss:$24 sps:$4 sm:$0xff]  }
  0x1c   : > { %1107 = vmatprep.subr.bf16.mxu1 %v4254_v23  ;;  %1065 = vmatpush1.bf16.msra.mxu0 %v4259_v25  ;;  %v4927_v0 = vld [vmem:[%s4859_s22] sm:$0xff]  ;;  %v4317_v5 = vld [vmem:[%s6065_s1 + $0x10] ss:$24 sps:$4 sm:$0xff]   ;;  %v4325_v8 = vld [vmem:[%s6065_s1 + $0x74] ss:$24 sps:$4 sm:$0xff]   ;;  %s440_s22 = scalar_lea.vmem %s6077_s13, %s4177_s30 }
  0x1d   : > { %1066 = vmatprep.subr.bf16.mxu0 %v4262_v26  ;;  %v4934_v2 = vpack.c.bf16 %v4927_v0, %v4927_v0  ;;  %v4322_v6 = vld [vmem:[%s6065_s1 + $0x44] ss:$24 sps:$4 sm:$0xff]   ;;  %v4320_v7 = vld [vmem:[%s6065_s1 + $0x40] ss:$24 sps:$4 sm:$0xff]   ;;  %v4323_v9 = vld [vmem:[%s6065_s1 + $0x70] ss:$24 sps:$4 sm:$0xff]  }
  0x1e   : > { %v4328_v10 = vld [vmem:[%s6065_s1 + $0xa4] ss:$24 sps:$4 sm:$0xff]   ;;  %v4326_v11 = vld [vmem:[%s6065_s1 + $0xa0] ss:$24 sps:$4 sm:$0xff]   ;;  %v4331_v12 = vld [vmem:[%s6065_s1 + $0xd4] ss:$24 sps:$4 sm:$0xff]  }
  0x1f   : > { %1108 = vmatpush1.bf16.msra.mxu1 %v4258_v24  ;;  %v4329_v13 = vld [vmem:[%s6065_s1 + $0xd0] ss:$24 sps:$4 sm:$0xff]   ;;  %v4334_v14 = vld [vmem:[%s6065_s1 + $0x104] ss:$24 sps:$4 sm:$0xff]   ;;  %v4332_v15 = vld [vmem:[%s6065_s1 + $0x100] ss:$24 sps:$4 sm:$0xff]  }
  0x20   : > { %1109 = vmatprep.subr.bf16.mxu1 %v4260_v27  ;;  %1067 = vmatpush1.bf16.msra.mxu0 %v4265_v28  ;;  %v4337_v16 = vld [vmem:[%s6065_s1 + $0x134] ss:$24 sps:$4 sm:$0xff]   ;;  %v4335_v17 = vld [vmem:[%s6065_s1 + $0x130] ss:$24 sps:$4 sm:$0xff]   ;;  %v4340_v18 = vld [vmem:[%s6065_s1 + $0x164] ss:$24 sps:$4 sm:$0xff]  }
  0x21   : > { %1068 = vmatprep.subr.bf16.mxu0 %v4268_v30  ;;  %v4338_v19 = vld [vmem:[%s6065_s1 + $0x160] ss:$24 sps:$4 sm:$0xff]   ;;  %v4343_v20 = vld [vmem:[%s6065_s1 + $0x194] ss:$24 sps:$4 sm:$0xff]   ;;  %v4341_v21 = vld [vmem:[%s6065_s1 + $0x190] ss:$24 sps:$4 sm:$0xff]  }
  0x22   : > { %v4346_v22 = vld [vmem:[%s6065_s1 + $0x1c4] ss:$24 sps:$4 sm:$0xff]   ;;  %v4344_v23 = vld [vmem:[%s6065_s1 + $0x1c0] ss:$24 sps:$4 sm:$0xff]   ;;  %v4349_v24 = vld [vmem:[%s6065_s1 + $0x1f4] ss:$24 sps:$4 sm:$0xff]  }
  0x23   : > { %1110 = vmatpush1.bf16.msra.mxu1 %v4264_v29  ;;  %v4347_v25 = vld [vmem:[%s6065_s1 + $0x1f0] ss:$24 sps:$4 sm:$0xff]   ;;  %v4352_v26 = vld [vmem:[%s6065_s1 + $0x224] ss:$24 sps:$4 sm:$0xff]   ;;  %v4350_v27 = vld [vmem:[%s6065_s1 + $0x220] ss:$24 sps:$4 sm:$0xff]  }
  0x24   : > { %1111 = vmatprep.subr.bf16.mxu1 %v4266_v31  ;;  %1069 = vmatpush1.bf16.msra.mxu0 %v4271_v33  ;;  %v4355_v28 = vld [vmem:[%s6065_s1 + $0x254] ss:$24 sps:$4 sm:$0xff]   ;;  %v4353_v29 = vld [vmem:[%s6065_s1 + $0x250] ss:$24 sps:$4 sm:$0xff]   ;;  %v4358_v30 = vld [vmem:[%s6065_s1 + $0x284] ss:$24 sps:$4 sm:$0xff]  }
  0x25   : > { %1070 = vmatprep.subr.bf16.mxu0 %v4274_v34  ;;  %v4356_v31 = vld [vmem:[%s6065_s1 + $0x280] ss:$24 sps:$4 sm:$0xff]   ;;  %v4359_v33 = vld [vmem:[%s6065_s1 + $0x2b0] ss:$24 sps:$4 sm:$0xff]   ;;  %v4364_v34 = vld [vmem:[%s6065_s1 + $0x2e4] ss:$24 sps:$4 sm:$0xff]  }
  0x27   : > { %1112 = vmatpush1.bf16.msra.mxu1 %v4270_v32  ;;  %v4361_v32 = vld [vmem:[%s6065_s1 + $0x2b4] ss:$24 sps:$4 sm:$0xff]  }
  0x28   : > { %1113 = vmatprep.subr.bf16.mxu1 %v4272_v35  ;;  %1071 = vmatpush1.bf16.msra.mxu0 %v4277_v36  ;;  %v4362_v35 = vld [vmem:[%s6065_s1 + $0x2e0] ss:$24 sps:$4 sm:$0xff]   ;;  %v4641_v36 = vmov 0.0  }
  0x29   : > { %1072 = vmatprep.subr.bf16.mxu0 %v4280_v38 }
  0x2b   : > { %1114 = vmatpush1.bf16.msra.mxu1 %v4276_v37  ;;  %v544_v37 = vlaneseq }
  0x2c   : > { %1115 = vmatprep.subr.bf16.mxu1 %v4278_v39  ;;  %1073 = vmatpush1.bf16.msra.mxu0 %v4283_v41 }
  0x2d   : > { %1074 = vmatprep.subr.bf16.mxu0 %v4286_v42  ;;  %v5040_v38 = vshrl.u32 %v544_v37, 7 }
  0x2f   : > { %1116 = vmatpush1.bf16.msra.mxu1 %v4282_v40  ;;  %v554_v39 = vsub.s32 2, %v5040_v38  ;;  %v542_v40 = vld [vmem:[%s6066_s2] sm:$0x3f]  ;;  %v558_v41 = vsub.s32 3, %v5040_v38  ;;  %v5048_v42 = vsub.s32 0, %v5040_v38 }
  0x30   : > { %1117 = vmatprep.subr.bf16.mxu1 %v4284_v43  ;;  %1075 = vmatpush1.bf16.msra.mxu0 %v4289_v46 }
  0x31   : > { %1076 = vmatprep.subr.bf16.mxu0 %v4292_v48  ;;  %v555_v43 = vrot.slane %v542_v40, %v554_v39  ;;  %v559_v46 = vrot.slane %v542_v40, %v558_v41  ;;  %v547_v48 = vrot.slane %v542_v40, %v5048_v42 }
  0x33   : > { %1118 = vmatpush1.bf16.msra.mxu1 %v4288_v44  ;;  %v5053_v44 = vsub.s32 1, %v5040_v38 }
  0x34   : > { %1119 = vmatprep.subr.bf16.mxu1 %v4290_v49  ;;  %1077 = vmatpush1.bf16.msra.mxu0 %v4295_v51 }
  0x35   : > { %1078 = vmatprep.subr.bf16.mxu0 %v4298_v52  ;;  %v551_v51 = vrot.slane %v542_v40, %v5053_v44 }
  0x37   : > { %1120 = vmatpush1.bf16.msra.mxu1 %v4294_v50 }
  0x38   : > { %1121 = vmatprep.subr.bf16.mxu1 %v4296_v53  ;;  %1079 = vmatpush1.bf16.msra.mxu0 %v4301_v55 }
  0x39   : > { %1080 = vmatprep.subr.bf16.mxu0 %v4304_v56 }
  0x3b   : > { %1122 = vmatpush1.bf16.msra.mxu1 %v4300_v54 }
  0x3c   : > { %1123 = vmatprep.subr.bf16.mxu1 %v4302_v57  ;;  %1081 = vmatpush1.bf16.msra.mxu0 %v4307_v59 }
  0x3d   : > { %1082 = vmatprep.subr.bf16.mxu0 %v4310_v60 }
  0x3f   : > { %1124 = vmatpush1.bf16.msra.mxu1 %v4306_v58 }
  0x40   : > { %1125 = vmatprep.subr.bf16.mxu1 %v4308_v61  ;;  %1083 = vmatpush1.bf16.msra.mxu0 %v4313_v63 }
  0x41   : > { %1084 = vmatprep.subr.bf16.mxu0 %v4314_v1 }
  0x43   : > { %1126 = vmatpush1.bf16.msra.mxu1 %v4312_v62 }
  0x44   : > { %1085 = vmatpush1.bf16.msra.mxu0 %v4316_v3  ;;  %4199 = vmatprep.subr.bf16.mxu1 %v4641_v36  ;;  %v566_v3 = vsub.s32 5, %v5040_v38 }
  0x45   : > { %1136 = vmatprep.subr.bf16.mxu0 %v4319_v4 }
  0x46   : > { %1128 = vmatmul.mubr.bf16.vlgmr.msra.gmra.mrb[0].mxu1 %v4934_v2 }
  0x47   : > { %1087 = vmatmul.mubr.bf16.vlgmr.msra.gmra.mrb[0].mxu0 %v4934_v2  ;;  %4201 = vmatprep.mubr.msk.bf16.mxu1 %vm4642_vm0, %v4641_v36 }
  0x48   : > { %1137 = vmatpush1.bf16.msra.mxu0 %v4317_v5  ;;  %1168 = vmatprep.mubr.bf16.mxu0 %v445_v47  ;;  %v567_v5 = vrot.slane %v542_v40, %v566_v3 }
  0x49   : > { %1138 = vmatprep.subr.bf16.mxu0 %v4322_v6 }
  0x4c   : > { %1139 = vmatpush1.bf16.msra.mxu0 %v4320_v7 }
  0x4d   : > { %1140 = vmatprep.subr.bf16.mxu0 %v4325_v8 }
  0x50   : > { %1141 = vmatpush1.bf16.msra.mxu0 %v4323_v9 }
  0x51   : > { %1142 = vmatprep.subr.bf16.mxu0 %v4328_v10 }
  0x54   : > { %1143 = vmatpush1.bf16.msra.mxu0 %v4326_v11 }
  0x55   : > { %1144 = vmatprep.subr.bf16.mxu0 %v4331_v12 }
  0x58   : > { %1145 = vmatpush1.bf16.msra.mxu0 %v4329_v13 }
  0x59   : > { %1146 = vmatprep.subr.bf16.mxu0 %v4334_v14 }
  0x5c   : > { %1147 = vmatpush1.bf16.msra.mxu0 %v4332_v15 }
  0x5d   : > { %1148 = vmatprep.subr.bf16.mxu0 %v4337_v16 }
  0x60   : > { %1149 = vmatpush1.bf16.msra.mxu0 %v4335_v17 }
  0x61   : > { %1150 = vmatprep.subr.bf16.mxu0 %v4340_v18 }
  0x64   : > { %1151 = vmatpush1.bf16.msra.mxu0 %v4338_v19 }
  0x65   : > { %1152 = vmatprep.subr.bf16.mxu0 %v4343_v20 }
  0x68   : > { %1153 = vmatpush1.bf16.msra.mxu0 %v4341_v21 }
  0x69   : > { %1154 = vmatprep.subr.bf16.mxu0 %v4346_v22 }
  0x6c   : > { %1155 = vmatpush1.bf16.msra.mxu0 %v4344_v23 }
  0x6d   : > { %1156 = vmatprep.subr.bf16.mxu0 %v4349_v24 }
  0x70   : > { %1157 = vmatpush1.bf16.msra.mxu0 %v4347_v25 }
  0x71   : > { %1158 = vmatprep.subr.bf16.mxu0 %v4352_v26 }
  0x74   : > { %1159 = vmatpush1.bf16.msra.mxu0 %v4350_v27 }
  0x75   : > { %1160 = vmatprep.subr.bf16.mxu0 %v4355_v28 }
  0x78   : > { %1161 = vmatpush1.bf16.msra.mxu0 %v4353_v29 }
  0x79   : > { %1162 = vmatprep.subr.bf16.mxu0 %v4358_v30 }
  0x7c   : > { %1163 = vmatpush1.bf16.msra.mxu0 %v4356_v31 }
  0x7d   : > { %1164 = vmatprep.subr.bf16.mxu0 %v4361_v32 }
  0x80   : > { %1165 = vmatpush1.bf16.msra.mxu0 %v4359_v33 }
  0x81   : > { %1166 = vmatprep.subr.bf16.mxu0 %v4364_v34 }
  0x84   : > { %1167 = vmatpush1.bf16.msra.mxu0 %v4362_v35 }
  0x85   : > { %4187 = vmatprep.subr.bf16.mxu0 %v4641_v36 }
  0x87   : > { %1169 = vmatmul.mubr.bf16.vlgmr.msra.gmra.mrb[4].mxu0 %v4934_v2  ;;  %v562_v2 = vsub.s32 4, %v5040_v38 }
  0x88   : > { %4189 = vmatprep.mubr.msk.bf16.mxu0 %vm4642_vm0, %v4641_v36 }
  0x89   : > { %v563_v4 = vrot.slane %v542_v40, %v562_v2  ;;  %v4367_v40 = vld [vmem:[%s6067_s3 + $0x4] ss:$8 sps:$4 sm:$0xff]  }
 0x119   : > { %v1129_v47 = vpop.f32.mrb[0].mxu1 }
 0x11a   : > { %v1130_v49 = vadd.f32 %v1129_v47, %v555_v43  ;;  %v1131_v50 = vpop.f32.mrb[1].mxu1  ;;  %v1088_v56 = vpop.f32.mrb[0].mxu0 }
 0x11b   : > { %v1132_v52 = vadd.f32 %v1131_v50, %v559_v46  ;;  %v1133_v53 = vpop.f32.mrb[2].mxu1  ;;  %v1089_v58 = vadd.f32 %v1088_v56, %v547_v48  ;;  %v1090_v59 = vpop.f32.mrb[1].mxu0  ;;  %v4373_v56 = vld [vmem:[%s6067_s3 + $0x24] ss:$8 sps:$4 sm:$0xff]  }
 0x11c   : > { %v1178_v54 = vpack.c.bf16 %v1130_v49, %v1130_v49  ;;  %v1134_v55 = vpop.f32.mrb[3].mxu1  ;;  %v1091_v60 = vadd.f32 %v1090_v59, %v551_v51  ;;  %v1092_v61 = vpop.f32.mrb[2].mxu0  ;;  %v4365_v49 = vld [vmem:[%s6067_s3] ss:$8 sps:$4 sm:$0xff]   ;;  %v4370_v51 = vld [vmem:[%s6067_s3 + $0x14] ss:$8 sps:$4 sm:$0xff]  }
 0x11d   : > { %v1282_v57 = vpack.c.bf16 %v1132_v52, %v1132_v52  ;;  %v1093_v62 = vpop.f32.mrb[3].mxu0  ;;  %v1177_v63 = vpack.c.bf16 %v1089_v58, %v1089_v58  ;;  %v4376_v58 = vld [vmem:[%s6067_s3 + $0x34] ss:$8 sps:$4 sm:$0xff]   ;;  %v4374_v59 = vld [vmem:[%s6067_s3 + $0x30] ss:$8 sps:$4 sm:$0xff]  }
 0x11e   : > { %4188 = vmatpush3.bf16.xpose.msra.mxu0 %v1178_v54  ;;  %v1281_v1 = vpack.c.bf16 %v1091_v60, %v1091_v60  ;;  %v4368_v54 = vld [vmem:[%s6067_s3 + $0x10] ss:$8 sps:$4 sm:$0xff]   ;;  %v4379_v60 = vld [vmem:[%s6067_s3 + $0x44] ss:$8 sps:$4 sm:$0xff]   ;;  %v4377_v61 = vld [vmem:[%s6067_s3 + $0x40] ss:$8 sps:$4 sm:$0xff]  }
 0x11f   : > { %4200 = vmatpush3.bf16.xpose.msra.mxu1 %v1282_v57  ;;  %4193 = vmatprep.subr.bf16.mxu0 %v4641_v36  ;;  %v4371_v57 = vld [vmem:[%s6067_s3 + $0x20] ss:$8 sps:$4 sm:$0xff]   ;;  %v4382_v62 = vld [vmem:[%s6067_s3 + $0x54] ss:$8 sps:$4 sm:$0xff]  }
 0x120   : > { %4205 = vmatprep.subr.bf16.mxu1 %v4641_v36 }
 0x125   : > { %4190 = vmatmul.mubr.bf16.vlgmr.msra.gmra.mrb[8].mxu0 %v1177_v63  ;;  %v4380_v63 = vld [vmem:[%s6067_s3 + $0x50] ss:$8 sps:$4 sm:$0xff]  }
 0x126   : > { %4202 = vmatmul.mubr.bf16.vlgmr.msra.gmra.mrb[4].mxu1 %v1281_v1  ;;  %4195 = vmatprep.mubr.msk.bf16.mxu0 %vm4642_vm0, %v4641_v36  ;;  %v4385_v1 = vld [vmem:[%s6067_s3 + $0x64] ss:$8 sps:$4 sm:$0xff]  }
 0x127   : > { %4207 = vmatprep.mubr.msk.bf16.mxu1 %vm4642_vm0, %v4641_v36 }
 0x15a   : > { %v1170_v6 = vpop.f32.mrb[4].mxu0 }
 0x15b   : > { %v1171_v7 = vadd.f32 %v1170_v6, %v563_v4  ;;  %v1172_v8 = vpop.f32.mrb[5].mxu0  ;;  %v4383_v4 = vld [vmem:[%s6067_s3 + $0x60] ss:$8 sps:$4 sm:$0xff]   ;;  %v4386_v6 = vld [vmem:[%s6067_s3 + $0x70] ss:$8 sps:$4 sm:$0xff]  }
 0x15c   : > { %v1173_v9 = vadd.f32 %v1172_v8, %v567_v5  ;;  %v1174_v10 = vpop.f32.mrb[6].mxu0  ;;  %v4388_v5 = vld [vmem:[%s6067_s3 + $0x74] ss:$8 sps:$4 sm:$0xff]   ;;  %v4389_v8 = vld [vmem:[%s6067_s3 + $0x80] ss:$8 sps:$4 sm:$0xff]  }
 0x15d   : > { %v1179_v11 = vpack.c.bf16 %v1171_v7, %v1171_v7  ;;  %v1175_v12 = vpop.f32.mrb[7].mxu0  ;;  %v4391_v7 = vld [vmem:[%s6067_s3 + $0x84] ss:$8 sps:$4 sm:$0xff]   ;;  %v4392_v10 = vld [vmem:[%s6067_s3 + $0x90] ss:$8 sps:$4 sm:$0xff]  }
 0x15e   : > { %v1283_v13 = vpack.c.bf16 %v1173_v9, %v1173_v9  ;;  %v4394_v9 = vld [vmem:[%s6067_s3 + $0x94] ss:$8 sps:$4 sm:$0xff]   ;;  %v4395_v12 = vld [vmem:[%s6067_s3 + $0xa0] ss:$8 sps:$4 sm:$0xff]  }
 0x15f   : > { %v1239_v14 = vsel %vm1237_vm1, %v1179_v11, 0  ;;  %v4397_v11 = vld [vmem:[%s6067_s3 + $0xa4] ss:$8 sps:$4 sm:$0xff]  }
 0x160   : > { %v1341_v15 = vsel %vm1237_vm1, %v1283_v13, 0  ;;  %4194 = vmatpush3.bf16.msra.mxu0 %v1239_v14  ;;  %v4400_v13 = vld [vmem:[%s6067_s3 + $0xb4] ss:$8 sps:$4 sm:$0xff]   ;;  %v4398_v14 = vld [vmem:[%s6067_s3 + $0xb0] ss:$8 sps:$4 sm:$0xff]  }
 0x161   : > { %4206 = vmatpush3.bf16.msra.mxu1 %v1341_v15  ;;  %v4403_v15 = vld [vmem:[%s6067_s3 + $0xc4] ss:$8 sps:$4 sm:$0xff]  }
 0x162   : > { %1589 = vmatprep.subr.bf16.mxu1 %v4367_v40 }
 0x1f8   : > { %v1214_v16 = vpop.f32.mrb[8].mxu0 }
 0x1f9   : > { %v4191_v17 = vpop.f32.mrb[9].mxu0  ;;  %v1318_v18 = vpop.f32.mrb[4].mxu1  ;;  %v1220_v24 = vmul.f32 0.088388346, %v1214_v16  ;;  %v4401_v16 = vld [vmem:[%s6067_s3 + $0xc0] ss:$8 sps:$4 sm:$0xff]  }
 0x1fa   : > { %v1324_v19 = vmul.f32 0.088388346, %v1318_v18  ;;  %v1217_v20 = vpop.f32.mrb[10].mxu0  ;;  %v4203_v21 = vpop.f32.mrb[5].mxu1  ;;  %v4406_v17 = vld [vmem:[%s6067_s3 + $0xd4] ss:$8 sps:$4 sm:$0xff]  }
 0x1fb   : > { %v4192_v22 = vpop.f32.mrb[11].mxu0  ;;  %v1321_v23 = vpop.f32.mrb[6].mxu1  ;;  %v1222_v27 = vsel %vm1221_vm2, %v1220_v24, -inf  ;;  %v4404_v18 = vld [vmem:[%s6067_s3 + $0xd0] ss:$8 sps:$4 sm:$0xff]  }
 0x1fc   : > { %v4204_v25 = vpop.f32.mrb[7].mxu1  ;;  %v1325_v26 = vsel %vm1221_vm2, %v1324_v19, -inf  ;;  %v4407_v20 = vld [vmem:[%s6067_s3 + $0xe0] ss:$8 sps:$4 sm:$0xff]   ;;  %v4412_v21 = vld [vmem:[%s6067_s3 + $0xf4] ss:$8 sps:$4 sm:$0xff]  }
 0x1fd   : > { %1326 = vmax.xlane.f32.xlu0 %v1325_v26  ;;  %v4410_v22 = vld [vmem:[%s6067_s3 + $0xf0] ss:$8 sps:$4 sm:$0xff]  }
 0x201   : > { %1223 = vmax.xlane.f32.xlu0 %v1222_v27 }
 0x28a   : > { %v1327_v28 = vpop.xlane.xlu0 %1326 }
 0x28b   : > { %v1328_v29 = vsub.f32 %v1324_v19, %v1327_v28  ;;  %v4409_v19 = vld [vmem:[%s6067_s3 + $0xe4] ss:$8 sps:$4 sm:$0xff]  }
 0x28d   : > { %v1329_v30 = vmul.f32 1.442695, %v1328_v29 }
 0x28e   : > { %v1224_v31 = vpop.xlane.xlu0 %1223 }
 0x28f   : > { %4605 = vpow2.f32 %v1329_v30  ;;  %v1225_v32 = vsub.f32 %v1220_v24, %v1224_v31 }
 0x291   : > { %v1226_v33 = vmul.f32 1.442695, %v1225_v32 }
 0x293   : > { %4607 = vpow2.f32 %v1226_v33  ;;  %v1417_v33 = vld [vmem:[%s6068_s4] sm:$0x3] }
 0x299   : > { %v4606_v34 = vpop.eup %4605 }
 0x29a   : > { %v1331_v35 = vsel %vm1221_vm2, %v4606_v34, 0.0 }
 0x29b   : > { %1332 = vadd.xlane.f32.xlu1 %v1331_v35  ;;  %v1426_v35 = vrot.slane %v1417_v33, %v5053_v44 }
 0x29d   : > { %v4608_v36 = vpop.eup %4607 }
 0x29e   : > { %v1228_v37 = vsel %vm1221_vm2, %v4608_v36, 0.0 }
 0x29f   : > { %1229 = vadd.xlane.f32.xlu1 %v1228_v37 }
 0x328   : > { %v1333_v43 = vpop.xlane.xlu1 %1332 }
 0x329   : > { %4609 = vrcp.f32 %v1333_v43 }
 0x32c   : > { %v1230_v46 = vpop.xlane.xlu1 %1229 }
 0x32d   : > { %4611 = vrcp.f32 %v1230_v46 }
 0x333   : > { %v4610_v47 = vpop.eup %4609 }
 0x334   : > { %v1335_v48 = vmul.f32 %v4610_v47, %v4606_v34  ;;  %v1422_v34 = vrot.slane %v1417_v33, %v5048_v42 }
 0x336   : > { %v1336_v50 = vpack.c.bf16 %v1335_v48, %v1335_v48 }
 0x337   : > { %v4612_v52 = vpop.eup %4611 }
 0x338   : > { %v1232_v53 = vmul.f32 %v4612_v52, %v4608_v36  ;;  %4208 = vmatmul.mubr.msk.bf16.vlgmr.msra.gmra.mrb[8].mxu1 %vm1221_vm2, %v1336_v50  ;;  %v1683_v52 = vld [vmem:[%s6071_s7 + $0x20] sm:$0xff] }
 0x339   : > { %1590 = vmatpush1.bf16.msra.mxu1 %v4365_v49 }
 0x33a   : > { %v1233_v55 = vpack.c.bf16 %v1232_v53, %v1232_v53  ;;  %1591 = vmatprep.subr.bf16.mxu1 %v4370_v51  ;;  %v1679_v51 = vld [vmem:[%s6071_s7] sm:$0xff] }
 0x33b   : > { %v3919_v53 = vcombine.low %v1679_v51, %v1683_v52 }
 0x33c   : > { %4196 = vmatmul.mubr.msk.bf16.vlgmr.msra.gmra.mrb[12].mxu0 %vm1221_vm2, %v1233_v55  ;;  %v1687_v55 = vld [vmem:[%s6071_s7 + $0x40] sm:$0xff] }
 0x33d   : > { %1592 = vmatpush1.bf16.msra.mxu1 %v4368_v54  ;;  %v3920_v54 = vcombine.high %v1679_v51, %v1683_v52  ;;  %v1739_v51 = vld [vmem:[%s6071_s7 + $0x1e0] sm:$0xff]  ;;  %v1736_v52 = vld [vmem:[%s6071_s7 + $0x1c8] sm:$0xff] }
 0x33e   : > { %1593 = vmatprep.subr.bf16.mxu1 %v4373_v56  ;;  %v1691_v56 = vld [vmem:[%s6071_s7 + $0x60] sm:$0xff] }
 0x33f   : > { %2489 = vmatprep.subr.bf16.mxu0 %v3920_v54 }
 0x340   : > { %2490 = vmatpush1.bf16.msra.mxu0 %v3919_v53 }
 0x341   : > { %1594 = vmatpush1.bf16.msra.mxu1 %v4371_v57 }
 0x342   : > { %1595 = vmatprep.subr.bf16.mxu1 %v4376_v58 }
 0x345   : > { %1596 = vmatpush1.bf16.msra.mxu1 %v4374_v59  ;;  %v3928_v59 = vcombine.high %v1687_v55, %v1691_v56 }
 0x346   : > { %1597 = vmatprep.subr.bf16.mxu1 %v4379_v60  ;;  %v1688_v60 = vld [vmem:[%s6071_s7 + $0x48] sm:$0xff] }
 0x347   : > { %2491 = vmatprep.subr.bf16.mxu0 %v3928_v59  ;;  %v1748_v59 = vld [vmem:[%s6071_s7 + $0x228] sm:$0xff] }
 0x349   : > { %1598 = vmatpush1.bf16.msra.mxu1 %v4377_v61  ;;  %v1692_v61 = vld [vmem:[%s6071_s7 + $0x68] sm:$0xff] }
 0x34a   : > { %1599 = vmatprep.subr.bf16.mxu1 %v4382_v62  ;;  %v1695_v62 = vld [vmem:[%s6071_s7 + $0x80] sm:$0xff] }
 0x34d   : > { %1600 = vmatpush1.bf16.msra.mxu1 %v4380_v63  ;;  %v3930_v63 = vcombine.high %v1688_v60, %v1692_v61 }
 0x34e   : > { %1601 = vmatprep.subr.bf16.mxu1 %v4385_v1  ;;  %v1699_v1 = vld [vmem:[%s6071_s7 + $0xa0] sm:$0xff] }
 0x351   : > { %1602 = vmatpush1.bf16.msra.mxu1 %v4383_v4  ;;  %v1696_v4 = vld [vmem:[%s6071_s7 + $0x88] sm:$0xff] }
 0x352   : > { %1603 = vmatprep.subr.bf16.mxu1 %v4388_v5  ;;  %v1700_v5 = vld [vmem:[%s6071_s7 + $0xa8] sm:$0xff] }
 0x355   : > { %1604 = vmatpush1.bf16.msra.mxu1 %v4386_v6  ;;  %v3927_v6 = vcombine.low %v1687_v55, %v1691_v56  ;;  %v1743_v56 = vld [vmem:[%s6071_s7 + $0x200] sm:$0xff] }
 0x356   : > { %1605 = vmatprep.subr.bf16.mxu1 %v4391_v7  ;;  %v3929_v7 = vcombine.low %v1688_v60, %v1692_v61 }
 0x357   : > { %2492 = vmatpush1.bf16.msra.mxu0 %v3927_v6  ;;  %v1756_v6 = vld [vmem:[%s6071_s7 + $0x268] sm:$0xff] }
 0x359   : > { %1606 = vmatpush1.bf16.msra.mxu1 %v4389_v8  ;;  %v3936_v8 = vcombine.high %v1695_v62, %v1699_v1 }
 0x35a   : > { %1607 = vmatprep.subr.bf16.mxu1 %v4394_v9  ;;  %v3938_v9 = vcombine.high %v1696_v4, %v1700_v5 }
 0x35b   : > { %2493 = vmatprep.subr.bf16.mxu0 %v3936_v8 }
 0x35d   : > { %1608 = vmatpush1.bf16.msra.mxu1 %v4392_v10  ;;  %v1703_v10 = vld [vmem:[%s6071_s7 + $0xc0] sm:$0xff] }
 0x35e   : > { %1609 = vmatprep.subr.bf16.mxu1 %v4397_v11  ;;  %v1707_v11 = vld [vmem:[%s6071_s7 + $0xe0] sm:$0xff] }
 0x361   : > { %1610 = vmatpush1.bf16.msra.mxu1 %v4395_v12  ;;  %v1704_v12 = vld [vmem:[%s6071_s7 + $0xc8] sm:$0xff] }
 0x362   : > { %1611 = vmatprep.subr.bf16.mxu1 %v4400_v13  ;;  %v1708_v13 = vld [vmem:[%s6071_s7 + $0xe8] sm:$0xff] }
 0x365   : > { %1612 = vmatpush1.bf16.msra.mxu1 %v4398_v14  ;;  %v3935_v14 = vcombine.low %v1695_v62, %v1699_v1  ;;  %v1751_v1 = vld [vmem:[%s6071_s7 + $0x240] sm:$0xff] }
 0x366   : > { %1613 = vmatprep.subr.bf16.mxu1 %v4403_v15  ;;  %v3937_v15 = vcombine.low %v1696_v4, %v1700_v5  ;;  %v1755_v4 = vld [vmem:[%s6071_s7 + $0x260] sm:$0xff]  ;;  %v1752_v5 = vld [vmem:[%s6071_s7 + $0x248] sm:$0xff] }
 0x367   : > { %2494 = vmatpush1.bf16.msra.mxu0 %v3935_v14  ;;  %v1764_v14 = vld [vmem:[%s6071_s7 + $0x2a8] sm:$0xff] }
 0x369   : > { %1614 = vmatpush1.bf16.msra.mxu1 %v4401_v16  ;;  %v3944_v16 = vcombine.high %v1703_v10, %v1707_v11 }
 0x36a   : > { %1615 = vmatprep.subr.bf16.mxu1 %v4406_v17  ;;  %v3946_v17 = vcombine.high %v1704_v12, %v1708_v13 }
 0x36b   : > { %2495 = vmatprep.subr.bf16.mxu0 %v3944_v16  ;;  %v3993_v16 = vcombine.low %v1752_v5, %v1756_v6 }
 0x36d   : > { %1616 = vmatpush1.bf16.msra.mxu1 %v4404_v18  ;;  %v1711_v18 = vld [vmem:[%s6071_s7 + $0x100] sm:$0xff] }
 0x36e   : > { %1617 = vmatprep.subr.bf16.mxu1 %v4409_v19  ;;  %v1715_v19 = vld [vmem:[%s6071_s7 + $0x120] sm:$0xff] }
 0x371   : > { %1618 = vmatpush1.bf16.msra.mxu1 %v4407_v20  ;;  %v1712_v20 = vld [vmem:[%s6071_s7 + $0x108] sm:$0xff] }
 0x372   : > { %1619 = vmatprep.subr.bf16.mxu1 %v4412_v21  ;;  %v1716_v21 = vld [vmem:[%s6071_s7 + $0x128] sm:$0xff] }
 0x375   : > { %1620 = vmatpush1.bf16.msra.mxu1 %v4410_v22  ;;  %v3943_v22 = vcombine.low %v1703_v10, %v1707_v11  ;;  %v3994_v10 = vcombine.high %v1752_v5, %v1756_v6  ;;  %v1759_v11 = vld [vmem:[%s6071_s7 + $0x280] sm:$0xff]  ;;  %v1800_v5 = vld [vmem:[%s6071_s7 + $0x3c8] sm:$0xff] }
 0x377   : > { %2496 = vmatpush1.bf16.msra.mxu0 %v3943_v22 }
 0x40b   : > { %v1377_v23 = vpop.f32.mrb[8].mxu1 }
 0x40c   : > { %v1384_v24 = vpack.c.bf16 %v1377_v23, %v1377_v23  ;;  %v4209_v25 = vpop.f32.mrb[9].mxu1  ;;  %v3945_v23 = vcombine.low %v1704_v12, %v1708_v13  ;;  %v1763_v12 = vld [vmem:[%s6071_s7 + $0x2a0] sm:$0xff]  ;;  %v1760_v13 = vld [vmem:[%s6071_s7 + $0x288] sm:$0xff] }
 0x40d   : > { %v1380_v26 = vpop.f32.mrb[10].mxu1  ;;  %v3954_v25 = vcombine.high %v1712_v20, %v1716_v21 }
 0x40e   : > { %v4210_v27 = vpop.f32.mrb[11].mxu1  ;;  %1621 = vmatprep.mubr.bf16.mxu1 %v1384_v24  ;;  %v3952_v24 = vcombine.high %v1711_v18, %v1715_v19  ;;  %v1719_v26 = vld [vmem:[%s6071_s7 + $0x140] sm:$0xff] }
 0x40f   : > { %v1275_v28 = vpop.f32.mrb[12].mxu0  ;;  %v1723_v27 = vld [vmem:[%s6071_s7 + $0x160] sm:$0xff] }
 0x410   : > { %v1383_v29 = vpack.c.bf16 %v1275_v28, %v1275_v28  ;;  %v4197_v30 = vpop.f32.mrb[13].mxu0  ;;  %v1720_v28 = vld [vmem:[%s6071_s7 + $0x148] sm:$0xff]  ;;  %2497 = vmatprep.subr.bf16.mxu0 %v3952_v24 }
 0x411   : > { %v1278_v31 = vpop.f32.mrb[14].mxu0  ;;  %v3951_v30 = vcombine.low %v1711_v18, %v1715_v19  ;;  %v4002_v18 = vcombine.high %v1760_v13, %v1764_v14  ;;  %v3999_v19 = vcombine.low %v1759_v11, %v1763_v12 }
 0x412   : > { %v4198_v32 = vpop.f32.mrb[15].mxu0  ;;  %1622 = vmatmul.mubr.bf16.vlgmr.msra.gmra.mrb[12].mxu1 %v1383_v29  ;;  %v1724_v29 = vld [vmem:[%s6071_s7 + $0x168] sm:$0xff]  ;;  %v3953_v31 = vcombine.low %v1712_v20, %v1716_v21  ;;  %v4001_v20 = vcombine.low %v1760_v13, %v1764_v14  ;;  %v1682_v13 = vld [vmem:[%s6071_s7 + $0x18] sm:$0xff] }
 0x413   : > { %v3960_v32 = vcombine.high %v1719_v26, %v1723_v27  ;;  %v3962_v33 = vcombine.high %v1720_v28, %v1724_v29  ;;  %2498 = vmatpush1.bf16.msra.mxu0 %v3951_v30  ;;  %v1772_v30 = vld [vmem:[%s6071_s7 + $0x2e8] sm:$0xff] }
 0x415   : > { %2499 = vmatprep.subr.bf16.mxu0 %v3960_v32 }
 0x4e5   : > { %v1623_v36 = vpop.f32.mrb[12].mxu1 }
 0x4e6   : > { %v1624_v37 = vadd.f32 %v1623_v36, %v1422_v34  ;;  %v1625_v40 = vpop.f32.mrb[13].mxu1  ;;  %v1727_v34 = vld [vmem:[%s6071_s7 + $0x180] sm:$0xff]  ;;  %v1728_v36 = vld [vmem:[%s6071_s7 + $0x188] sm:$0xff] }
 0x4e7   : > { %v1626_v43 = vadd.f32 %v1625_v40, %v1426_v35  ;;  %v1627_v46 = vpop.f32.mrb[14].mxu1  ;;  %v1731_v35 = vld [vmem:[%s6071_s7 + $0x1a0] sm:$0xff]  ;;  %v3959_v40 = vcombine.low %v1719_v26, %v1723_v27 }
 0x4e8   : > { %v5175_v47 = vadd.f32 %v1624_v37, %v4927_v0  ;;  %v1628_v48 = vpop.f32.mrb[15].mxu1  ;;  %v1680_v0 = vld [vmem:[%s6071_s7 + $0x8] sm:$0xff]  ;;  %v3968_v46 = vcombine.high %v1727_v34, %v1731_v35  ;;  %v3967_v53 = vcombine.low %v1727_v34, %v1731_v35  ;;  %v1775_v34 = vld [vmem:[%s6071_s7 + $0x300] sm:$0xff] }
 0x4e9   : > { %v5178_v49 = vadd.f32 %v1626_v43, %v4871_v45  ;;  %v1684_v45 = vld [vmem:[%s6071_s7 + $0x28] sm:$0xff]  ;;  %v3961_v43 = vcombine.low %v1720_v28, %v1724_v29  ;;  %2500 = vmatpush1.bf16.msra.mxu0 %v3959_v40  ;;  %v1767_v28 = vld [vmem:[%s6071_s7 + $0x2c0] sm:$0xff] }
 0x4ea   : > { %v3921_v57 = vcombine.low %v1680_v0, %v1684_v45  ;;  %v3922_v58 = vcombine.high %v1680_v0, %v1684_v45  ;;  %v1732_v37 = vld [vmem:[%s6071_s7 + $0x1a8] sm:$0xff]  ;;  %2501 = vmatprep.subr.bf16.mxu0 %v3968_v46  ;;  %v1779_v35 = vld [vmem:[%s6071_s7 + $0x320] sm:$0xff] }
 0x4eb   : > { %v1634_v50 = vadd.f32 %v5178_v49, %v5175_v47  ;;  %v3970_v48 = vcombine.high %v1728_v36, %v1732_v37  ;;  %v1740_v0 = vld [vmem:[%s6071_s7 + $0x1e8] sm:$0xff]  ;;  %v3969_v54 = vcombine.low %v1728_v36, %v1732_v37  ;;  %v4016_v37 = vcombine.high %v1775_v34, %v1779_v35 }
 0x4ec   : > { %2530 = vmatprep.subr.bf16.mxu1 %v3922_v58  ;;  %v3978_v55 = vcombine.high %v1736_v52, %v1740_v0  ;;  %v1744_v58 = vld [vmem:[%s6071_s7 + $0x208] sm:$0xff]  ;;  %v3977_v61 = vcombine.low %v1736_v52, %v1740_v0 }
 0x4ed   : > { %1635 = vadd.xlane.f32.xlu0 %v1634_v50  ;;  %2531 = vmatpush1.bf16.msra.mxu1 %v3921_v57  ;;  %v1735_v50 = vld [vmem:[%s6071_s7 + $0x1c0] sm:$0xff]  ;;  %v3985_v8 = vcombine.low %v1744_v58, %v1748_v59  ;;  %v1776_v36 = vld [vmem:[%s6071_s7 + $0x308] sm:$0xff] }
 0x4ee   : > { %2532 = vmatprep.subr.bf16.mxu1 %v3930_v63  ;;  %v3976_v45 = vcombine.high %v1735_v50, %v1739_v51  ;;  %v1747_v57 = vld [vmem:[%s6071_s7 + $0x220] sm:$0xff]  ;;  %2502 = vmatpush1.bf16.msra.mxu0 %v3967_v53  ;;  %v3975_v60 = vcombine.low %v1735_v50, %v1739_v51  ;;  %v3986_v63 = vcombine.high %v1744_v58, %v1748_v59  ;;  %v1780_v40 = vld [vmem:[%s6071_s7 + $0x328] sm:$0xff] }
 0x4ef   : > { %v3984_v62 = vcombine.high %v1743_v56, %v1747_v57  ;;  %v4017_v46 = vcombine.low %v1776_v36, %v1780_v40  ;;  %v1783_v50 = vld [vmem:[%s6071_s7 + $0x340] sm:$0xff]  ;;  %v1784_v52 = vld [vmem:[%s6071_s7 + $0x348] sm:$0xff] }
 0x4f0   : > { %2503 = vmatprep.subr.bf16.mxu0 %v3976_v45  ;;  %v1787_v51 = vld [vmem:[%s6071_s7 + $0x360] sm:$0xff]  ;;  %v1788_v53 = vld [vmem:[%s6071_s7 + $0x368] sm:$0xff] }
 0x4f1   : > { %2533 = vmatpush1.bf16.msra.mxu1 %v3929_v7  ;;  %v3983_v7 = vcombine.low %v1743_v56, %v1747_v57  ;;  %v4024_v0 = vcombine.high %v1783_v50, %v1787_v51  ;;  %v4025_v45 = vcombine.low %v1784_v52, %v1788_v53  ;;  %v1791_v56 = vld [vmem:[%s6071_s7 + $0x380] sm:$0xff]  ;;  %v1792_v58 = vld [vmem:[%s6071_s7 + $0x388] sm:$0xff] }
 0x4f2   : > { %2534 = vmatprep.subr.bf16.mxu1 %v3938_v9  ;;  %2504 = vmatpush1.bf16.msra.mxu0 %v3975_v60  ;;  %v3992_v9 = vcombine.high %v1751_v1, %v1755_v4  ;;  %v1795_v57 = vld [vmem:[%s6071_s7 + $0x3a0] sm:$0xff]  ;;  %v1796_v60 = vld [vmem:[%s6071_s7 + $0x3a8] sm:$0xff] }
 0x4f3   : > { %2505 = vmatprep.subr.bf16.mxu0 %v3984_v62  ;;  %v4032_v59 = vcombine.high %v1791_v56, %v1795_v57  ;;  %v4033_v62 = vcombine.low %v1792_v58, %v1796_v60 }
 0x4f5   : > { %2535 = vmatpush1.bf16.msra.mxu1 %v3937_v15  ;;  %v3991_v15 = vcombine.low %v1751_v1, %v1755_v4  ;;  %v1799_v1 = vld [vmem:[%s6071_s7 + $0x3c0] sm:$0xff] }
 0x4f6   : > { %2536 = vmatprep.subr.bf16.mxu1 %v3946_v17  ;;  %2506 = vmatpush1.bf16.msra.mxu0 %v3983_v7  ;;  %v4000_v17 = vcombine.high %v1759_v11, %v1763_v12  ;;  %v1803_v4 = vld [vmem:[%s6071_s7 + $0x3e0] sm:$0xff]  ;;  %v1681_v11 = vld [vmem:[%s6071_s7 + $0x10] sm:$0xff] }
 0x4f7   : > { %2507 = vmatprep.subr.bf16.mxu0 %v3992_v9  ;;  %v4039_v6 = vcombine.low %v1799_v1, %v1803_v4  ;;  %v4040_v7 = vcombine.high %v1799_v1, %v1803_v4  ;;  %v1685_v12 = vld [vmem:[%s6071_s7 + $0x30] sm:$0xff]  ;;  %v1714_v4 = vld [vmem:[%s6071_s7 + $0x118] sm:$0xff] }
 0x4f8   : > { %v3924_v14 = vcombine.high %v1681_v11, %v1685_v12  ;;  %v1717_v1 = vld [vmem:[%s6071_s7 + $0x130] sm:$0xff] }
 0x4f9   : > { %2537 = vmatpush1.bf16.msra.mxu1 %v3945_v23 }
 0x4fa   : > { %2538 = vmatprep.subr.bf16.mxu1 %v3954_v25  ;;  %2508 = vmatpush1.bf16.msra.mxu0 %v3991_v15  ;;  %v1686_v15 = vld [vmem:[%s6071_s7 + $0x38] sm:$0xff] }
 0x4fb   : > { %2509 = vmatprep.subr.bf16.mxu0 %v4000_v17  ;;  %v3925_v17 = vcombine.low %v1682_v13, %v1686_v15 }
 0x4fd   : > { %2539 = vmatpush1.bf16.msra.mxu1 %v3953_v31 }
 0x4fe   : > { %2540 = vmatprep.subr.bf16.mxu1 %v3962_v33  ;;  %2510 = vmatpush1.bf16.msra.mxu0 %v3999_v19 }
 0x501   : > { %2541 = vmatpush1.bf16.msra.mxu1 %v3961_v43  ;;  %v4015_v43 = vcombine.low %v1775_v34, %v1779_v35  ;;  %v1689_v35 = vld [vmem:[%s6071_s7 + $0x50] sm:$0xff] }
 0x502   : > { %2542 = vmatprep.subr.bf16.mxu1 %v3970_v48  ;;  %v4018_v48 = vcombine.high %v1776_v36, %v1780_v40  ;;  %v1694_v36 = vld [vmem:[%s6071_s7 + $0x78] sm:$0xff] }
 0x505   : > { %2543 = vmatpush1.bf16.msra.mxu1 %v3969_v54  ;;  %v4023_v54 = vcombine.low %v1783_v50, %v1787_v51  ;;  %v1701_v50 = vld [vmem:[%s6071_s7 + $0xb0] sm:$0xff]  ;;  %v1698_v51 = vld [vmem:[%s6071_s7 + $0x98] sm:$0xff] }
 0x506   : > { %2544 = vmatprep.subr.bf16.mxu1 %v3978_v55  ;;  %v4026_v55 = vcombine.high %v1784_v52, %v1788_v53  ;;  %v1702_v52 = vld [vmem:[%s6071_s7 + $0xb8] sm:$0xff] }
 0x509   : > { %2545 = vmatpush1.bf16.msra.mxu1 %v3977_v61  ;;  %v4031_v61 = vcombine.low %v1791_v56, %v1795_v57  ;;  %v1709_v56 = vld [vmem:[%s6071_s7 + $0xf0] sm:$0xff]  ;;  %v1706_v57 = vld [vmem:[%s6071_s7 + $0xd8] sm:$0xff] }
 0x50a   : > { %2546 = vmatprep.subr.bf16.mxu1 %v3986_v63  ;;  %v4034_v63 = vcombine.high %v1792_v58, %v1796_v60  ;;  %v1710_v58 = vld [vmem:[%s6071_s7 + $0xf8] sm:$0xff]  ;;  %v3941_v60 = vcombine.low %v1698_v51, %v1702_v52 }
 0x50d   : > { %2547 = vmatpush1.bf16.msra.mxu1 %v3985_v8  ;;  %v1804_v8 = vld [vmem:[%s6071_s7 + $0x3e8] sm:$0xff] }
 0x50e   : > { %2548 = vmatprep.subr.bf16.mxu1 %v3994_v10  ;;  %v4041_v9 = vcombine.low %v1800_v5, %v1804_v8  ;;  %v4042_v10 = vcombine.high %v1800_v5, %v1804_v8  ;;  %v1718_v5 = vld [vmem:[%s6071_s7 + $0x138] sm:$0xff] }
 0x511   : > { %2549 = vmatpush1.bf16.msra.mxu1 %v3993_v16  ;;  %v3923_v16 = vcombine.low %v1681_v11, %v1685_v12  ;;  %v1725_v11 = vld [vmem:[%s6071_s7 + $0x170] sm:$0xff]  ;;  %v1722_v12 = vld [vmem:[%s6071_s7 + $0x158] sm:$0xff] }
 0x512   : > { %2550 = vmatprep.subr.bf16.mxu1 %v4002_v18  ;;  %v3926_v18 = vcombine.high %v1682_v13, %v1686_v15  ;;  %v1726_v13 = vld [vmem:[%s6071_s7 + $0x178] sm:$0xff]  ;;  %v3957_v15 = vcombine.low %v1714_v4, %v1718_v5 }
 0x515   : > { %2551 = vmatpush1.bf16.msra.mxu1 %v4001_v20 }
 0x57a   : > { %v1636_v21 = vpop.xlane.xlu0 %1635 }
 0x57b   : > { %v1638_v22 = vmul.f32 0.00390625, %v1636_v21 }
 0x57d   : > { %v5315_v23 = vsub.f32 %v5175_v47, %v1638_v22  ;;  %v5318_v24 = vsub.f32 %v5178_v49, %v1638_v22  ;;  %v1771_v47 = vld [vmem:[%s6071_s7 + $0x2e0] sm:$0xff]  ;;  %v1768_v49 = vld [vmem:[%s6071_s7 + $0x2c8] sm:$0xff] }
 0x57e   : > { %v4008_v29 = vcombine.high %v1767_v28, %v1771_v47  ;;  %v4007_v31 = vcombine.low %v1767_v28, %v1771_v47  ;;  %v4009_v32 = vcombine.low %v1768_v49, %v1772_v30  ;;  %v4010_v33 = vcombine.high %v1768_v49, %v1772_v30  ;;  %v1632_v22 = vld [vmem:[%s6069_s5] sm:$0x3] }
 0x57f   : > { %v1641_v25 = vmul.f32 %v5315_v23, %v5315_v23  ;;  %v1642_v26 = vmul.f32 %v5318_v24, %v5318_v24 }
 0x580   : > { %2511 = vmatprep.subr.bf16.mxu0 %v4008_v29  ;;  %2552 = vmatprep.subr.bf16.mxu1 %v4010_v33 }
 0x581   : > { %v1643_v27 = vadd.f32 %v1642_v26, %v1641_v25  ;;  %2512 = vmatpush1.bf16.msra.mxu0 %v4007_v31  ;;  %2553 = vmatpush1.bf16.msra.mxu1 %v4009_v32  ;;  %v1633_v25 = vld [vmem:[%s6070_s6] sm:$0x3]  ;;  %v1659_v26 = vrot.slane %v1632_v22, %v5053_v44 }
 0x582   : > { %2513 = vmatprep.subr.bf16.mxu0 %v4016_v37  ;;  %2554 = vmatprep.subr.bf16.mxu1 %v4018_v48  ;;  %v1672_v29 = vrot.slane %v1633_v25, %v5053_v44  ;;  %v1668_v30 = vrot.slane %v1633_v25, %v5048_v42  ;;  %v3965_v25 = vcombine.low %v1722_v12, %v1726_v13 }
 0x583   : > { %1644 = vadd.xlane.f32.xlu1 %v1643_v27  ;;  %v1655_v27 = vrot.slane %v1632_v22, %v5048_v42 }
 0x585   : > { %2514 = vmatpush1.bf16.msra.mxu0 %v4015_v43  ;;  %2555 = vmatpush1.bf16.msra.mxu1 %v4017_v46  ;;  %v1697_v43 = vld [vmem:[%s6071_s7 + $0x90] sm:$0xff] }
 0x586   : > { %2515 = vmatprep.subr.bf16.mxu0 %v4024_v0  ;;  %2556 = vmatprep.subr.bf16.mxu1 %v4026_v55  ;;  %v1705_v55 = vld [vmem:[%s6071_s7 + $0xd0] sm:$0xff] }
 0x589   : > { %2516 = vmatpush1.bf16.msra.mxu0 %v4023_v54  ;;  %2557 = vmatpush1.bf16.msra.mxu1 %v4025_v45  ;;  %v3940_v54 = vcombine.high %v1697_v43, %v1701_v50  ;;  %v3942_v45 = vcombine.high %v1698_v51, %v1702_v52  ;;  %v1753_v51 = vld [vmem:[%s6071_s7 + $0x250] sm:$0xff] }
 0x58a   : > { %2517 = vmatprep.subr.bf16.mxu0 %v4032_v59  ;;  %2558 = vmatprep.subr.bf16.mxu1 %v4034_v63  ;;  %v3939_v59 = vcombine.low %v1697_v43, %v1701_v50  ;;  %v1713_v63 = vld [vmem:[%s6071_s7 + $0x110] sm:$0xff] }
 0x58b   : > { %v3956_v8 = vcombine.high %v1713_v63, %v1717_v1  ;;  %v1757_v52 = vld [vmem:[%s6071_s7 + $0x270] sm:$0xff] }
 0x58d   : > { %2518 = vmatpush1.bf16.msra.mxu0 %v4031_v61  ;;  %2559 = vmatpush1.bf16.msra.mxu1 %v4033_v62  ;;  %v3948_v61 = vcombine.high %v1705_v55, %v1709_v56  ;;  %v3950_v62 = vcombine.high %v1706_v57, %v1710_v58 }
 0x58e   : > { %2519 = vmatprep.subr.bf16.mxu0 %v4040_v7  ;;  %2560 = vmatprep.subr.bf16.mxu1 %v4042_v10  ;;  %v3949_v7 = vcombine.low %v1706_v57, %v1710_v58  ;;  %v1721_v10 = vld [vmem:[%s6071_s7 + $0x150] sm:$0xff] }
 0x58f   : > { %v3963_v22 = vcombine.low %v1721_v10, %v1725_v11  ;;  %v1761_v57 = vld [vmem:[%s6071_s7 + $0x290] sm:$0xff] }
 0x590   : > { %v1765_v58 = vld [vmem:[%s6071_s7 + $0x2b0] sm:$0xff] }
 0x591   : > { %2520 = vmatpush1.bf16.msra.mxu0 %v4039_v6  ;;  %2561 = vmatpush1.bf16.msra.mxu1 %v4041_v9  ;;  %v3947_v6 = vcombine.low %v1705_v55, %v1709_v56  ;;  %v3958_v9 = vcombine.high %v1714_v4, %v1718_v5  ;;  %v3996_v55 = vcombine.high %v1753_v51, %v1757_v52  ;;  %v1769_v4 = vld [vmem:[%s6071_s7 + $0x2d0] sm:$0xff] }
 0x592   : > { %2571 = vmatprep.subr.bf16.mxu0 %v3924_v14  ;;  %2612 = vmatprep.subr.bf16.mxu1 %v3926_v18  ;;  %v3955_v14 = vcombine.low %v1713_v63, %v1717_v1  ;;  %v1729_v18 = vld [vmem:[%s6071_s7 + $0x190] sm:$0xff]  ;;  %v4004_v63 = vcombine.high %v1761_v57, %v1765_v58 }
 0x593   : > { %v1773_v5 = vld [vmem:[%s6071_s7 + $0x2f0] sm:$0xff] }
 0x610   : > { %v1645_v19 = vpop.xlane.xlu1 %1644 }
 0x611   : > { %v1646_v20 = vmul.f32 0.00390625, %v1645_v19  ;;  %v1733_v19 = vld [vmem:[%s6071_s7 + $0x1b0] sm:$0xff] }
 0x613   : > { %v1647_v21 = vadd.f32 1e-12, %v1646_v20  ;;  %v1730_v20 = vld [vmem:[%s6071_s7 + $0x198] sm:$0xff] }
 0x615   : > { %4613 = vrsqrt.f32 %v1647_v21  ;;  %v1734_v21 = vld [vmem:[%s6071_s7 + $0x1b8] sm:$0xff] }
 0x61f   : > { %v4614_v28 = vpop.eup %4613 }
 0x620   : > { %v1649_v47 = vmul.f32 %v4614_v28, %v5315_v23  ;;  %v1650_v49 = vmul.f32 %v4614_v28, %v5318_v24  ;;  %v1693_v23 = vld [vmem:[%s6071_s7 + $0x70] sm:$0xff]  ;;  %v1690_v24 = vld [vmem:[%s6071_s7 + $0x58] sm:$0xff] }
 0x621   : > { %v3932_v46 = vcombine.high %v1689_v35, %v1693_v23  ;;  %v3934_v48 = vcombine.high %v1690_v24, %v1694_v36  ;;  %v3931_v0 = vcombine.low %v1689_v35, %v1693_v23  ;;  %v3933_v53 = vcombine.low %v1690_v24, %v1694_v36  ;;  %v1737_v28 = vld [vmem:[%s6071_s7 + $0x1d0] sm:$0xff]  ;;  %v1746_v36 = vld [vmem:[%s6071_s7 + $0x218] sm:$0xff] }
 0x622   : > { %v1663_v31 = vmul.f32 %v1659_v26, %v1650_v49  ;;  %v1662_v32 = vmul.f32 %v1655_v27, %v1649_v47  ;;  %v3972_v26 = vcombine.high %v1729_v18, %v1733_v19  ;;  %v3974_v27 = vcombine.high %v1730_v20, %v1734_v21  ;;  %v1741_v47 = vld [vmem:[%s6071_s7 + $0x1f0] sm:$0xff]  ;;  %v1738_v49 = vld [vmem:[%s6071_s7 + $0x1d8] sm:$0xff] }
 0x623   : > { %v1745_v23 = vld [vmem:[%s6071_s7 + $0x210] sm:$0xff]  ;;  %v3979_v43 = vcombine.low %v1737_v28, %v1741_v47 }
 0x624   : > { %v5408_v33 = vadd.f32 %v1672_v29, %v1663_v31  ;;  %v5410_v34 = vadd.f32 %v1668_v30, %v1662_v32  ;;  %v1742_v29 = vld [vmem:[%s6071_s7 + $0x1f8] sm:$0xff]  ;;  %v3971_v30 = vcombine.low %v1729_v18, %v1733_v19  ;;  %v3973_v31 = vcombine.low %v1730_v20, %v1734_v21  ;;  %v1749_v24 = vld [vmem:[%s6071_s7 + $0x230] sm:$0xff] }
 0x625   : > { %v3980_v32 = vcombine.high %v1737_v28, %v1741_v47  ;;  %v3982_v35 = vcombine.high %v1738_v49, %v1742_v29  ;;  %v1785_v20 = vld [vmem:[%s6071_s7 + $0x350] sm:$0xff] }
 0x626   : > { %v1678_v37 = vpack.c.bf16 %v5408_v33, %v5408_v33  ;;  %v5428_v40 = vpack.c.bf16 %v5410_v34, %v5410_v34  ;;  %v1789_v21 = vld [vmem:[%s6071_s7 + $0x370] sm:$0xff] }
 0x627   : > { %v4028_v28 = vcombine.high %v1785_v20, %v1789_v21 }
 0x628   : > { %2521 = vmatprep.mubr.bf16.mxu0 %v1678_v37  ;;  %2562 = vmatprep.mubr.bf16.mxu1 %v1678_v37 }
 0x629   : > { %2522 = vmatmul.mubr.bf16.vlgmr.msra.gmra.mrb[16].mxu0 %v5428_v40  ;;  %2563 = vmatmul.mubr.bf16.vlgmr.msra.gmra.mrb[16].mxu1 %v5428_v40 }
 0x62a   : > { %2572 = vmatpush1.bf16.msra.mxu0 %v3923_v16  ;;  %2613 = vmatpush1.bf16.msra.mxu1 %v3925_v17  ;;  %v3964_v16 = vcombine.high %v1721_v10, %v1725_v11  ;;  %v3966_v17 = vcombine.high %v1722_v12, %v1726_v13  ;;  %v4012_v10 = vcombine.high %v1769_v4, %v1773_v5  ;;  %v1777_v12 = vld [vmem:[%s6071_s7 + $0x310] sm:$0xff] }
 0x62b   : > { %2603 = vmatprep.mubr.bf16.mxu0 %v1678_v37  ;;  %2644 = vmatprep.mubr.bf16.mxu1 %v1678_v37  ;;  %v1750_v37 = vld [vmem:[%s6071_s7 + $0x238] sm:$0xff]  ;;  %v1781_v13 = vld [vmem:[%s6071_s7 + $0x330] sm:$0xff] }
 0x62c   : > { %2573 = vmatprep.subr.bf16.mxu0 %v3932_v46  ;;  %2614 = vmatprep.subr.bf16.mxu1 %v3934_v48  ;;  %v3981_v46 = vcombine.low %v1738_v49, %v1742_v29  ;;  %v3988_v48 = vcombine.high %v1745_v23, %v1749_v24  ;;  %v3990_v50 = vcombine.high %v1746_v36, %v1750_v37  ;;  %v1793_v49 = vld [vmem:[%s6071_s7 + $0x390] sm:$0xff] }
 0x62d   : > { %v4020_v18 = vcombine.high %v1777_v12, %v1781_v13  ;;  %v1797_v29 = vld [vmem:[%s6071_s7 + $0x3b0] sm:$0xff] }
 0x62e   : > { %2574 = vmatpush1.bf16.msra.mxu0 %v3931_v0  ;;  %2615 = vmatpush1.bf16.msra.mxu1 %v3933_v53  ;;  %v1754_v0 = vld [vmem:[%s6071_s7 + $0x258] sm:$0xff] }
 0x62f   : > { %2575 = vmatprep.subr.bf16.mxu0 %v3940_v54  ;;  %2616 = vmatprep.subr.bf16.mxu1 %v3942_v45  ;;  %v1758_v53 = vld [vmem:[%s6071_s7 + $0x278] sm:$0xff]  ;;  %v3987_v54 = vcombine.low %v1745_v23, %v1749_v24  ;;  %v3989_v45 = vcombine.low %v1746_v36, %v1750_v37  ;;  %v4036_v23 = vcombine.high %v1793_v49, %v1797_v29  ;;  %v1801_v36 = vld [vmem:[%s6071_s7 + $0x3d0] sm:$0xff] }
 0x630   : > { %v3998_v56 = vcombine.high %v1754_v0, %v1758_v53  ;;  %v1805_v37 = vld [vmem:[%s6071_s7 + $0x3f0] sm:$0xff] }
 0x632   : > { %2576 = vmatpush1.bf16.msra.mxu0 %v3939_v59  ;;  %2617 = vmatpush1.bf16.msra.mxu1 %v3941_v60  ;;  %v1762_v59 = vld [vmem:[%s6071_s7 + $0x298] sm:$0xff] }
 0x633   : > { %2577 = vmatprep.subr.bf16.mxu0 %v3948_v61  ;;  %2618 = vmatprep.subr.bf16.mxu1 %v3950_v62  ;;  %v1766_v60 = vld [vmem:[%s6071_s7 + $0x2b8] sm:$0xff]  ;;  %v3995_v61 = vcombine.low %v1753_v51, %v1757_v52  ;;  %v3997_v62 = vcombine.low %v1754_v0, %v1758_v53  ;;  %v4044_v51 = vcombine.high %v1801_v36, %v1805_v37 }
 0x634   : > { %v4006_v1 = vcombine.high %v1762_v59, %v1766_v60  ;;  %v4043_v0 = vcombine.low %v1801_v36, %v1805_v37  ;;  %v4484_v36 = vld [vmem:[%s6073_s9 + $0x1b4] ss:$8 sps:$4 sm:$0xff]   ;;  %v4479_v37 = vld [vmem:[%s6073_s9 + $0xb0] ss:$8 sps:$4 sm:$0xff]  }
 0x636   : > { %2578 = vmatpush1.bf16.msra.mxu0 %v3947_v6  ;;  %2619 = vmatpush1.bf16.msra.mxu1 %v3949_v7  ;;  %v1770_v6 = vld [vmem:[%s6071_s7 + $0x2d8] sm:$0xff] }
 0x637   : > { %2579 = vmatprep.subr.bf16.mxu0 %v3956_v8  ;;  %2620 = vmatprep.subr.bf16.mxu1 %v3958_v9  ;;  %v1774_v7 = vld [vmem:[%s6071_s7 + $0x2f8] sm:$0xff]  ;;  %v4003_v8 = vcombine.low %v1761_v57, %v1765_v58  ;;  %v4005_v9 = vcombine.low %v1762_v59, %v1766_v60 }
 0x638   : > { %v4014_v11 = vcombine.high %v1770_v6, %v1774_v7  ;;  %v4421_v57 = vld [vmem:[%s6073_s9 + $0x14] ss:$8 sps:$4 sm:$0xff]   ;;  %v4419_v59 = vld [vmem:[%s6073_s9 + $0x10] ss:$8 sps:$4 sm:$0xff]  }
 0x639   : > { %v4424_v58 = vld [vmem:[%s6073_s9 + $0x114] ss:$8 sps:$4 sm:$0xff]   ;;  %v4422_v60 = vld [vmem:[%s6073_s9 + $0x110] ss:$8 sps:$4 sm:$0xff]  }
 0x63a   : > { %2580 = vmatpush1.bf16.msra.mxu0 %v3955_v14  ;;  %2621 = vmatpush1.bf16.msra.mxu1 %v3957_v15  ;;  %v1778_v14 = vld [vmem:[%s6071_s7 + $0x318] sm:$0xff] }
 0x63b   : > { %2581 = vmatprep.subr.bf16.mxu0 %v3964_v16  ;;  %2622 = vmatprep.subr.bf16.mxu1 %v3966_v17  ;;  %v1782_v15 = vld [vmem:[%s6071_s7 + $0x338] sm:$0xff]  ;;  %v4011_v16 = vcombine.low %v1769_v4, %v1773_v5  ;;  %v4013_v17 = vcombine.low %v1770_v6, %v1774_v7  ;;  %v4439_v7 = vld [vmem:[%s6073_s9 + $0x44] ss:$8 sps:$4 sm:$0xff]  }
 0x63c   : > { %v4022_v19 = vcombine.high %v1778_v14, %v1782_v15  ;;  %v4436_v4 = vld [vmem:[%s6073_s9 + $0x134] ss:$8 sps:$4 sm:$0xff]   ;;  %v4431_v5 = vld [vmem:[%s6073_s9 + $0x30] ss:$8 sps:$4 sm:$0xff]  }
 0x63d   : > { %v4434_v6 = vld [vmem:[%s6073_s9 + $0x130] ss:$8 sps:$4 sm:$0xff]  }
 0x63e   : > { %2582 = vmatpush1.bf16.msra.mxu0 %v3963_v22  ;;  %2623 = vmatpush1.bf16.msra.mxu1 %v3965_v25  ;;  %v1786_v22 = vld [vmem:[%s6071_s7 + $0x358] sm:$0xff] }
 0x63f   : > { %2583 = vmatprep.subr.bf16.mxu0 %v3972_v26  ;;  %2624 = vmatprep.subr.bf16.mxu1 %v3974_v27  ;;  %v1790_v25 = vld [vmem:[%s6071_s7 + $0x378] sm:$0xff]  ;;  %v4019_v26 = vcombine.low %v1777_v12, %v1781_v13  ;;  %v4021_v27 = vcombine.low %v1778_v14, %v1782_v15  ;;  %v4451_v15 = vld [vmem:[%s6073_s9 + $0x64] ss:$8 sps:$4 sm:$0xff]  }
 0x640   : > { %v4030_v47 = vcombine.high %v1786_v22, %v1790_v25  ;;  %v4448_v12 = vld [vmem:[%s6073_s9 + $0x154] ss:$8 sps:$4 sm:$0xff]   ;;  %v4443_v13 = vld [vmem:[%s6073_s9 + $0x50] ss:$8 sps:$4 sm:$0xff]  }
 0x641   : > { %v4446_v14 = vld [vmem:[%s6073_s9 + $0x150] ss:$8 sps:$4 sm:$0xff]  }
 0x642   : > { %2584 = vmatpush1.bf16.msra.mxu0 %v3971_v30  ;;  %2625 = vmatpush1.bf16.msra.mxu1 %v3973_v31  ;;  %v1794_v30 = vld [vmem:[%s6071_s7 + $0x398] sm:$0xff] }
 0x643   : > { %2585 = vmatprep.subr.bf16.mxu0 %v3980_v32  ;;  %2626 = vmatprep.subr.bf16.mxu1 %v3982_v35  ;;  %v1798_v31 = vld [vmem:[%s6071_s7 + $0x3b8] sm:$0xff]  ;;  %v4027_v32 = vcombine.low %v1785_v20, %v1789_v21  ;;  %v4029_v35 = vcombine.low %v1786_v22, %v1790_v25  ;;  %v4463_v25 = vld [vmem:[%s6073_s9 + $0x84] ss:$8 sps:$4 sm:$0xff]  }
 0x644   : > { %v4038_v24 = vcombine.high %v1794_v30, %v1798_v31  ;;  %v4460_v20 = vld [vmem:[%s6073_s9 + $0x174] ss:$8 sps:$4 sm:$0xff]   ;;  %v4455_v21 = vld [vmem:[%s6073_s9 + $0x70] ss:$8 sps:$4 sm:$0xff]  }
 0x645   : > { %v4458_v22 = vld [vmem:[%s6073_s9 + $0x170] ss:$8 sps:$4 sm:$0xff]  }
 0x646   : > { %2586 = vmatpush1.bf16.msra.mxu0 %v3979_v43  ;;  %2627 = vmatpush1.bf16.msra.mxu1 %v3981_v46  ;;  %v1802_v43 = vld [vmem:[%s6071_s7 + $0x3d8] sm:$0xff] }
 0x647   : > { %2587 = vmatprep.subr.bf16.mxu0 %v3988_v48  ;;  %2628 = vmatprep.subr.bf16.mxu1 %v3990_v50  ;;  %v1806_v46 = vld [vmem:[%s6071_s7 + $0x3f8] sm:$0xff]  ;;  %v4035_v48 = vcombine.low %v1793_v49, %v1797_v29  ;;  %v4037_v50 = vcombine.low %v1794_v30, %v1798_v31  ;;  %v4475_v31 = vld [vmem:[%s6073_s9 + $0xa4] ss:$8 sps:$4 sm:$0xff]  }
 0x648   : > { %v4046_v52 = vcombine.high %v1802_v43, %v1806_v46  ;;  %v4045_v53 = vcombine.low %v1802_v43, %v1806_v46  ;;  %v4472_v49 = vld [vmem:[%s6073_s9 + $0x194] ss:$8 sps:$4 sm:$0xff]   ;;  %v4467_v29 = vld [vmem:[%s6073_s9 + $0x90] ss:$8 sps:$4 sm:$0xff]   ;;  %v4487_v46 = vld [vmem:[%s6073_s9 + $0xc4] ss:$8 sps:$4 sm:$0xff]  }
 0x649   : > { %v4470_v30 = vld [vmem:[%s6073_s9 + $0x190] ss:$8 sps:$4 sm:$0xff]  }
 0x64a   : > { %2588 = vmatpush1.bf16.msra.mxu0 %v3987_v54  ;;  %2629 = vmatpush1.bf16.msra.mxu1 %v3989_v45  ;;  %v4415_v54 = vld [vmem:[%s6073_s9 + $0x4] ss:$8 sps:$4 sm:$0xff]   ;;  %v4482_v43 = vld [vmem:[%s6073_s9 + $0x1b0] ss:$8 sps:$4 sm:$0xff]  }
 0x64b   : > { %2589 = vmatprep.subr.bf16.mxu0 %v3996_v55  ;;  %2630 = vmatprep.subr.bf16.mxu1 %v3998_v56  ;;  %v4418_v45 = vld [vmem:[%s6073_s9 + $0x104] ss:$8 sps:$4 sm:$0xff]   ;;  %v4413_v55 = vld [vmem:[%s6073_s9] ss:$8 sps:$4 sm:$0xff]  }
 0x64c   : > { %v4416_v56 = vld [vmem:[%s6073_s9 + $0x100] ss:$8 sps:$4 sm:$0xff]  }
 0x64e   : > { %2590 = vmatpush1.bf16.msra.mxu0 %v3995_v61  ;;  %2631 = vmatpush1.bf16.msra.mxu1 %v3997_v62  ;;  %v4427_v61 = vld [vmem:[%s6073_s9 + $0x24] ss:$8 sps:$4 sm:$0xff]   ;;  %v4425_v62 = vld [vmem:[%s6073_s9 + $0x20] ss:$8 sps:$4 sm:$0xff]  }
 0x64f   : > { %2591 = vmatprep.subr.bf16.mxu0 %v4004_v63  ;;  %2632 = vmatprep.subr.bf16.mxu1 %v4006_v1  ;;  %v4428_v63 = vld [vmem:[%s6073_s9 + $0x120] ss:$8 sps:$4 sm:$0xff]   ;;  %v4433_v1 = vld [vmem:[%s6073_s9 + $0x34] ss:$8 sps:$4 sm:$0xff]  }
 0x652   : > { %2592 = vmatpush1.bf16.msra.mxu0 %v4003_v8  ;;  %2633 = vmatpush1.bf16.msra.mxu1 %v4005_v9  ;;  %v4442_v8 = vld [vmem:[%s6073_s9 + $0x144] ss:$8 sps:$4 sm:$0xff]   ;;  %v4437_v9 = vld [vmem:[%s6073_s9 + $0x40] ss:$8 sps:$4 sm:$0xff]  }
 0x653   : > { %2593 = vmatprep.subr.bf16.mxu0 %v4012_v10  ;;  %2634 = vmatprep.subr.bf16.mxu1 %v4014_v11  ;;  %v4440_v10 = vld [vmem:[%s6073_s9 + $0x140] ss:$8 sps:$4 sm:$0xff]   ;;  %v4445_v11 = vld [vmem:[%s6073_s9 + $0x54] ss:$8 sps:$4 sm:$0xff]  }
 0x656   : > { %2594 = vmatpush1.bf16.msra.mxu0 %v4011_v16  ;;  %2635 = vmatpush1.bf16.msra.mxu1 %v4013_v17  ;;  %v4454_v16 = vld [vmem:[%s6073_s9 + $0x164] ss:$8 sps:$4 sm:$0xff]   ;;  %v4449_v17 = vld [vmem:[%s6073_s9 + $0x60] ss:$8 sps:$4 sm:$0xff]  }
 0x657   : > { %2595 = vmatprep.subr.bf16.mxu0 %v4020_v18  ;;  %2636 = vmatprep.subr.bf16.mxu1 %v4022_v19  ;;  %v4452_v18 = vld [vmem:[%s6073_s9 + $0x160] ss:$8 sps:$4 sm:$0xff]   ;;  %v4457_v19 = vld [vmem:[%s6073_s9 + $0x74] ss:$8 sps:$4 sm:$0xff]  }
 0x65a   : > { %2596 = vmatpush1.bf16.msra.mxu0 %v4019_v26  ;;  %2637 = vmatpush1.bf16.msra.mxu1 %v4021_v27  ;;  %v4466_v26 = vld [vmem:[%s6073_s9 + $0x184] ss:$8 sps:$4 sm:$0xff]   ;;  %v4461_v27 = vld [vmem:[%s6073_s9 + $0x80] ss:$8 sps:$4 sm:$0xff]  }
 0x65b   : > { %2597 = vmatprep.subr.bf16.mxu0 %v4028_v28  ;;  %2638 = vmatprep.subr.bf16.mxu1 %v4030_v47  ;;  %v4464_v28 = vld [vmem:[%s6073_s9 + $0x180] ss:$8 sps:$4 sm:$0xff]   ;;  %v4469_v47 = vld [vmem:[%s6073_s9 + $0x94] ss:$8 sps:$4 sm:$0xff]  }
 0x65e   : > { %2598 = vmatpush1.bf16.msra.mxu0 %v4027_v32  ;;  %2639 = vmatpush1.bf16.msra.mxu1 %v4029_v35  ;;  %v4478_v32 = vld [vmem:[%s6073_s9 + $0x1a4] ss:$8 sps:$4 sm:$0xff]   ;;  %v4473_v35 = vld [vmem:[%s6073_s9 + $0xa0] ss:$8 sps:$4 sm:$0xff]  }
 0x65f   : > { %2599 = vmatprep.subr.bf16.mxu0 %v4036_v23  ;;  %2640 = vmatprep.subr.bf16.mxu1 %v4038_v24  ;;  %v4476_v23 = vld [vmem:[%s6073_s9 + $0x1a0] ss:$8 sps:$4 sm:$0xff]   ;;  %v4481_v24 = vld [vmem:[%s6073_s9 + $0xb4] ss:$8 sps:$4 sm:$0xff]  }
 0x662   : > { %2600 = vmatpush1.bf16.msra.mxu0 %v4035_v48  ;;  %2641 = vmatpush1.bf16.msra.mxu1 %v4037_v50  ;;  %v4490_v48 = vld [vmem:[%s6073_s9 + $0x1c4] ss:$8 sps:$4 sm:$0xff]   ;;  %v4485_v50 = vld [vmem:[%s6073_s9 + $0xc0] ss:$8 sps:$4 sm:$0xff]  }
 0x663   : > { %2601 = vmatprep.subr.bf16.mxu0 %v4044_v51  ;;  %2642 = vmatprep.subr.bf16.mxu1 %v4046_v52  ;;  %v4488_v51 = vld [vmem:[%s6073_s9 + $0x1c0] ss:$8 sps:$4 sm:$0xff]   ;;  %v4493_v52 = vld [vmem:[%s6073_s9 + $0xd4] ss:$8 sps:$4 sm:$0xff]  }
 0x666   : > { %2602 = vmatpush1.bf16.msra.mxu0 %v4043_v0  ;;  %2643 = vmatpush1.bf16.msra.mxu1 %v4045_v53  ;;  %v4496_v0 = vld [vmem:[%s6073_s9 + $0x1d4] ss:$8 sps:$4 sm:$0xff]   ;;  %v4491_v53 = vld [vmem:[%s6073_s9 + $0xd0] ss:$8 sps:$4 sm:$0xff]  }
 0x667   : > { %3513 = vmatprep.subr.bf16.mxu0 %v4415_v54  ;;  %3554 = vmatprep.subr.bf16.mxu1 %v4418_v45  ;;  %v4494_v54 = vld [vmem:[%s6073_s9 + $0x1d0] ss:$8 sps:$4 sm:$0xff]   ;;  %v4499_v45 = vld [vmem:[%s6073_s9 + $0xe4] ss:$8 sps:$4 sm:$0xff]  }
 0x669   : > { %2604 = vmatmul.mubr.bf16.vlgmr.msra.gmra.mrb[20].mxu0 %v5428_v40  ;;  %2645 = vmatmul.mubr.bf16.vlgmr.msra.gmra.mrb[20].mxu1 %v5428_v40  ;;  %v4430_v40 = vld [vmem:[%s6073_s9 + $0x124] ss:$8 sps:$4 sm:$0xff]  }
 0x66a   : > { %3514 = vmatpush1.bf16.msra.mxu0 %v4413_v55  ;;  %3555 = vmatpush1.bf16.msra.mxu1 %v4416_v56  ;;  %v4502_v55 = vld [vmem:[%s6073_s9 + $0x1e4] ss:$8 sps:$4 sm:$0xff]   ;;  %v4497_v56 = vld [vmem:[%s6073_s9 + $0xe0] ss:$8 sps:$4 sm:$0xff]  }
 0x66b   : > { %3515 = vmatprep.subr.bf16.mxu0 %v4421_v57  ;;  %3556 = vmatprep.subr.bf16.mxu1 %v4424_v58  ;;  %v4500_v57 = vld [vmem:[%s6073_s9 + $0x1e0] ss:$8 sps:$4 sm:$0xff]   ;;  %v4505_v58 = vld [vmem:[%s6073_s9 + $0xf4] ss:$8 sps:$4 sm:$0xff]  }
 0x66e   : > { %3516 = vmatpush1.bf16.msra.mxu0 %v4419_v59  ;;  %3557 = vmatpush1.bf16.msra.mxu1 %v4422_v60  ;;  %v4508_v59 = vld [vmem:[%s6073_s9 + $0x1f4] ss:$8 sps:$4 sm:$0xff]   ;;  %v4503_v60 = vld [vmem:[%s6073_s9 + $0xf0] ss:$8 sps:$4 sm:$0xff]  }
 0x66f   : > { %3517 = vmatprep.subr.bf16.mxu0 %v4427_v61  ;;  %3558 = vmatprep.subr.bf16.mxu1 %v4430_v40  ;;  %v4506_v61 = vld [vmem:[%s6073_s9 + $0x1f0] ss:$8 sps:$4 sm:$0xff]   ;;  %v4511_v40 = vld [vmem:[%s6073_s9 + $0x204] ss:$8 sps:$4 sm:$0xff]  }
 0x672   : > { %3518 = vmatpush1.bf16.msra.mxu0 %v4425_v62  ;;  %3559 = vmatpush1.bf16.msra.mxu1 %v4428_v63  ;;  %v4514_v62 = vld [vmem:[%s6073_s9 + $0x304] ss:$8 sps:$4 sm:$0xff]  }
 0x673   : > { %3519 = vmatprep.subr.bf16.mxu0 %v4433_v1  ;;  %3560 = vmatprep.subr.bf16.mxu1 %v4436_v4  ;;  %v5803_v63 = vld [vmem:[%s6072_s8] sm:$0xff] }
 0x674   : > { %v1812_v1 = vrot.slane %v5803_v63, %v5048_v42  ;;  %v1820_v4 = vrot.slane %v5803_v63, %v554_v39 }
 0x676   : > { %3520 = vmatpush1.bf16.msra.mxu0 %v4431_v5  ;;  %3561 = vmatpush1.bf16.msra.mxu1 %v4434_v6  ;;  %v1816_v5 = vrot.slane %v5803_v63, %v5053_v44  ;;  %v1824_v6 = vrot.slane %v5803_v63, %v558_v41 }
 0x677   : > { %3521 = vmatprep.subr.bf16.mxu0 %v4439_v7  ;;  %3562 = vmatprep.subr.bf16.mxu1 %v4442_v8 }
 0x67a   : > { %3522 = vmatpush1.bf16.msra.mxu0 %v4437_v9  ;;  %3563 = vmatpush1.bf16.msra.mxu1 %v4440_v10 }
 0x67b   : > { %3523 = vmatprep.subr.bf16.mxu0 %v4445_v11  ;;  %3564 = vmatprep.subr.bf16.mxu1 %v4448_v12 }
 0x67e   : > { %3524 = vmatpush1.bf16.msra.mxu0 %v4443_v13  ;;  %3565 = vmatpush1.bf16.msra.mxu1 %v4446_v14 }
 0x67f   : > { %3525 = vmatprep.subr.bf16.mxu0 %v4451_v15  ;;  %3566 = vmatprep.subr.bf16.mxu1 %v4454_v16 }
 0x682   : > { %3526 = vmatpush1.bf16.msra.mxu0 %v4449_v17  ;;  %3567 = vmatpush1.bf16.msra.mxu1 %v4452_v18 }
 0x683   : > { %3527 = vmatprep.subr.bf16.mxu0 %v4457_v19  ;;  %3568 = vmatprep.subr.bf16.mxu1 %v4460_v20 }
 0x686   : > { %3528 = vmatpush1.bf16.msra.mxu0 %v4455_v21  ;;  %3569 = vmatpush1.bf16.msra.mxu1 %v4458_v22 }
 0x687   : > { %3529 = vmatprep.subr.bf16.mxu0 %v4463_v25  ;;  %3570 = vmatprep.subr.bf16.mxu1 %v4466_v26 }
 0x68a   : > { %3530 = vmatpush1.bf16.msra.mxu0 %v4461_v27  ;;  %3571 = vmatpush1.bf16.msra.mxu1 %v4464_v28 }
 0x68b   : > { %3531 = vmatprep.subr.bf16.mxu0 %v4469_v47  ;;  %3572 = vmatprep.subr.bf16.mxu1 %v4472_v49 }
 0x68e   : > { %3532 = vmatpush1.bf16.msra.mxu0 %v4467_v29  ;;  %3573 = vmatpush1.bf16.msra.mxu1 %v4470_v30 }
 0x68f   : > { %3533 = vmatprep.subr.bf16.mxu0 %v4475_v31  ;;  %3574 = vmatprep.subr.bf16.mxu1 %v4478_v32 }
 0x692   : > { %3534 = vmatpush1.bf16.msra.mxu0 %v4473_v35  ;;  %3575 = vmatpush1.bf16.msra.mxu1 %v4476_v23 }
 0x693   : > { %3535 = vmatprep.subr.bf16.mxu0 %v4481_v24  ;;  %3576 = vmatprep.subr.bf16.mxu1 %v4484_v36 }
 0x696   : > { %3536 = vmatpush1.bf16.msra.mxu0 %v4479_v37  ;;  %3577 = vmatpush1.bf16.msra.mxu1 %v4482_v43 }
 0x697   : > { %3537 = vmatprep.subr.bf16.mxu0 %v4487_v46  ;;  %3578 = vmatprep.subr.bf16.mxu1 %v4490_v48 }
 0x69a   : > { %3538 = vmatpush1.bf16.msra.mxu0 %v4485_v50  ;;  %3579 = vmatpush1.bf16.msra.mxu1 %v4488_v51 }
 0x69b   : > { %3539 = vmatprep.subr.bf16.mxu0 %v4493_v52  ;;  %3580 = vmatprep.subr.bf16.mxu1 %v4496_v0 }
 0x69e   : > { %3540 = vmatpush1.bf16.msra.mxu0 %v4491_v53  ;;  %3581 = vmatpush1.bf16.msra.mxu1 %v4494_v54 }
 0x69f   : > { %3541 = vmatprep.subr.bf16.mxu0 %v4499_v45  ;;  %3582 = vmatprep.subr.bf16.mxu1 %v4502_v55 }
 0x6a2   : > { %3542 = vmatpush1.bf16.msra.mxu0 %v4497_v56  ;;  %3583 = vmatpush1.bf16.msra.mxu1 %v4500_v57 }
 0x6a3   : > { %3543 = vmatprep.subr.bf16.mxu0 %v4505_v58  ;;  %3584 = vmatprep.subr.bf16.mxu1 %v4508_v59 }
 0x6a6   : > { %3544 = vmatpush1.bf16.msra.mxu0 %v4503_v60  ;;  %3585 = vmatpush1.bf16.msra.mxu1 %v4506_v61  ;;  %v4509_v60 = vld [vmem:[%s6073_s9 + $0x200] ss:$8 sps:$4 sm:$0xff]  }
 0x6a7   : > { %3595 = vmatprep.subr.bf16.mxu0 %v4511_v40  ;;  %3636 = vmatprep.subr.bf16.mxu1 %v4514_v62  ;;  %v4512_v62 = vld [vmem:[%s6073_s9 + $0x300] ss:$8 sps:$4 sm:$0xff]  }
 0x6fc   : > { %v2523_v7 = vpop.f32.mrb[16].mxu0  ;;  %v2564_v8 = vpop.f32.mrb[16].mxu1 }
 0x6fd   : > { %v2524_v9 = vadd.f32 %v2523_v7, %v1812_v1  ;;  %v2565_v10 = vadd.f32 %v2564_v8, %v1820_v4  ;;  %v2525_v11 = vpop.f32.mrb[17].mxu0  ;;  %v2566_v12 = vpop.f32.mrb[17].mxu1  ;;  %v4517_v4 = vld [vmem:[%s6073_s9 + $0x214] ss:$8 sps:$4 sm:$0xff]   ;;  %v4515_v7 = vld [vmem:[%s6073_s9 + $0x210] ss:$8 sps:$4 sm:$0xff]  }
 0x6fe   : > { %v2526_v13 = vadd.f32 %v2525_v11, %v1816_v5  ;;  %v2567_v14 = vadd.f32 %v2566_v12, %v1824_v6  ;;  %v2527_v15 = vpop.f32.mrb[18].mxu0  ;;  %v2568_v16 = vpop.f32.mrb[18].mxu1  ;;  %v4520_v6 = vld [vmem:[%s6073_s9 + $0x314] ss:$8 sps:$4 sm:$0xff]   ;;  %v4518_v8 = vld [vmem:[%s6073_s9 + $0x310] ss:$8 sps:$4 sm:$0xff]  }
 0x6ff   : > { %v2661_v17 = vmul.f32 0.044715, %v2524_v9  ;;  %v2663_v18 = vmul.f32 0.044715, %v2565_v10  ;;  %v2528_v39 = vpop.f32.mrb[19].mxu0  ;;  %v2569_v19 = vpop.f32.mrb[19].mxu1 }
 0x700   : > { %v2662_v20 = vmul.f32 0.044715, %v2526_v13  ;;  %v2664_v21 = vmul.f32 0.044715, %v2567_v14  ;;  %v2653_v46 = vmul.f32 0.5, %v2524_v9  ;;  %v2654_v51 = vmul.f32 0.5, %v2526_v13 }
 0x701   : > { %v2669_v22 = vmul.f32 %v2661_v17, %v2524_v9  ;;  %v2671_v25 = vmul.f32 %v2663_v18, %v2565_v10  ;;  %v2656_v53 = vmul.f32 0.5, %v2567_v14  ;;  %v2655_v56 = vmul.f32 0.5, %v2565_v10  ;;  %v4521_v11 = vld [vmem:[%s6073_s9 + $0x220] ss:$8 sps:$4 sm:$0xff]   ;;  %v4527_v15 = vld [vmem:[%s6073_s9 + $0x230] ss:$8 sps:$4 sm:$0xff]  }
 0x702   : > { %v2670_v26 = vmul.f32 %v2662_v20, %v2526_v13  ;;  %v2672_v41 = vmul.f32 %v2664_v21, %v2567_v14  ;;  %v4524_v12 = vld [vmem:[%s6073_s9 + $0x320] ss:$8 sps:$4 sm:$0xff]   ;;  %v4530_v16 = vld [vmem:[%s6073_s9 + $0x330] ss:$8 sps:$4 sm:$0xff]   ;;  %v4535_v17 = vld [vmem:[%s6073_s9 + $0x244] ss:$8 sps:$4 sm:$0xff]  }
 0x703   : > { %v2677_v27 = vmul.f32 %v2669_v22, %v2524_v9  ;;  %v2679_v28 = vmul.f32 %v2671_v25, %v2565_v10  ;;  %v4538_v18 = vld [vmem:[%s6073_s9 + $0x344] ss:$8 sps:$4 sm:$0xff]   ;;  %v4533_v39 = vld [vmem:[%s6073_s9 + $0x240] ss:$8 sps:$4 sm:$0xff]   ;;  %v4541_v20 = vld [vmem:[%s6073_s9 + $0x254] ss:$8 sps:$4 sm:$0xff]  }
 0x704   : > { %v2678_v47 = vmul.f32 %v2670_v26, %v2526_v13  ;;  %v2680_v49 = vmul.f32 %v2672_v41, %v2567_v14  ;;  %v4536_v19 = vld [vmem:[%s6073_s9 + $0x340] ss:$8 sps:$4 sm:$0xff]   ;;  %v4544_v21 = vld [vmem:[%s6073_s9 + $0x354] ss:$8 sps:$4 sm:$0xff]   ;;  %v4539_v22 = vld [vmem:[%s6073_s9 + $0x250] ss:$8 sps:$4 sm:$0xff]  }
 0x705   : > { %v2685_v29 = vadd.f32 %v2677_v27, %v2524_v9  ;;  %v2687_v30 = vadd.f32 %v2679_v28, %v2565_v10  ;;  %v4523_v9 = vld [vmem:[%s6073_s9 + $0x224] ss:$8 sps:$4 sm:$0xff]   ;;  %v4542_v25 = vld [vmem:[%s6073_s9 + $0x350] ss:$8 sps:$4 sm:$0xff]   ;;  %v4545_v27 = vld [vmem:[%s6073_s9 + $0x260] ss:$8 sps:$4 sm:$0xff]  }
 0x706   : > { %v2686_v31 = vadd.f32 %v2678_v47, %v2526_v13  ;;  %v2688_v32 = vadd.f32 %v2680_v49, %v2567_v14  ;;  %v4526_v10 = vld [vmem:[%s6073_s9 + $0x324] ss:$8 sps:$4 sm:$0xff]   ;;  %v4529_v13 = vld [vmem:[%s6073_s9 + $0x234] ss:$8 sps:$4 sm:$0xff]   ;;  %v4548_v28 = vld [vmem:[%s6073_s9 + $0x360] ss:$8 sps:$4 sm:$0xff]  }
 0x707   : > { %v2693_v35 = vmul.f32 0.7978846, %v2685_v29  ;;  %v2695_v36 = vmul.f32 0.7978846, %v2687_v30  ;;  %v4532_v14 = vld [vmem:[%s6073_s9 + $0x334] ss:$8 sps:$4 sm:$0xff]  }
 0x708   : > { %v2694_v23 = vmul.f32 0.7978846, %v2686_v31  ;;  %v2696_v24 = vmul.f32 0.7978846, %v2688_v32  ;;  %v4547_v26 = vld [vmem:[%s6073_s9 + $0x264] ss:$8 sps:$4 sm:$0xff]  }
 0x709   : > { %4615 = vtanh.f32 %v2693_v35  ;;  %v4550_v41 = vld [vmem:[%s6073_s9 + $0x364] ss:$8 sps:$4 sm:$0xff]   ;;  %v4553_v47 = vld [vmem:[%s6073_s9 + $0x274] ss:$8 sps:$4 sm:$0xff]   ;;  %v4551_v29 = vld [vmem:[%s6073_s9 + $0x270] ss:$8 sps:$4 sm:$0xff]  }
 0x70a   : > { %4617 = vtanh.f32 %v2694_v23  ;;  %v4556_v49 = vld [vmem:[%s6073_s9 + $0x374] ss:$8 sps:$4 sm:$0xff]   ;;  %v1835_v30 = vsub.s32 6, %v5040_v38  ;;  %v4554_v31 = vld [vmem:[%s6073_s9 + $0x370] ss:$8 sps:$4 sm:$0xff]   ;;  %v1839_v35 = vsub.s32 7, %v5040_v38 }
 0x70b   : > { %4619 = vtanh.f32 %v2696_v24  ;;  %v4559_v32 = vld [vmem:[%s6073_s9 + $0x284] ss:$8 sps:$4 sm:$0xff]   ;;  %v1828_v24 = vrot.slane %v5803_v63, %v562_v2  ;;  %v4565_v2 = vld [vmem:[%s6073_s9 + $0x294] ss:$8 sps:$4 sm:$0xff]  }
 0x70c   : > { %4621 = vtanh.f32 %v2695_v36  ;;  %v4562_v23 = vld [vmem:[%s6073_s9 + $0x384] ss:$8 sps:$4 sm:$0xff]   ;;  %v1836_v36 = vrot.slane %v5803_v63, %v1835_v30  ;;  %v4592_v30 = vld [vmem:[%s6073_s9 + $0x3d4] ss:$8 sps:$4 sm:$0xff]  }
 0x713   : > { %v4616_v37 = vpop.eup %4615 }
 0x714   : > { %v4618_v43 = vpop.eup %4617  ;;  %v2709_v48 = vadd.f32 1.0, %v4616_v37  ;;  %v4557_v37 = vld [vmem:[%s6073_s9 + $0x280] ss:$8 sps:$4 sm:$0xff]  }
 0x715   : > { %v4620_v50 = vpop.eup %4619  ;;  %v2710_v52 = vadd.f32 1.0, %v4618_v43  ;;  %v4560_v43 = vld [vmem:[%s6073_s9 + $0x380] ss:$8 sps:$4 sm:$0xff]  }
 0x716   : > { %v4622_v0 = vpop.eup %4621  ;;  %v2712_v54 = vadd.f32 1.0, %v4620_v50  ;;  %v2717_v45 = vmul.f32 %v2709_v48, %v2653_v46  ;;  %v1832_v46 = vrot.slane %v5803_v63, %v566_v3  ;;  %v1840_v48 = vrot.slane %v5803_v63, %v1839_v35  ;;  %v4568_v50 = vld [vmem:[%s6073_s9 + $0x394] ss:$8 sps:$4 sm:$0xff]   ;;  %v4563_v3 = vld [vmem:[%s6073_s9 + $0x290] ss:$8 sps:$4 sm:$0xff]  }
 0x717   : > { %v2718_v55 = vmul.f32 %v2710_v52, %v2654_v51  ;;  %v2711_v57 = vadd.f32 1.0, %v4622_v0  ;;  %v4566_v63 = vld [vmem:[%s6073_s9 + $0x390] ss:$8 sps:$4 sm:$0xff]   ;;  %v4595_v35 = vld [vmem:[%s6073_s9 + $0x2e4] ss:$8 sps:$4 sm:$0xff]  }
 0x718   : > { %v2720_v58 = vmul.f32 %v2712_v54, %v2656_v53  ;;  %v2725_v1 = vpack.c.bf16 %v2717_v45, %v2717_v45 }
 0x719   : > { %v2726_v59 = vpack.c.bf16 %v2718_v55, %v2718_v55  ;;  %v2719_v61 = vmul.f32 %v2711_v57, %v2655_v56 }
 0x71a   : > { %v2728_v40 = vpack.c.bf16 %v2720_v58, %v2720_v58  ;;  %v4571_v58 = vld [vmem:[%s6073_s9 + $0x2a4] ss:$8 sps:$4 sm:$0xff]  }
 0x71b   : > { %3545 = vmatprep.mubr.bf16.mxu0 %v2726_v59  ;;  %v2727_v5 = vpack.c.bf16 %v2719_v61, %v2719_v61  ;;  %v4574_v59 = vld [vmem:[%s6073_s9 + $0x3a4] ss:$8 sps:$4 sm:$0xff]  }
 0x71c   : > { %3586 = vmatprep.mubr.bf16.mxu1 %v2728_v40  ;;  %3546 = vmatmul.mubr.bf16.vlgmr.msra.gmra.mrb[24].mxu0 %v2725_v1 }
 0x71d   : > { %3587 = vmatmul.mubr.bf16.vlgmr.msra.gmra.mrb[24].mxu1 %v2727_v5  ;;  %3596 = vmatpush1.bf16.msra.mxu0 %v4509_v60 }
 0x71e   : > { %3637 = vmatpush1.bf16.msra.mxu1 %v4512_v62  ;;  %3597 = vmatprep.subr.bf16.mxu0 %v4517_v4 }
 0x71f   : > { %3638 = vmatprep.subr.bf16.mxu1 %v4520_v6 }
 0x721   : > { %3598 = vmatpush1.bf16.msra.mxu0 %v4515_v7  ;;  %v4569_v7 = vld [vmem:[%s6073_s9 + $0x2a0] ss:$8 sps:$4 sm:$0xff]  }
 0x722   : > { %3639 = vmatpush1.bf16.msra.mxu1 %v4518_v8  ;;  %3599 = vmatprep.subr.bf16.mxu0 %v4523_v9 }
 0x723   : > { %3640 = vmatprep.subr.bf16.mxu1 %v4526_v10  ;;  %v4572_v10 = vld [vmem:[%s6073_s9 + $0x3a0] ss:$8 sps:$4 sm:$0xff]  }
 0x725   : > { %3600 = vmatpush1.bf16.msra.mxu0 %v4521_v11  ;;  %v4577_v11 = vld [vmem:[%s6073_s9 + $0x2b4] ss:$8 sps:$4 sm:$0xff]  }
 0x726   : > { %3641 = vmatpush1.bf16.msra.mxu1 %v4524_v12  ;;  %3601 = vmatprep.subr.bf16.mxu0 %v4529_v13 }
 0x727   : > { %3642 = vmatprep.subr.bf16.mxu1 %v4532_v14  ;;  %v4580_v14 = vld [vmem:[%s6073_s9 + $0x3b4] ss:$8 sps:$4 sm:$0xff]  }
 0x729   : > { %3602 = vmatpush1.bf16.msra.mxu0 %v4527_v15 }
 0x72a   : > { %3643 = vmatpush1.bf16.msra.mxu1 %v4530_v16  ;;  %3603 = vmatprep.subr.bf16.mxu0 %v4535_v17 }
 0x72b   : > { %3644 = vmatprep.subr.bf16.mxu1 %v4538_v18 }
 0x72d   : > { %3604 = vmatpush1.bf16.msra.mxu0 %v4533_v39  ;;  %v4575_v39 = vld [vmem:[%s6073_s9 + $0x2b0] ss:$8 sps:$4 sm:$0xff]  }
 0x72e   : > { %3645 = vmatpush1.bf16.msra.mxu1 %v4536_v19  ;;  %3605 = vmatprep.subr.bf16.mxu0 %v4541_v20  ;;  %v4578_v19 = vld [vmem:[%s6073_s9 + $0x3b0] ss:$8 sps:$4 sm:$0xff]   ;;  %v4583_v20 = vld [vmem:[%s6073_s9 + $0x2c4] ss:$8 sps:$4 sm:$0xff]  }
 0x72f   : > { %3646 = vmatprep.subr.bf16.mxu1 %v4544_v21 }
 0x731   : > { %3606 = vmatpush1.bf16.msra.mxu0 %v4539_v22 }
 0x732   : > { %3647 = vmatpush1.bf16.msra.mxu1 %v4542_v25  ;;  %3607 = vmatprep.subr.bf16.mxu0 %v4547_v26  ;;  %v4586_v25 = vld [vmem:[%s6073_s9 + $0x3c4] ss:$8 sps:$4 sm:$0xff]  }
 0x733   : > { %3648 = vmatprep.subr.bf16.mxu1 %v4550_v41 }
 0x735   : > { %3608 = vmatpush1.bf16.msra.mxu0 %v4545_v27 }
 0x736   : > { %3649 = vmatpush1.bf16.msra.mxu1 %v4548_v28  ;;  %3609 = vmatprep.subr.bf16.mxu0 %v4553_v47  ;;  %v4581_v47 = vld [vmem:[%s6073_s9 + $0x2c0] ss:$8 sps:$4 sm:$0xff]  }
 0x737   : > { %3650 = vmatprep.subr.bf16.mxu1 %v4556_v49  ;;  %v4584_v49 = vld [vmem:[%s6073_s9 + $0x3c0] ss:$8 sps:$4 sm:$0xff]  }
 0x739   : > { %3610 = vmatpush1.bf16.msra.mxu0 %v4551_v29  ;;  %v4589_v29 = vld [vmem:[%s6073_s9 + $0x2d4] ss:$8 sps:$4 sm:$0xff]  }
 0x73a   : > { %3651 = vmatpush1.bf16.msra.mxu1 %v4554_v31  ;;  %3611 = vmatprep.subr.bf16.mxu0 %v4559_v32  ;;  %v4587_v31 = vld [vmem:[%s6073_s9 + $0x2d0] ss:$8 sps:$4 sm:$0xff]  }
 0x73b   : > { %3652 = vmatprep.subr.bf16.mxu1 %v4562_v23  ;;  %v4590_v32 = vld [vmem:[%s6073_s9 + $0x3d0] ss:$8 sps:$4 sm:$0xff]   ;;  %v4598_v23 = vld [vmem:[%s6073_s9 + $0x3e4] ss:$8 sps:$4 sm:$0xff]  }
 0x73c   : > { %v2605_v51 = vpop.f32.mrb[20].mxu0  ;;  %v2646_v52 = vpop.f32.mrb[20].mxu1 }
 0x73d   : > { %v5933_v0 = vadd.f32 %v2605_v51, %v1828_v24  ;;  %v5935_v53 = vadd.f32 %v2646_v52, %v1836_v36  ;;  %v2607_v38 = vpop.f32.mrb[21].mxu0  ;;  %v2648_v54 = vpop.f32.mrb[21].mxu1  ;;  %3612 = vmatpush1.bf16.msra.mxu0 %v4557_v37  ;;  %v4593_v24 = vld [vmem:[%s6073_s9 + $0x2e0] ss:$8 sps:$4 sm:$0xff]   ;;  %v4601_v37 = vld [vmem:[%s6073_s9 + $0x2f4] ss:$8 sps:$4 sm:$0xff]  }
 0x73e   : > { %v5943_v45 = vadd.f32 %v2607_v38, %v1832_v46  ;;  %v5945_v55 = vadd.f32 %v2648_v54, %v1840_v48  ;;  %3653 = vmatpush1.bf16.msra.mxu1 %v4560_v43  ;;  %v2609_v56 = vpop.f32.mrb[22].mxu0  ;;  %v2650_v57 = vpop.f32.mrb[22].mxu1  ;;  %3613 = vmatprep.subr.bf16.mxu0 %v4565_v2  ;;  %v4596_v36 = vld [vmem:[%s6073_s9 + $0x3e0] ss:$8 sps:$4 sm:$0xff]   ;;  %v4604_v46 = vld [vmem:[%s6073_s9 + $0x3f4] ss:$8 sps:$4 sm:$0xff]  }
 0x73f   : > { %v2665_v60 = vmul.f32 0.044715, %v5933_v0  ;;  %v2667_v61 = vmul.f32 0.044715, %v5935_v53  ;;  %v2610_v40 = vpop.f32.mrb[23].mxu0  ;;  %v2651_v62 = vpop.f32.mrb[23].mxu1  ;;  %3654 = vmatprep.subr.bf16.mxu1 %v4568_v50 }
 0x740   : > { %v2666_v1 = vmul.f32 0.044715, %v5943_v45  ;;  %v2668_v4 = vmul.f32 0.044715, %v5945_v55  ;;  %v2657_v2 = vmul.f32 0.5, %v5933_v0  ;;  %v2658_v38 = vmul.f32 0.5, %v5943_v45 }
 0x741   : > { %v2673_v5 = vmul.f32 %v2665_v60, %v5933_v0  ;;  %v2675_v6 = vmul.f32 %v2667_v61, %v5935_v53  ;;  %3614 = vmatpush1.bf16.msra.mxu0 %v4563_v3  ;;  %v4599_v52 = vld [vmem:[%s6073_s9 + $0x2f0] ss:$8 sps:$4 sm:$0xff]   ;;  %v2660_v56 = vmul.f32 0.5, %v5945_v55 }
 0x742   : > { %v2674_v8 = vmul.f32 %v2666_v1, %v5943_v45  ;;  %v2676_v9 = vmul.f32 %v2668_v4, %v5945_v55  ;;  %3655 = vmatpush1.bf16.msra.mxu1 %v4566_v63  ;;  %3615 = vmatprep.subr.bf16.mxu0 %v4571_v58  ;;  %v4602_v63 = vld [vmem:[%s6073_s9 + $0x3f0] ss:$8 sps:$4 sm:$0xff]  }
 0x743   : > { %v2681_v12 = vmul.f32 %v2673_v5, %v5933_v0  ;;  %v2683_v13 = vmul.f32 %v2675_v6, %v5935_v53  ;;  %3656 = vmatprep.subr.bf16.mxu1 %v4574_v59  ;;  %v2659_v59 = vmul.f32 0.5, %v5935_v53 }
 0x744   : > { %v2682_v15 = vmul.f32 %v2674_v8, %v5943_v45  ;;  %v2684_v16 = vmul.f32 %v2676_v9, %v5945_v55 }
 0x745   : > { %v2689_v17 = vadd.f32 %v2681_v12, %v5933_v0  ;;  %v2691_v18 = vadd.f32 %v2683_v13, %v5935_v53  ;;  %3616 = vmatpush1.bf16.msra.mxu0 %v4569_v7 }
 0x746   : > { %3657 = vmatpush1.bf16.msra.mxu1 %v4572_v10  ;;  %3617 = vmatprep.subr.bf16.mxu0 %v4577_v11  ;;  %v2690_v21 = vadd.f32 %v2682_v15, %v5943_v45  ;;  %v2692_v22 = vadd.f32 %v2684_v16, %v5945_v55  ;;  %v2861_v55 = vld [vmem:[%s6074_s10] sm:$0x3] }
 0x747   : > { %3658 = vmatprep.subr.bf16.mxu1 %v4580_v14  ;;  %v2697_v26 = vmul.f32 0.7978846, %v2689_v17  ;;  %v2699_v28 = vmul.f32 0.7978846, %v2691_v18  ;;  %v2866_v5 = vrot.slane %v2861_v55, %v5048_v42  ;;  %v2870_v53 = vrot.slane %v2861_v55, %v5053_v44 }
 0x748   : > { %v2698_v41 = vmul.f32 0.7978846, %v2690_v21  ;;  %v2700_v27 = vmul.f32 0.7978846, %v2692_v22 }
 0x749   : > { %3618 = vmatpush1.bf16.msra.mxu0 %v4575_v39  ;;  %4623 = vtanh.f32 %v2697_v26 }
 0x74a   : > { %3659 = vmatpush1.bf16.msra.mxu1 %v4578_v19  ;;  %3619 = vmatprep.subr.bf16.mxu0 %v4583_v20  ;;  %4625 = vtanh.f32 %v2698_v41 }
 0x74b   : > { %3660 = vmatprep.subr.bf16.mxu1 %v4586_v25  ;;  %4627 = vtanh.f32 %v2700_v27 }
 0x74c   : > { %4629 = vtanh.f32 %v2699_v28 }
 0x74d   : > { %3620 = vmatpush1.bf16.msra.mxu0 %v4581_v47 }
 0x74e   : > { %3661 = vmatpush1.bf16.msra.mxu1 %v4584_v49  ;;  %3621 = vmatprep.subr.bf16.mxu0 %v4589_v29 }
 0x74f   : > { %3662 = vmatprep.subr.bf16.mxu1 %v4592_v30 }
 0x751   : > { %3622 = vmatpush1.bf16.msra.mxu0 %v4587_v31 }
 0x752   : > { %3663 = vmatpush1.bf16.msra.mxu1 %v4590_v32  ;;  %3623 = vmatprep.subr.bf16.mxu0 %v4595_v35 }
 0x753   : > { %v4624_v43 = vpop.eup %4623  ;;  %3664 = vmatprep.subr.bf16.mxu1 %v4598_v23 }
 0x754   : > { %v4626_v48 = vpop.eup %4625  ;;  %v2713_v50 = vadd.f32 1.0, %v4624_v43 }
 0x755   : > { %v4628_v51 = vpop.eup %4627  ;;  %3624 = vmatpush1.bf16.msra.mxu0 %v4593_v24  ;;  %v2714_v54 = vadd.f32 1.0, %v4626_v48 }
 0x756   : > { %v4630_v3 = vpop.eup %4629  ;;  %3665 = vmatpush1.bf16.msra.mxu1 %v4596_v36  ;;  %3625 = vmatprep.subr.bf16.mxu0 %v4601_v37  ;;  %v2716_v0 = vadd.f32 1.0, %v4628_v51  ;;  %v2721_v57 = vmul.f32 %v2713_v50, %v2657_v2 }
 0x757   : > { %3666 = vmatprep.subr.bf16.mxu1 %v4604_v46  ;;  %v2722_v58 = vmul.f32 %v2714_v54, %v2658_v38  ;;  %v2715_v60 = vadd.f32 1.0, %v4630_v3 }
 0x758   : > { %v2724_v61 = vmul.f32 %v2716_v0, %v2660_v56  ;;  %v2729_v1 = vpack.c.bf16 %v2721_v57, %v2721_v57 }
 0x759   : > { %3626 = vmatpush1.bf16.msra.mxu0 %v4599_v52  ;;  %v2730_v45 = vpack.c.bf16 %v2722_v58, %v2722_v58  ;;  %v2723_v40 = vmul.f32 %v2715_v60, %v2659_v59 }
 0x75a   : > { %3667 = vmatpush1.bf16.msra.mxu1 %v4602_v63  ;;  %v2732_v62 = vpack.c.bf16 %v2724_v61, %v2724_v61 }
 0x75b   : > { %3627 = vmatprep.mubr.bf16.mxu0 %v2730_v45  ;;  %v2731_v4 = vpack.c.bf16 %v2723_v40, %v2723_v40 }
 0x75c   : > { %3668 = vmatprep.mubr.bf16.mxu1 %v2732_v62  ;;  %3628 = vmatmul.mubr.bf16.vlgmr.msra.gmra.mrb[28].mxu0 %v2729_v1 }
 0x75d   : > { %3669 = vmatmul.mubr.bf16.vlgmr.msra.gmra.mrb[28].mxu1 %v2731_v4 }
 0x7ef   : > { %v3547_v6 = vpop.f32.mrb[24].mxu0 }
 0x7f0   : > { %v3548_v7 = vadd.f32 %v3547_v6, %v2866_v5  ;;  %v3588_v8 = vpop.f32.mrb[24].mxu1  ;;  %v3549_v9 = vpop.f32.mrb[25].mxu0 }
 0x7f1   : > { %v3550_v10 = vadd.f32 %v3549_v9, %v2870_v53  ;;  %v3590_v11 = vpop.f32.mrb[25].mxu1  ;;  %v3551_v12 = vpop.f32.mrb[26].mxu0 }
 0x7f2   : > { %v3589_v13 = vadd.f32 %v3588_v8, %v3548_v7  ;;  %v3592_v14 = vpop.f32.mrb[26].mxu1  ;;  %v3552_v15 = vpop.f32.mrb[27].mxu0 }
 0x7f3   : > { %v3591_v16 = vadd.f32 %v3590_v11, %v3550_v10  ;;  %v3593_v17 = vpop.f32.mrb[27].mxu1 }
 0x82f   : > { %v3629_v18 = vpop.f32.mrb[28].mxu0 }
 0x830   : > { %v3630_v39 = vadd.f32 %v3629_v18, %v3589_v13  ;;  %v3670_v19 = vpop.f32.mrb[28].mxu1  ;;  %v3631_v20 = vpop.f32.mrb[29].mxu0 }
 0x831   : > { %v3632_v21 = vadd.f32 %v3631_v20, %v3591_v16  ;;  %v3672_v22 = vpop.f32.mrb[29].mxu1  ;;  %v3633_v25 = vpop.f32.mrb[30].mxu0 }
 0x832   : > { %v3671_v26 = vadd.f32 %v3670_v19, %v3630_v39  ;;  %v3674_v41 = vpop.f32.mrb[30].mxu1  ;;  %v3634_v27 = vpop.f32.mrb[31].mxu0 }
 0x833   : > { %v3673_v28 = vadd.f32 %v3672_v22, %v3632_v21  ;;  %v3675_v47 = vpop.f32.mrb[31].mxu1 }
 0x834   : > { %v3677_v49 = vadd.f32 %v3671_v26, %v5410_v34  ;;  %v3679_v34 = vld [vmem:[%s6075_s11] sm:$0x3] }
 0x835   : > { %v3678_v29 = vadd.f32 %v3673_v28, %v5408_v33  ;;  %v3680_v33 = vld [vmem:[%s6076_s12] sm:$0x3]  ;;  %v3701_v2 = vrot.slane %v3679_v34, %v5048_v42  ;;  %v3705_v50 = vrot.slane %v3679_v34, %v5053_v44 }
 0x836   : > { %v3714_v52 = vrot.slane %v3680_v33, %v5048_v42  ;;  %v3718_v38 = vrot.slane %v3680_v33, %v5053_v44 }
 0x837   : > { %v3681_v30 = vadd.f32 %v3678_v29, %v3677_v49 }
 0x839   : > { %3682 = vadd.xlane.f32.xlu0 %v3681_v30 }
 0x8c6   : > { %v3683_v31 = vpop.xlane.xlu0 %3682 }
 0x8c7   : > { %v3684_v32 = vmul.f32 0.00390625, %v3683_v31 }
 0x8c9   : > { %v3685_v35 = vsub.f32 %v3677_v49, %v3684_v32  ;;  %v3686_v23 = vsub.f32 %v3678_v29, %v3684_v32 }
 0x8cb   : > { %v3687_v24 = vmul.f32 %v3685_v35, %v3685_v35  ;;  %v3688_v36 = vmul.f32 %v3686_v23, %v3686_v23 }
 0x8cd   : > { %v3689_v37 = vadd.f32 %v3688_v36, %v3687_v24 }
 0x8cf   : > { %3690 = vadd.xlane.f32.xlu1 %v3689_v37 }
 0x95c   : > { %v3691_v43 = vpop.xlane.xlu1 %3690 }
 0x95d   : > { %v3692_v46 = vmul.f32 0.00390625, %v3691_v43 }
 0x95f   : > { %v3693_v48 = vadd.f32 1e-12, %v3692_v46 }
 0x961   : > { %4631 = vrsqrt.f32 %v3693_v48 }
 0x96b   : > { %v4632_v51 = vpop.eup %4631 }
 0x96c   : > { %v3695_v54 = vmul.f32 %v4632_v51, %v3685_v35  ;;  %v3696_v3 = vmul.f32 %v4632_v51, %v3686_v23 }
 0x96e   : > { %v3708_v63 = vmul.f32 %v3701_v2, %v3695_v54  ;;  %v3709_v56 = vmul.f32 %v3705_v50, %v3696_v3 }
 0x970   : > { %v3721_v0 = vadd.f32 %v3714_v52, %v3708_v63  ;;  %v3722_v57 = vadd.f32 %v3718_v38, %v3709_v56 }
 0x972   : > { %3723 = vst [vmem:[%s440_s22] sm:$0xff] %v3721_v0  ;;  %3724 = vst [vmem:[%s440_s22 + $0x8] sm:$0xff] %v3722_v57 }
 0x973 PF: > { %s23_s25 = sadd.s32 1, %s4639_s25  }
 0x974   : > { %p20_p4 = scmp.ge.s32.totalorder %s23_s25, 4  }
 0x976   :  { %22 = sbr.rel (!%p20_p4) target bundleno = 1 (0x1), region = 102 }

// kernel: bert_classifier_forward.5
= control target key start
LH: loop header
LB: loop body
LE: loop exit
PB: predicated region body
PF: predicated region fallthrough
CT: control target
= control target key end

     0   :  { %s5327_s0 = inlined_call_operand.vmem [shape: f32[16,256], index: 0, kind: input, shape index: {}]   ;;  %s5328_s1 = inlined_call_operand.hbm [shape: bf16[256,768], index: 1, kind: input, shape index: {}]   ;;  %s5329_s2 = inlined_call_operand.vmem [shape: f32[1,768], index: 2, kind: input, shape index: {}]   ;;  %s5330_s3 = inlined_call_operand.vmem [shape: bf16[256,256], index: 3, kind: input, shape index: {}]   ;;  %s5331_s4 = inlined_call_operand.vmem [shape: f32[1,256], index: 4, kind: input, shape index: {}]   ;;  %s5332_s5 = inlined_call_operand.vmem [shape: f32[1,256], index: 5, kind: input, shape index: {}]   ;;  %s5333_s6 = inlined_call_operand.vmem [shape: f32[1,256], index: 6, kind: input, shape index: {}]   ;;  %s5334_s7 = inlined_call_operand.hbm [shape: bf16[256,1024], index: 7, kind: input, shape index: {}]   ;;  %s5335_s8 = inlined_call_operand.vmem [shape: f32[1,1024], index: 8, kind: input, shape index: {}]   ;;  %s5336_s9 = inlined_call_operand.hbm [shape: bf16[1024,256], index: 9, kind: input, shape index: {}]   ;;  %s5337_s10 = inlined_call_operand.vmem [shape: f32[1,256], index: 10, kind: input, shape index: {}]   ;;  %s5338_s11 = inlined_call_operand.vmem [shape: f32[1,256], index: 11, kind: input, shape index: {}]   ;;  %s5339_s12 = inlined_call_operand.vmem [shape: f32[1,256], index: 12, kind: input, shape index: {}]   ;;  %s5340_s13 = inlined_call_operand.vmem [shape: f32[16,256], index: 13, kind: output, shape index: {}]  }
   0x1   :  { %5344 = sst [smem:[#allocation10_spill]] %s5340_s13 }
   0x2   :  { %18 = vsyncpa [#allocation3], 0 }
   0x3   :  { %19 = vsyncpa [#allocation5], 0  ;;  %s4932_s25 = smov 0  }
   0x4 LB: > { %5345 = sst [smem:[#allocation9_spill]] %s4849_s25  ;;  %s4851_s26 = smov [#allocation4]   ;;  %s4849_s25 = sphi %s4932_s25, %s25_s25  }
   0x5   : > { %s374_s27 = sshll.u32 %s4851_s26, 4  ;;  %s4938_s28 = sadd.s32 4294967295, %s4849_s25   ;;  %s4943_s27 = int_to_ptr.vmem [resolvable:$true] %s374_s27 }
   0x6   : > { %p3857_p0 = scmp.ge.s32.totalorder %s4849_s25, 1  ;;  %p334_p1 = scmp.lt.s32.totalorder %s4849_s25, 3 }
   0x7   : > { %p5342_p2 = scmp.eq.s32.totalorder %s4938_s28, 0  ;;  %s4852_s30 = smov [#allocation2]  }
   0x8   : > { %p4945_p3 = pnand %p3857_p0, %p334_p1  ;;  %s346_s14 = sshll.u32 %s4852_s30, 4  ;;  %s4951_s14 = int_to_ptr.vmem [resolvable:$true] %s346_s14 }
   0x9   : > { %s4853_s16 = smov [#allocation6]   ;;  %s4751_s20 = scalar_lea.hbm %s5334_s7, 16384 }
   0xa   : > { %s5346_s29 = scalar_select %p4945_p3, 1, 0 }
   0xb   : > { %p4304_p4 = pneg %p4945_p3  ;;  %s4959_s17 = sshll.u32 %s4853_s16, 4  ;;  %s391_s17 = int_to_ptr.vmem [resolvable:$true] %s4959_s17 }
   0xc   : > { %p4752_p6 = scmp.ne.s32.totalorder %s5334_s7, %s4751_s20  ;;  %p4758_p10 = scmp.lt.u32.totalorder %s4751_s20, %s5334_s7 }
   0xd   : > { %p4955_p5 = pnand %p5342_p2, %p4304_p4 }
   0xf   : > { %p4969_p7 = pneg %p4955_p5 }
  0x11   : > { %p4754_p8 = pnand %p4969_p7, %p4752_p6 }
  0x13   : > { %p4755_p9 = pneg %p4754_p8 }
  0x15   : > { %p4760_p11 = pnand %p4758_p10, %p4755_p9 }
  0x17   : > { %4763 = shalt.err (!%p4760_p11)
}
  0x18   : > { %s4764_s30 = scalar_lea.vmem %s4943_s27, 16384  ;;  %p4772_p1 = scmp.lt.s32.totalorder %s4943_s27, %s4943_s27 }
  0x19   : > { %p4765_p12 = scmp.ne.s32.totalorder %s4943_s27, %s4764_s30  ;;  %p4773_p4 = scmp.lt.s32.totalorder %s4764_s30, %s4764_s30 }
  0x1b   : > { %p4767_p13 = pnand %p4765_p12, %p4969_p7  ;;  %p4774_p6 = por %p4773_p4, %p4772_p1 }
  0x1d   : > { %p4768_p0 = pneg %p4767_p13 }
  0x1f   : > { %p4775_p8 = pnand %p4774_p6, %p4768_p0 }
  0x21   : > { %4778 = shalt.err (!%p4775_p8)
}
  0x22   : > { %s4854_s16 = smov 512   ;;  %s4855_s18 = smov 32  }
  0x23   : > { %4310 = dma.hbm_to_vmem [thread:$0]  (!%p4955_p5), %s5334_s7, 16384, %s4943_s27, [#allocation5], %s4854_s16, %s4854_s16, %s4855_s18  }
  0x24   : > { %s4779_s24 = scalar_lea.hbm %s5328_s1, 12288 }
  0x25   : > { %p4780_p9 = scmp.ne.s32.totalorder %s5328_s1, %s4779_s24  ;;  %p4786_p12 = scmp.lt.u32.totalorder %s4779_s24, %s5328_s1 }
  0x27   : > { %p4782_p10 = pnand %p4780_p9, %p4969_p7 }
  0x29   : > { %p4783_p11 = pneg %p4782_p10 }
  0x2b   : > { %p4788_p13 = pnand %p4786_p12, %p4783_p11 }
  0x2d   : > { %4791 = shalt.err (!%p4788_p13)
}
  0x2e   : > { %s4792_s27 = scalar_lea.vmem %s4951_s14, 12288  ;;  %p4800_p6 = scmp.lt.s32.totalorder %s4951_s14, %s4951_s14 }
  0x2f   : > { %p4793_p0 = scmp.ne.s32.totalorder %s4951_s14, %s4792_s27  ;;  %p4801_p8 = scmp.lt.s32.totalorder %s4792_s27, %s4792_s27 }
  0x31   : > { %p4795_p1 = pnand %p4793_p0, %p4969_p7  ;;  %p4802_p9 = por %p4801_p8, %p4800_p6 }
  0x33   : > { %p4796_p4 = pneg %p4795_p1 }
  0x35   : > { %p4803_p10 = pnand %p4802_p9, %p4796_p4 }
  0x37   : > { %4806 = shalt.err (!%p4803_p10)
}
  0x38   : > { %s4856_s25 = smov 384   ;;  %s4857_s13 = smov 24  }
  0x39   : > { %4307 = dma.hbm_to_vmem [thread:$0]  (!%p4955_p5), %s5328_s1, 12288, %s4951_s14, [#allocation3], %s4856_s25, %s4856_s25, %s4857_s13  }
  0x3a   : > { %s4807_s21 = scalar_lea.hbm %s5336_s9, 16384 }
  0x3b   : > { %p4808_p11 = scmp.ne.s32.totalorder %s5336_s9, %s4807_s21  ;;  %p4814_p0 = scmp.lt.u32.totalorder %s4807_s21, %s5336_s9 }
  0x3d   : > { %p4810_p12 = pnand %p4808_p11, %p4969_p7 }
  0x3f   : > { %p4811_p13 = pneg %p4810_p12 }
  0x41   : > { %p4816_p1 = pnand %p4814_p0, %p4811_p13 }
  0x43   : > { %4819 = shalt.err (!%p4816_p1)
}
  0x44   : > { %s4820_s27 = scalar_lea.vmem %s391_s17, 16384  ;;  %p4828_p9 = scmp.lt.s32.totalorder %s391_s17, %s391_s17 }
  0x45   : > { %p4821_p4 = scmp.ne.s32.totalorder %s391_s17, %s4820_s27  ;;  %p4829_p10 = scmp.lt.s32.totalorder %s4820_s27, %s4820_s27 }
  0x47   : > { %p4823_p6 = pnand %p4821_p4, %p4969_p7  ;;  %p4830_p2 = por %p4829_p10, %p4828_p9 }
  0x49   : > { %p4824_p8 = pneg %p4823_p6 }
  0x4b   : > { %p4831_p3 = pnand %p4830_p2, %p4824_p8 }
  0x4d   : > { %4834 = shalt.err (!%p4831_p3)
}
  0x4e   : > { %s4858_s14 = smov 128   ;;  %s4859_s25 = smov 8  }
  0x4f   : > { %4313 = dma.hbm_to_vmem [thread:$0]  (!%p4955_p5), %s5336_s9, 16384, %s391_s17, [#allocation5], %s4858_s14, %s4858_s14, %s4859_s25  }
  0x50   : > { %p5349_p11 = scmp.ne.s32.totalorder %s5346_s29, 0 }
  0x51   : > { %p5350_p12 = scmp.eq.s32.totalorder (!%p5349_p11), %s4938_s28, 0 }
  0x52   : > { %423 = sbr.rel (%p5349_p11) target bundleno = 2508 (0x9cc), region = 72 }
  0x59   : > { %4840 = dma.done.wait (%p5350_p12), [#allocation3], 12288   ;;  %p5351_p7 = pmov %p5350_p12 }
  0x5b   : > { %4842 = vsyncadd (%p5351_p7), [#allocation3], 4294955008  ;;  %p5352_p2 = pmov %p5351_p7 }
  0x5d   : > { %4844 = dma.done.wait (%p5352_p2), [#allocation5], 32768   ;;  %p5353_p3 = pmov %p5352_p2 }
  0x5e   : > { %v4339_v0 = vld [vmem:[#allocation2 + $0xc] ss:$24 sps:$4 sm:$0xff]   ;;  %v4341_v1 = vld [vmem:[#allocation2 + $0x8] ss:$24 sps:$4 sm:$0xff]   ;;  %v4342_v2 = vld [vmem:[#allocation2 + $0x3c] ss:$24 sps:$4 sm:$0xff]  }
  0x5f   : > { %4846 = vsyncadd (%p5353_p3), [#allocation5], 4294934528  ;;  %1139 = vmatprep.subr.bf16.mxu1 %v4339_v0  ;;  %v4344_v3 = vld [vmem:[#allocation2 + $0x4] ss:$24 sps:$4 sm:$0xff]   ;;  %v4346_v4 = vld [vmem:[#allocation2 + $0x38] ss:$24 sps:$4 sm:$0xff]  }
  0x60   : > { %1140 = vmatpush1.bf16.msra.mxu1 %v4341_v1  ;;  %v4347_v5 = vld [vmem:[#allocation2] ss:$24 sps:$4 sm:$0xff]   ;;  %v4348_v6 = vld [vmem:[#allocation2 + $0x6c] ss:$24 sps:$4 sm:$0xff]   ;;  %1098 = vmatprep.subr.bf16.mxu0 %v4344_v3  ;;  %v4353_v8 = vld [vmem:[#allocation2 + $0x30] ss:$24 sps:$4 sm:$0xff]  }
  0x61   : > { %1141 = vmatprep.subr.bf16.mxu1 %v4342_v2  ;;  %v4350_v7 = vld [vmem:[#allocation2 + $0x34] ss:$24 sps:$4 sm:$0xff]   ;;  %1099 = vmatpush1.bf16.msra.mxu0 %v4347_v5  ;;  %v4352_v9 = vld [vmem:[#allocation2 + $0x68] ss:$24 sps:$4 sm:$0xff]   ;;  %v4356_v11 = vld [vmem:[#allocation2 + $0x64] ss:$24 sps:$4 sm:$0xff]  }
  0x62   : > { %1100 = vmatprep.subr.bf16.mxu0 %v4350_v7  ;;  %v4354_v10 = vld [vmem:[#allocation2 + $0x9c] ss:$24 sps:$4 sm:$0xff]   ;;  %v4359_v12 = vld [vmem:[#allocation2 + $0x60] ss:$24 sps:$4 sm:$0xff]   ;;  %v4360_v15 = vld [vmem:[#allocation2 + $0xcc] ss:$24 sps:$4 sm:$0xff]  }
  0x63   : > { %v4358_v13 = vld [vmem:[#allocation2 + $0x98] ss:$24 sps:$4 sm:$0xff]   ;;  %v4362_v14 = vld [vmem:[#allocation2 + $0x94] ss:$24 sps:$4 sm:$0xff]   ;;  %v4364_v16 = vld [vmem:[#allocation2 + $0xc8] ss:$24 sps:$4 sm:$0xff]  }
  0x64   : > { %1142 = vmatpush1.bf16.msra.mxu1 %v4346_v4  ;;  %v4365_v17 = vld [vmem:[#allocation2 + $0x90] ss:$24 sps:$4 sm:$0xff]   ;;  %v4368_v18 = vld [vmem:[#allocation2 + $0xc4] ss:$24 sps:$4 sm:$0xff]   ;;  %v4371_v20 = vld [vmem:[#allocation2 + $0xc0] ss:$24 sps:$4 sm:$0xff]  }
  0x65   : > { %1143 = vmatprep.subr.bf16.mxu1 %v4348_v6  ;;  %1101 = vmatpush1.bf16.msra.mxu0 %v4353_v8  ;;  %v4366_v19 = vld [vmem:[#allocation2 + $0xfc] ss:$24 sps:$4 sm:$0xff]   ;;  %v4370_v21 = vld [vmem:[#allocation2 + $0xf8] ss:$24 sps:$4 sm:$0xff]   ;;  %v4372_v23 = vld [vmem:[#allocation2 + $0x12c] ss:$24 sps:$4 sm:$0xff]  }
  0x66   : > { %1102 = vmatprep.subr.bf16.mxu0 %v4356_v11  ;;  %v4374_v22 = vld [vmem:[#allocation2 + $0xf4] ss:$24 sps:$4 sm:$0xff]   ;;  %v4376_v24 = vld [vmem:[#allocation2 + $0x128] ss:$24 sps:$4 sm:$0xff]   ;;  %v4380_v26 = vld [vmem:[#allocation2 + $0x124] ss:$24 sps:$4 sm:$0xff]  }
  0x67   : > { %v4377_v25 = vld [vmem:[#allocation2 + $0xf0] ss:$24 sps:$4 sm:$0xff]   ;;  %v4378_v27 = vld [vmem:[#allocation2 + $0x15c] ss:$24 sps:$4 sm:$0xff]   ;;  %v4383_v28 = vld [vmem:[#allocation2 + $0x120] ss:$24 sps:$4 sm:$0xff]  }
  0x68   : > { %1144 = vmatpush1.bf16.msra.mxu1 %v4352_v9  ;;  %v4382_v29 = vld [vmem:[#allocation2 + $0x158] ss:$24 sps:$4 sm:$0xff]   ;;  %v4386_v30 = vld [vmem:[#allocation2 + $0x154] ss:$24 sps:$4 sm:$0xff]   ;;  %p475_p5 = scmp.lt.s32.totalorder %s4938_s28, 1  ;;  %vm4861_vm0 = vmmov 0  }
  0x69   : > { %1145 = vmatprep.subr.bf16.mxu1 %v4354_v10  ;;  %1103 = vmatpush1.bf16.msra.mxu0 %v4359_v12  ;;  %v4384_v31 = vld [vmem:[#allocation2 + $0x18c] ss:$24 sps:$4 sm:$0xff]   ;;  %v4388_v32 = vld [vmem:[#allocation2 + $0x188] ss:$24 sps:$4 sm:$0xff]   ;;  %v4390_v35 = vld [vmem:[#allocation2 + $0x1bc] ss:$24 sps:$4 sm:$0xff]  }
  0x6a   : > { %1104 = vmatprep.subr.bf16.mxu0 %v4362_v14  ;;  %v4389_v33 = vld [vmem:[#allocation2 + $0x150] ss:$24 sps:$4 sm:$0xff]   ;;  %v4392_v34 = vld [vmem:[#allocation2 + $0x184] ss:$24 sps:$4 sm:$0xff]   ;;  %s5357_s28 = smov (!%p475_p5, %s4938_s28), 1  ;;  %vm1281_vm1 = vcmask 1043456  }
  0x6b   : > { %v4395_v36 = vld [vmem:[#allocation2 + $0x180] ss:$24 sps:$4 sm:$0xff]   ;;  %v4398_v38 = vld [vmem:[#allocation2 + $0x1b4] ss:$24 sps:$4 sm:$0xff]   ;;  %s4258_s29 = sshll.u32 %s5357_s28, 4  ;;  %vm1265_vm2 = vcmask 64512  }
  0x6c   : > { %1146 = vmatpush1.bf16.msra.mxu1 %v4358_v13  ;;  %v4394_v37 = vld [vmem:[#allocation2 + $0x1b8] ss:$24 sps:$4 sm:$0xff]   ;;  %v4396_v39 = vld [vmem:[#allocation2 + $0x1ec] ss:$24 sps:$4 sm:$0xff]   ;;  %v4400_v40 = vld [vmem:[#allocation2 + $0x1e8] ss:$24 sps:$4 sm:$0xff]   ;;  %s5052_s23 = scalar_lea.vmem %s5327_s0, %s4258_s29 }
  0x6d   : > { %1147 = vmatprep.subr.bf16.mxu1 %v4360_v15  ;;  %1105 = vmatpush1.bf16.msra.mxu0 %v4365_v17  ;;  %v4401_v41 = vld [vmem:[#allocation2 + $0x1b0] ss:$24 sps:$4 sm:$0xff]   ;;  %v4404_v42 = vld [vmem:[#allocation2 + $0x1e4] ss:$24 sps:$4 sm:$0xff]   ;;  %v4407_v46 = vld [vmem:[#allocation2 + $0x1e0] ss:$24 sps:$4 sm:$0xff]  }
  0x6e   : > { %1106 = vmatprep.subr.bf16.mxu0 %v4368_v18  ;;  %v4402_v43 = vld [vmem:[#allocation2 + $0x21c] ss:$24 sps:$4 sm:$0xff]   ;;  %v4406_v44 = vld [vmem:[#allocation2 + $0x218] ss:$24 sps:$4 sm:$0xff]   ;;  %v5055_v45 = vld [vmem:[%s5052_s23 + $0x8] sm:$0xff]  ;;  %s5354_s20 = sld [smem:[#allocation10_spill]] }
  0x6f   : > { %v489_v47 = vpack.c.bf16 %v5055_v45, %v5055_v45  ;;  %v4410_v48 = vld [vmem:[#allocation2 + $0x214] ss:$24 sps:$4 sm:$0xff]   ;;  %v4412_v50 = vld [vmem:[#allocation2 + $0x248] ss:$24 sps:$4 sm:$0xff]   ;;  %v4416_v52 = vld [vmem:[#allocation2 + $0x244] ss:$24 sps:$4 sm:$0xff]  }
  0x70   : > { %1148 = vmatpush1.bf16.msra.mxu1 %v4364_v16  ;;  %v4408_v49 = vld [vmem:[#allocation2 + $0x24c] ss:$24 sps:$4 sm:$0xff]   ;;  %v4413_v51 = vld [vmem:[#allocation2 + $0x210] ss:$24 sps:$4 sm:$0xff]   ;;  %v4414_v53 = vld [vmem:[#allocation2 + $0x27c] ss:$24 sps:$4 sm:$0xff]  }
  0x71   : > { %1149 = vmatprep.subr.bf16.mxu1 %v4366_v19  ;;  %1107 = vmatpush1.bf16.msra.mxu0 %v4371_v20  ;;  %v4418_v54 = vld [vmem:[#allocation2 + $0x278] ss:$24 sps:$4 sm:$0xff]   ;;  %v4422_v56 = vld [vmem:[#allocation2 + $0x274] ss:$24 sps:$4 sm:$0xff]   ;;  %v4424_v58 = vld [vmem:[#allocation2 + $0x2a8] ss:$24 sps:$4 sm:$0xff]  }
  0x72   : > { %1108 = vmatprep.subr.bf16.mxu0 %v4374_v22  ;;  %1171 = vmatprep.mubr.bf16.mxu1 %v489_v47  ;;  %v4419_v55 = vld [vmem:[#allocation2 + $0x240] ss:$24 sps:$4 sm:$0xff]   ;;  %v4420_v57 = vld [vmem:[#allocation2 + $0x2ac] ss:$24 sps:$4 sm:$0xff]   ;;  %v4425_v59 = vld [vmem:[#allocation2 + $0x270] ss:$24 sps:$4 sm:$0xff]  }
  0x73   : > { %1130 = vmatprep.mubr.bf16.mxu0 %v489_v47  ;;  %v4428_v60 = vld [vmem:[#allocation2 + $0x2a4] ss:$24 sps:$4 sm:$0xff]   ;;  %v4430_v62 = vld [vmem:[#allocation2 + $0x2d8] ss:$24 sps:$4 sm:$0xff]   ;;  %v4432_v1 = vld [vmem:[#allocation2 + $0x2d4] ss:$24 sps:$4 sm:$0xff]  }
  0x74   : > { %1150 = vmatpush1.bf16.msra.mxu1 %v4370_v21  ;;  %v4426_v61 = vld [vmem:[#allocation2 + $0x2dc] ss:$24 sps:$4 sm:$0xff]   ;;  %v4431_v63 = vld [vmem:[#allocation2 + $0x2a0] ss:$24 sps:$4 sm:$0xff]   ;;  %v4434_v3 = vld [vmem:[#allocation2 + $0x2d0] ss:$24 sps:$4 sm:$0xff]   ;;  %s484_s21 = scalar_lea.vmem %s5354_s20, %s4258_s29 }
  0x75   : > { %1151 = vmatprep.subr.bf16.mxu1 %v4372_v23  ;;  %1109 = vmatpush1.bf16.msra.mxu0 %v4377_v25  ;;  %v5060_v0 = vld [vmem:[%s5052_s23] sm:$0xff]  ;;  %v4437_v4 = vld [vmem:[#allocation2 + $0x14] ss:$24 sps:$4 sm:$0xff]   ;;  %v4435_v5 = vld [vmem:[#allocation2 + $0x10] ss:$24 sps:$4 sm:$0xff]  }
  0x76   : > { %1110 = vmatprep.subr.bf16.mxu0 %v4380_v26  ;;  %v5064_v2 = vpack.c.bf16 %v5060_v0, %v5060_v0  ;;  %v4440_v6 = vld [vmem:[#allocation2 + $0x44] ss:$24 sps:$4 sm:$0xff]   ;;  %v4438_v7 = vld [vmem:[#allocation2 + $0x40] ss:$24 sps:$4 sm:$0xff]   ;;  %v4443_v8 = vld [vmem:[#allocation2 + $0x74] ss:$24 sps:$4 sm:$0xff]  }
  0x77   : > { %v4441_v9 = vld [vmem:[#allocation2 + $0x70] ss:$24 sps:$4 sm:$0xff]   ;;  %v4446_v10 = vld [vmem:[#allocation2 + $0xa4] ss:$24 sps:$4 sm:$0xff]   ;;  %v4444_v11 = vld [vmem:[#allocation2 + $0xa0] ss:$24 sps:$4 sm:$0xff]  }
  0x78   : > { %1152 = vmatpush1.bf16.msra.mxu1 %v4376_v24  ;;  %v4449_v12 = vld [vmem:[#allocation2 + $0xd4] ss:$24 sps:$4 sm:$0xff]   ;;  %v4447_v13 = vld [vmem:[#allocation2 + $0xd0] ss:$24 sps:$4 sm:$0xff]   ;;  %v4452_v14 = vld [vmem:[#allocation2 + $0x104] ss:$24 sps:$4 sm:$0xff]  }
  0x79   : > { %1153 = vmatprep.subr.bf16.mxu1 %v4378_v27  ;;  %1111 = vmatpush1.bf16.msra.mxu0 %v4383_v28  ;;  %v4450_v15 = vld [vmem:[#allocation2 + $0x100] ss:$24 sps:$4 sm:$0xff]   ;;  %v4455_v16 = vld [vmem:[#allocation2 + $0x134] ss:$24 sps:$4 sm:$0xff]   ;;  %v4453_v17 = vld [vmem:[#allocation2 + $0x130] ss:$24 sps:$4 sm:$0xff]  }
  0x7a   : > { %1112 = vmatprep.subr.bf16.mxu0 %v4386_v30  ;;  %v4458_v18 = vld [vmem:[#allocation2 + $0x164] ss:$24 sps:$4 sm:$0xff]   ;;  %v4456_v19 = vld [vmem:[#allocation2 + $0x160] ss:$24 sps:$4 sm:$0xff]   ;;  %v4461_v20 = vld [vmem:[#allocation2 + $0x194] ss:$24 sps:$4 sm:$0xff]  }
  0x7b   : > { %v4459_v21 = vld [vmem:[#allocation2 + $0x190] ss:$24 sps:$4 sm:$0xff]   ;;  %v4464_v22 = vld [vmem:[#allocation2 + $0x1c4] ss:$24 sps:$4 sm:$0xff]   ;;  %v4462_v23 = vld [vmem:[#allocation2 + $0x1c0] ss:$24 sps:$4 sm:$0xff]  }
  0x7c   : > { %1154 = vmatpush1.bf16.msra.mxu1 %v4382_v29  ;;  %v4467_v24 = vld [vmem:[#allocation2 + $0x1f4] ss:$24 sps:$4 sm:$0xff]   ;;  %v4465_v25 = vld [vmem:[#allocation2 + $0x1f0] ss:$24 sps:$4 sm:$0xff]   ;;  %v4470_v26 = vld [vmem:[#allocation2 + $0x224] ss:$24 sps:$4 sm:$0xff]  }
  0x7d   : > { %1155 = vmatprep.subr.bf16.mxu1 %v4384_v31  ;;  %1113 = vmatpush1.bf16.msra.mxu0 %v4389_v33  ;;  %v4468_v27 = vld [vmem:[#allocation2 + $0x220] ss:$24 sps:$4 sm:$0xff]   ;;  %v4473_v28 = vld [vmem:[#allocation2 + $0x254] ss:$24 sps:$4 sm:$0xff]   ;;  %v4471_v29 = vld [vmem:[#allocation2 + $0x250] ss:$24 sps:$4 sm:$0xff]  }
  0x7e   : > { %1114 = vmatprep.subr.bf16.mxu0 %v4392_v34  ;;  %v4476_v30 = vld [vmem:[#allocation2 + $0x284] ss:$24 sps:$4 sm:$0xff]   ;;  %v4474_v31 = vld [vmem:[#allocation2 + $0x280] ss:$24 sps:$4 sm:$0xff]   ;;  %v4477_v33 = vld [vmem:[#allocation2 + $0x2b0] ss:$24 sps:$4 sm:$0xff]  }
  0x7f   : > { %v4482_v34 = vld [vmem:[#allocation2 + $0x2e4] ss:$24 sps:$4 sm:$0xff]  }
  0x80   : > { %1156 = vmatpush1.bf16.msra.mxu1 %v4388_v32  ;;  %v4479_v32 = vld [vmem:[#allocation2 + $0x2b4] ss:$24 sps:$4 sm:$0xff]  }
  0x81   : > { %1157 = vmatprep.subr.bf16.mxu1 %v4390_v35  ;;  %1115 = vmatpush1.bf16.msra.mxu0 %v4395_v36  ;;  %v4480_v35 = vld [vmem:[#allocation2 + $0x2e0] ss:$24 sps:$4 sm:$0xff]   ;;  %v4860_v36 = vmov 0.0  }
  0x82   : > { %1116 = vmatprep.subr.bf16.mxu0 %v4398_v38 }
  0x84   : > { %1158 = vmatpush1.bf16.msra.mxu1 %v4394_v37  ;;  %v588_v37 = vlaneseq }
  0x85   : > { %1159 = vmatprep.subr.bf16.mxu1 %v4396_v39  ;;  %1117 = vmatpush1.bf16.msra.mxu0 %v4401_v41 }
  0x86   : > { %1118 = vmatprep.subr.bf16.mxu0 %v4404_v42  ;;  %v5071_v38 = vshrl.u32 %v588_v37, 7 }
  0x88   : > { %1160 = vmatpush1.bf16.msra.mxu1 %v4400_v40  ;;  %v598_v39 = vsub.s32 2, %v5071_v38  ;;  %v586_v40 = vld [vmem:[%s5329_s2] sm:$0x3f]  ;;  %v602_v41 = vsub.s32 3, %v5071_v38  ;;  %v5079_v42 = vsub.s32 0, %v5071_v38 }
  0x89   : > { %1161 = vmatprep.subr.bf16.mxu1 %v4402_v43  ;;  %1119 = vmatpush1.bf16.msra.mxu0 %v4407_v46 }
  0x8a   : > { %1120 = vmatprep.subr.bf16.mxu0 %v4410_v48  ;;  %v599_v43 = vrot.slane %v586_v40, %v598_v39  ;;  %v603_v46 = vrot.slane %v586_v40, %v602_v41  ;;  %v591_v48 = vrot.slane %v586_v40, %v5079_v42 }
  0x8c   : > { %1162 = vmatpush1.bf16.msra.mxu1 %v4406_v44  ;;  %v5084_v44 = vsub.s32 1, %v5071_v38 }
  0x8d   : > { %1163 = vmatprep.subr.bf16.mxu1 %v4408_v49  ;;  %1121 = vmatpush1.bf16.msra.mxu0 %v4413_v51 }
  0x8e   : > { %1122 = vmatprep.subr.bf16.mxu0 %v4416_v52  ;;  %v595_v51 = vrot.slane %v586_v40, %v5084_v44 }
  0x90   : > { %1164 = vmatpush1.bf16.msra.mxu1 %v4412_v50 }
  0x91   : > { %1165 = vmatprep.subr.bf16.mxu1 %v4414_v53  ;;  %1123 = vmatpush1.bf16.msra.mxu0 %v4419_v55 }
  0x92   : > { %1124 = vmatprep.subr.bf16.mxu0 %v4422_v56 }
  0x94   : > { %1166 = vmatpush1.bf16.msra.mxu1 %v4418_v54 }
  0x95   : > { %1167 = vmatprep.subr.bf16.mxu1 %v4420_v57  ;;  %1125 = vmatpush1.bf16.msra.mxu0 %v4425_v59 }
  0x96   : > { %1126 = vmatprep.subr.bf16.mxu0 %v4428_v60 }
  0x98   : > { %1168 = vmatpush1.bf16.msra.mxu1 %v4424_v58 }
  0x99   : > { %1169 = vmatprep.subr.bf16.mxu1 %v4426_v61  ;;  %1127 = vmatpush1.bf16.msra.mxu0 %v4431_v63 }
  0x9a   : > { %1128 = vmatprep.subr.bf16.mxu0 %v4432_v1 }
  0x9c   : > { %1170 = vmatpush1.bf16.msra.mxu1 %v4430_v62 }
  0x9d   : > { %1129 = vmatpush1.bf16.msra.mxu0 %v4434_v3  ;;  %4280 = vmatprep.subr.bf16.mxu1 %v4860_v36  ;;  %v610_v3 = vsub.s32 5, %v5071_v38 }
  0x9e   : > { %1180 = vmatprep.subr.bf16.mxu0 %v4437_v4 }
  0x9f   : > { %1172 = vmatmul.mubr.bf16.vlgmr.msra.gmra.mrb[0].mxu1 %v5064_v2 }
  0xa0   : > { %1131 = vmatmul.mubr.bf16.vlgmr.msra.gmra.mrb[0].mxu0 %v5064_v2  ;;  %4282 = vmatprep.mubr.msk.bf16.mxu1 %vm4861_vm0, %v4860_v36 }
  0xa1   : > { %1181 = vmatpush1.bf16.msra.mxu0 %v4435_v5  ;;  %1212 = vmatprep.mubr.bf16.mxu0 %v489_v47  ;;  %v611_v5 = vrot.slane %v586_v40, %v610_v3 }
  0xa2   : > { %1182 = vmatprep.subr.bf16.mxu0 %v4440_v6 }
  0xa5   : > { %1183 = vmatpush1.bf16.msra.mxu0 %v4438_v7 }
  0xa6   : > { %1184 = vmatprep.subr.bf16.mxu0 %v4443_v8 }
  0xa9   : > { %1185 = vmatpush1.bf16.msra.mxu0 %v4441_v9 }
  0xaa   : > { %1186 = vmatprep.subr.bf16.mxu0 %v4446_v10 }
  0xad   : > { %1187 = vmatpush1.bf16.msra.mxu0 %v4444_v11 }
  0xae   : > { %1188 = vmatprep.subr.bf16.mxu0 %v4449_v12 }
  0xb1   : > { %1189 = vmatpush1.bf16.msra.mxu0 %v4447_v13 }
  0xb2   : > { %1190 = vmatprep.subr.bf16.mxu0 %v4452_v14 }
  0xb5   : > { %1191 = vmatpush1.bf16.msra.mxu0 %v4450_v15 }
  0xb6   : > { %1192 = vmatprep.subr.bf16.mxu0 %v4455_v16 }
  0xb9   : > { %1193 = vmatpush1.bf16.msra.mxu0 %v4453_v17 }
  0xba   : > { %1194 = vmatprep.subr.bf16.mxu0 %v4458_v18 }
  0xbd   : > { %1195 = vmatpush1.bf16.msra.mxu0 %v4456_v19 }
  0xbe   : > { %1196 = vmatprep.subr.bf16.mxu0 %v4461_v20 }
  0xc1   : > { %1197 = vmatpush1.bf16.msra.mxu0 %v4459_v21 }
  0xc2   : > { %1198 = vmatprep.subr.bf16.mxu0 %v4464_v22 }
  0xc5   : > { %1199 = vmatpush1.bf16.msra.mxu0 %v4462_v23 }
  0xc6   : > { %1200 = vmatprep.subr.bf16.mxu0 %v4467_v24 }
  0xc9   : > { %1201 = vmatpush1.bf16.msra.mxu0 %v4465_v25 }
  0xca   : > { %1202 = vmatprep.subr.bf16.mxu0 %v4470_v26 }
  0xcd   : > { %1203 = vmatpush1.bf16.msra.mxu0 %v4468_v27 }
  0xce   : > { %1204 = vmatprep.subr.bf16.mxu0 %v4473_v28 }
  0xd1   : > { %1205 = vmatpush1.bf16.msra.mxu0 %v4471_v29 }
  0xd2   : > { %1206 = vmatprep.subr.bf16.mxu0 %v4476_v30 }
  0xd5   : > { %1207 = vmatpush1.bf16.msra.mxu0 %v4474_v31 }
  0xd6   : > { %1208 = vmatprep.subr.bf16.mxu0 %v4479_v32 }
  0xd9   : > { %1209 = vmatpush1.bf16.msra.mxu0 %v4477_v33 }
  0xda   : > { %1210 = vmatprep.subr.bf16.mxu0 %v4482_v34 }
  0xdd   : > { %1211 = vmatpush1.bf16.msra.mxu0 %v4480_v35 }
  0xde   : > { %4268 = vmatprep.subr.bf16.mxu0 %v4860_v36 }
  0xe0   : > { %1213 = vmatmul.mubr.bf16.vlgmr.msra.gmra.mrb[4].mxu0 %v5064_v2  ;;  %v606_v2 = vsub.s32 4, %v5071_v38 }
  0xe1   : > { %4270 = vmatprep.mubr.msk.bf16.mxu0 %vm4861_vm0, %v4860_v36 }
  0xe2   : > { %v607_v4 = vrot.slane %v586_v40, %v606_v2  ;;  %v4485_v40 = vld [vmem:[%s5330_s3 + $0x4] ss:$8 sps:$4 sm:$0xff]  }
 0x172   : > { %v1173_v47 = vpop.f32.mrb[0].mxu1 }
 0x173   : > { %v1174_v49 = vadd.f32 %v1173_v47, %v599_v43  ;;  %v1175_v50 = vpop.f32.mrb[1].mxu1  ;;  %v1132_v56 = vpop.f32.mrb[0].mxu0 }
 0x174   : > { %v1176_v52 = vadd.f32 %v1175_v50, %v603_v46  ;;  %v1177_v53 = vpop.f32.mrb[2].mxu1  ;;  %v1133_v58 = vadd.f32 %v1132_v56, %v591_v48  ;;  %v1134_v59 = vpop.f32.mrb[1].mxu0  ;;  %v4491_v56 = vld [vmem:[%s5330_s3 + $0x24] ss:$8 sps:$4 sm:$0xff]  }
 0x175   : > { %v1222_v54 = vpack.c.bf16 %v1174_v49, %v1174_v49  ;;  %v1178_v55 = vpop.f32.mrb[3].mxu1  ;;  %v1135_v60 = vadd.f32 %v1134_v59, %v595_v51  ;;  %v1136_v61 = vpop.f32.mrb[2].mxu0  ;;  %v4483_v49 = vld [vmem:[%s5330_s3] ss:$8 sps:$4 sm:$0xff]   ;;  %v4488_v51 = vld [vmem:[%s5330_s3 + $0x14] ss:$8 sps:$4 sm:$0xff]  }
 0x176   : > { %v1326_v57 = vpack.c.bf16 %v1176_v52, %v1176_v52  ;;  %v1137_v62 = vpop.f32.mrb[3].mxu0  ;;  %v1221_v63 = vpack.c.bf16 %v1133_v58, %v1133_v58  ;;  %v4494_v58 = vld [vmem:[%s5330_s3 + $0x34] ss:$8 sps:$4 sm:$0xff]   ;;  %v4492_v59 = vld [vmem:[%s5330_s3 + $0x30] ss:$8 sps:$4 sm:$0xff]  }
 0x177   : > { %4269 = vmatpush3.bf16.xpose.msra.mxu0 %v1222_v54  ;;  %v1325_v1 = vpack.c.bf16 %v1135_v60, %v1135_v60  ;;  %v4486_v54 = vld [vmem:[%s5330_s3 + $0x10] ss:$8 sps:$4 sm:$0xff]   ;;  %v4497_v60 = vld [vmem:[%s5330_s3 + $0x44] ss:$8 sps:$4 sm:$0xff]   ;;  %v4495_v61 = vld [vmem:[%s5330_s3 + $0x40] ss:$8 sps:$4 sm:$0xff]  }
 0x178   : > { %4281 = vmatpush3.bf16.xpose.msra.mxu1 %v1326_v57  ;;  %4274 = vmatprep.subr.bf16.mxu0 %v4860_v36  ;;  %v4489_v57 = vld [vmem:[%s5330_s3 + $0x20] ss:$8 sps:$4 sm:$0xff]   ;;  %v4500_v62 = vld [vmem:[%s5330_s3 + $0x54] ss:$8 sps:$4 sm:$0xff]  }
 0x179   : > { %4286 = vmatprep.subr.bf16.mxu1 %v4860_v36 }
 0x17e   : > { %4271 = vmatmul.mubr.bf16.vlgmr.msra.gmra.mrb[8].mxu0 %v1221_v63  ;;  %v4498_v63 = vld [vmem:[%s5330_s3 + $0x50] ss:$8 sps:$4 sm:$0xff]  }
 0x17f   : > { %4283 = vmatmul.mubr.bf16.vlgmr.msra.gmra.mrb[4].mxu1 %v1325_v1  ;;  %4276 = vmatprep.mubr.msk.bf16.mxu0 %vm4861_vm0, %v4860_v36  ;;  %v4503_v1 = vld [vmem:[%s5330_s3 + $0x64] ss:$8 sps:$4 sm:$0xff]  }
 0x180   : > { %4288 = vmatprep.mubr.msk.bf16.mxu1 %vm4861_vm0, %v4860_v36 }
 0x1b3   : > { %v1214_v6 = vpop.f32.mrb[4].mxu0 }
 0x1b4   : > { %v1215_v7 = vadd.f32 %v1214_v6, %v607_v4  ;;  %v1216_v8 = vpop.f32.mrb[5].mxu0  ;;  %v4501_v4 = vld [vmem:[%s5330_s3 + $0x60] ss:$8 sps:$4 sm:$0xff]   ;;  %v4504_v6 = vld [vmem:[%s5330_s3 + $0x70] ss:$8 sps:$4 sm:$0xff]  }
 0x1b5   : > { %v1217_v9 = vadd.f32 %v1216_v8, %v611_v5  ;;  %v1218_v10 = vpop.f32.mrb[6].mxu0  ;;  %v4506_v5 = vld [vmem:[%s5330_s3 + $0x74] ss:$8 sps:$4 sm:$0xff]   ;;  %v4507_v8 = vld [vmem:[%s5330_s3 + $0x80] ss:$8 sps:$4 sm:$0xff]  }
 0x1b6   : > { %v1223_v11 = vpack.c.bf16 %v1215_v7, %v1215_v7  ;;  %v1219_v12 = vpop.f32.mrb[7].mxu0  ;;  %v4509_v7 = vld [vmem:[%s5330_s3 + $0x84] ss:$8 sps:$4 sm:$0xff]   ;;  %v4510_v10 = vld [vmem:[%s5330_s3 + $0x90] ss:$8 sps:$4 sm:$0xff]  }
 0x1b7   : > { %v1327_v13 = vpack.c.bf16 %v1217_v9, %v1217_v9  ;;  %v4512_v9 = vld [vmem:[%s5330_s3 + $0x94] ss:$8 sps:$4 sm:$0xff]   ;;  %v4513_v12 = vld [vmem:[%s5330_s3 + $0xa0] ss:$8 sps:$4 sm:$0xff]  }
 0x1b8   : > { %v1283_v14 = vsel %vm1281_vm1, %v1223_v11, 0  ;;  %v4515_v11 = vld [vmem:[%s5330_s3 + $0xa4] ss:$8 sps:$4 sm:$0xff]  }
 0x1b9   : > { %v1385_v15 = vsel %vm1281_vm1, %v1327_v13, 0  ;;  %4275 = vmatpush3.bf16.msra.mxu0 %v1283_v14  ;;  %v4518_v13 = vld [vmem:[%s5330_s3 + $0xb4] ss:$8 sps:$4 sm:$0xff]   ;;  %v4516_v14 = vld [vmem:[%s5330_s3 + $0xb0] ss:$8 sps:$4 sm:$0xff]  }
 0x1ba   : > { %4287 = vmatpush3.bf16.msra.mxu1 %v1385_v15  ;;  %v4521_v15 = vld [vmem:[%s5330_s3 + $0xc4] ss:$8 sps:$4 sm:$0xff]  }
 0x1bb   : > { %1633 = vmatprep.subr.bf16.mxu1 %v4485_v40 }
 0x251   : > { %v1258_v16 = vpop.f32.mrb[8].mxu0 }
 0x252   : > { %v4272_v17 = vpop.f32.mrb[9].mxu0  ;;  %v1362_v18 = vpop.f32.mrb[4].mxu1  ;;  %v1264_v24 = vmul.f32 0.088388346, %v1258_v16  ;;  %v4519_v16 = vld [vmem:[%s5330_s3 + $0xc0] ss:$8 sps:$4 sm:$0xff]  }
 0x253   : > { %v1368_v19 = vmul.f32 0.088388346, %v1362_v18  ;;  %v1261_v20 = vpop.f32.mrb[10].mxu0  ;;  %v4284_v21 = vpop.f32.mrb[5].mxu1  ;;  %v4524_v17 = vld [vmem:[%s5330_s3 + $0xd4] ss:$8 sps:$4 sm:$0xff]  }
 0x254   : > { %v4273_v22 = vpop.f32.mrb[11].mxu0  ;;  %v1365_v23 = vpop.f32.mrb[6].mxu1  ;;  %v1266_v27 = vsel %vm1265_vm2, %v1264_v24, -inf  ;;  %v4522_v18 = vld [vmem:[%s5330_s3 + $0xd0] ss:$8 sps:$4 sm:$0xff]  }
 0x255   : > { %v4285_v25 = vpop.f32.mrb[7].mxu1  ;;  %v1369_v26 = vsel %vm1265_vm2, %v1368_v19, -inf  ;;  %v4525_v20 = vld [vmem:[%s5330_s3 + $0xe0] ss:$8 sps:$4 sm:$0xff]   ;;  %v4530_v21 = vld [vmem:[%s5330_s3 + $0xf4] ss:$8 sps:$4 sm:$0xff]  }
 0x256   : > { %1370 = vmax.xlane.f32.xlu0 %v1369_v26  ;;  %v4528_v22 = vld [vmem:[%s5330_s3 + $0xf0] ss:$8 sps:$4 sm:$0xff]  }
 0x25a   : > { %1267 = vmax.xlane.f32.xlu0 %v1266_v27 }
 0x2e3   : > { %v1371_v28 = vpop.xlane.xlu0 %1370 }
 0x2e4   : > { %v1372_v29 = vsub.f32 %v1368_v19, %v1371_v28  ;;  %v4527_v19 = vld [vmem:[%s5330_s3 + $0xe4] ss:$8 sps:$4 sm:$0xff]  }
 0x2e6   : > { %v1373_v30 = vmul.f32 1.442695, %v1372_v29 }
 0x2e7   : > { %v1268_v31 = vpop.xlane.xlu0 %1267 }
 0x2e8   : > { %4723 = vpow2.f32 %v1373_v30  ;;  %v1269_v32 = vsub.f32 %v1264_v24, %v1268_v31 }
 0x2ea   : > { %v1270_v33 = vmul.f32 1.442695, %v1269_v32 }
 0x2ec   : > { %4725 = vpow2.f32 %v1270_v33  ;;  %v1461_v33 = vld [vmem:[%s5331_s4] sm:$0x3] }
 0x2f2   : > { %v4724_v34 = vpop.eup %4723 }
 0x2f3   : > { %v1375_v35 = vsel %vm1265_vm2, %v4724_v34, 0.0 }
 0x2f4   : > { %1376 = vadd.xlane.f32.xlu1 %v1375_v35  ;;  %v1470_v35 = vrot.slane %v1461_v33, %v5084_v44 }
 0x2f6   : > { %v4726_v36 = vpop.eup %4725 }
 0x2f7   : > { %v1272_v37 = vsel %vm1265_vm2, %v4726_v36, 0.0 }
 0x2f8   : > { %1273 = vadd.xlane.f32.xlu1 %v1272_v37 }
 0x381   : > { %v1377_v43 = vpop.xlane.xlu1 %1376 }
 0x382   : > { %4727 = vrcp.f32 %v1377_v43 }
 0x385   : > { %v1274_v46 = vpop.xlane.xlu1 %1273 }
 0x386   : > { %4729 = vrcp.f32 %v1274_v46 }
 0x38c   : > { %v4728_v47 = vpop.eup %4727 }
 0x38d   : > { %v1379_v48 = vmul.f32 %v4728_v47, %v4724_v34  ;;  %v1466_v34 = vrot.slane %v1461_v33, %v5079_v42 }
 0x38f   : > { %v1380_v50 = vpack.c.bf16 %v1379_v48, %v1379_v48 }
 0x390   : > { %v4730_v52 = vpop.eup %4729 }
 0x391   : > { %v1276_v53 = vmul.f32 %v4730_v52, %v4726_v36  ;;  %4289 = vmatmul.mubr.msk.bf16.vlgmr.msra.gmra.mrb[8].mxu1 %vm1265_vm2, %v1380_v50  ;;  %v1727_v52 = vld [vmem:[#allocation4 + $0x20] sm:$0xff] }
 0x392   : > { %1634 = vmatpush1.bf16.msra.mxu1 %v4483_v49 }
 0x393   : > { %v1277_v55 = vpack.c.bf16 %v1276_v53, %v1276_v53  ;;  %1635 = vmatprep.subr.bf16.mxu1 %v4488_v51  ;;  %v1723_v51 = vld [vmem:[#allocation4] sm:$0xff]  ;;  %v1724_v53 = vld [vmem:[#allocation4 + $0x8] sm:$0xff] }
 0x395   : > { %4277 = vmatmul.mubr.msk.bf16.vlgmr.msra.gmra.mrb[12].mxu0 %vm1265_vm2, %v1277_v55  ;;  %v4001_v55 = vcombine.high %v1723_v51, %v1727_v52 }
 0x396   : > { %1636 = vmatpush1.bf16.msra.mxu1 %v4486_v54  ;;  %v4000_v54 = vcombine.low %v1723_v51, %v1727_v52  ;;  %v1783_v51 = vld [vmem:[#allocation4 + $0x1e0] sm:$0xff]  ;;  %v1780_v52 = vld [vmem:[#allocation4 + $0x1c8] sm:$0xff] }
 0x397   : > { %1637 = vmatprep.subr.bf16.mxu1 %v4491_v56  ;;  %v1728_v56 = vld [vmem:[#allocation4 + $0x28] sm:$0xff]  ;;  %2533 = vmatprep.subr.bf16.mxu0 %v4001_v55 }
 0x398   : > { %2534 = vmatpush1.bf16.msra.mxu0 %v4000_v54 }
 0x39a   : > { %1638 = vmatpush1.bf16.msra.mxu1 %v4489_v57  ;;  %v1731_v57 = vld [vmem:[#allocation4 + $0x40] sm:$0xff] }
 0x39b   : > { %1639 = vmatprep.subr.bf16.mxu1 %v4494_v58  ;;  %v1735_v58 = vld [vmem:[#allocation4 + $0x60] sm:$0xff] }
 0x39e   : > { %1640 = vmatpush1.bf16.msra.mxu1 %v4492_v59  ;;  %v4002_v59 = vcombine.low %v1724_v53, %v1728_v56 }
 0x39f   : > { %1641 = vmatprep.subr.bf16.mxu1 %v4497_v60  ;;  %v4003_v60 = vcombine.high %v1724_v53, %v1728_v56  ;;  %v1784_v53 = vld [vmem:[#allocation4 + $0x1e8] sm:$0xff] }
 0x3a2   : > { %1642 = vmatpush1.bf16.msra.mxu1 %v4495_v61  ;;  %v1732_v61 = vld [vmem:[#allocation4 + $0x48] sm:$0xff] }
 0x3a3   : > { %1643 = vmatprep.subr.bf16.mxu1 %v4500_v62  ;;  %v1736_v62 = vld [vmem:[#allocation4 + $0x68] sm:$0xff] }
 0x3a6   : > { %1644 = vmatpush1.bf16.msra.mxu1 %v4498_v63  ;;  %v1739_v63 = vld [vmem:[#allocation4 + $0x80] sm:$0xff] }
 0x3a7   : > { %1645 = vmatprep.subr.bf16.mxu1 %v4503_v1  ;;  %v1743_v1 = vld [vmem:[#allocation4 + $0xa0] sm:$0xff] }
 0x3aa   : > { %1646 = vmatpush1.bf16.msra.mxu1 %v4501_v4  ;;  %v1740_v4 = vld [vmem:[#allocation4 + $0x88] sm:$0xff] }
 0x3ab   : > { %1647 = vmatprep.subr.bf16.mxu1 %v4506_v5  ;;  %v1744_v5 = vld [vmem:[#allocation4 + $0xa8] sm:$0xff] }
 0x3ae   : > { %1648 = vmatpush1.bf16.msra.mxu1 %v4504_v6  ;;  %v4008_v6 = vcombine.low %v1731_v57, %v1735_v58 }
 0x3af   : > { %1649 = vmatprep.subr.bf16.mxu1 %v4509_v7  ;;  %v4010_v7 = vcombine.low %v1732_v61, %v1736_v62 }
 0x3b2   : > { %1650 = vmatpush1.bf16.msra.mxu1 %v4507_v8  ;;  %v4017_v8 = vcombine.high %v1739_v63, %v1743_v1 }
 0x3b3   : > { %1651 = vmatprep.subr.bf16.mxu1 %v4512_v9  ;;  %v4019_v9 = vcombine.high %v1740_v4, %v1744_v5 }
 0x3b6   : > { %1652 = vmatpush1.bf16.msra.mxu1 %v4510_v10  ;;  %v1747_v10 = vld [vmem:[#allocation4 + $0xc0] sm:$0xff] }
 0x3b7   : > { %1653 = vmatprep.subr.bf16.mxu1 %v4515_v11  ;;  %v1751_v11 = vld [vmem:[#allocation4 + $0xe0] sm:$0xff] }
 0x3ba   : > { %1654 = vmatpush1.bf16.msra.mxu1 %v4513_v12  ;;  %v1748_v12 = vld [vmem:[#allocation4 + $0xc8] sm:$0xff] }
 0x3bb   : > { %1655 = vmatprep.subr.bf16.mxu1 %v4518_v13  ;;  %v1752_v13 = vld [vmem:[#allocation4 + $0xe8] sm:$0xff] }
 0x3be   : > { %1656 = vmatpush1.bf16.msra.mxu1 %v4516_v14  ;;  %v4016_v14 = vcombine.low %v1739_v63, %v1743_v1  ;;  %v1795_v1 = vld [vmem:[#allocation4 + $0x240] sm:$0xff] }
 0x3bf   : > { %1657 = vmatprep.subr.bf16.mxu1 %v4521_v15  ;;  %v4018_v15 = vcombine.low %v1740_v4, %v1744_v5  ;;  %v1799_v4 = vld [vmem:[#allocation4 + $0x260] sm:$0xff]  ;;  %v1796_v5 = vld [vmem:[#allocation4 + $0x248] sm:$0xff] }
 0x3c2   : > { %1658 = vmatpush1.bf16.msra.mxu1 %v4519_v16  ;;  %v4025_v16 = vcombine.high %v1747_v10, %v1751_v11 }
 0x3c3   : > { %1659 = vmatprep.subr.bf16.mxu1 %v4524_v17  ;;  %v4027_v17 = vcombine.high %v1748_v12, %v1752_v13 }
 0x3c6   : > { %1660 = vmatpush1.bf16.msra.mxu1 %v4522_v18  ;;  %v1755_v18 = vld [vmem:[#allocation4 + $0x100] sm:$0xff] }
 0x3c7   : > { %1661 = vmatprep.subr.bf16.mxu1 %v4527_v19  ;;  %v1759_v19 = vld [vmem:[#allocation4 + $0x120] sm:$0xff] }
 0x3ca   : > { %1662 = vmatpush1.bf16.msra.mxu1 %v4525_v20  ;;  %v1756_v20 = vld [vmem:[#allocation4 + $0x108] sm:$0xff] }
 0x3cb   : > { %1663 = vmatprep.subr.bf16.mxu1 %v4530_v21  ;;  %v1760_v21 = vld [vmem:[#allocation4 + $0x128] sm:$0xff] }
 0x3ce   : > { %1664 = vmatpush1.bf16.msra.mxu1 %v4528_v22  ;;  %v4024_v22 = vcombine.low %v1747_v10, %v1751_v11  ;;  %v1803_v11 = vld [vmem:[#allocation4 + $0x280] sm:$0xff] }
 0x3cf   : > { %2574 = vmatprep.subr.bf16.mxu1 %v4003_v60  ;;  %v1788_v60 = vld [vmem:[#allocation4 + $0x208] sm:$0xff] }
 0x464   : > { %v1421_v23 = vpop.f32.mrb[8].mxu1 }
 0x465   : > { %v1428_v24 = vpack.c.bf16 %v1421_v23, %v1421_v23  ;;  %v4290_v25 = vpop.f32.mrb[9].mxu1  ;;  %v4026_v23 = vcombine.low %v1748_v12, %v1752_v13  ;;  %v1807_v12 = vld [vmem:[#allocation4 + $0x2a0] sm:$0xff]  ;;  %v1804_v13 = vld [vmem:[#allocation4 + $0x288] sm:$0xff] }
 0x466   : > { %v1424_v26 = vpop.f32.mrb[10].mxu1  ;;  %v4035_v25 = vcombine.high %v1756_v20, %v1760_v21 }
 0x467   : > { %v4291_v27 = vpop.f32.mrb[11].mxu1  ;;  %1665 = vmatprep.mubr.bf16.mxu1 %v1428_v24  ;;  %v4033_v24 = vcombine.high %v1755_v18, %v1759_v19  ;;  %v1763_v26 = vld [vmem:[#allocation4 + $0x140] sm:$0xff] }
 0x468   : > { %v1319_v28 = vpop.f32.mrb[12].mxu0  ;;  %v1767_v27 = vld [vmem:[#allocation4 + $0x160] sm:$0xff] }
 0x469   : > { %v1427_v29 = vpack.c.bf16 %v1319_v28, %v1319_v28  ;;  %v4278_v30 = vpop.f32.mrb[13].mxu0  ;;  %v1764_v28 = vld [vmem:[#allocation4 + $0x148] sm:$0xff] }
 0x46a   : > { %v1322_v31 = vpop.f32.mrb[14].mxu0  ;;  %v4032_v30 = vcombine.low %v1755_v18, %v1759_v19  ;;  %v4080_v19 = vcombine.low %v1803_v11, %v1807_v12 }
 0x46b   : > { %v4279_v32 = vpop.f32.mrb[15].mxu0  ;;  %1666 = vmatmul.mubr.bf16.vlgmr.msra.gmra.mrb[12].mxu1 %v1427_v29  ;;  %v1768_v29 = vld [vmem:[#allocation4 + $0x168] sm:$0xff]  ;;  %v4034_v31 = vcombine.low %v1756_v20, %v1760_v21 }
 0x46c   : > { %2575 = vmatpush1.bf16.msra.mxu1 %v4002_v59  ;;  %v4041_v32 = vcombine.high %v1763_v26, %v1767_v27  ;;  %v4043_v33 = vcombine.high %v1764_v28, %v1768_v29  ;;  %v1791_v59 = vld [vmem:[#allocation4 + $0x220] sm:$0xff] }
 0x53e   : > { %v1667_v36 = vpop.f32.mrb[12].mxu1 }
 0x53f   : > { %v1668_v37 = vadd.f32 %v1667_v36, %v1466_v34  ;;  %v1669_v40 = vpop.f32.mrb[13].mxu1  ;;  %v1771_v34 = vld [vmem:[#allocation4 + $0x180] sm:$0xff]  ;;  %v1772_v36 = vld [vmem:[#allocation4 + $0x188] sm:$0xff] }
 0x540   : > { %v1670_v43 = vadd.f32 %v1669_v40, %v1470_v35  ;;  %v1671_v46 = vpop.f32.mrb[14].mxu1  ;;  %v1775_v35 = vld [vmem:[#allocation4 + $0x1a0] sm:$0xff]  ;;  %v4040_v40 = vcombine.low %v1763_v26, %v1767_v27 }
 0x541   : > { %v5206_v47 = vadd.f32 %v1668_v37, %v5060_v0  ;;  %v1672_v48 = vpop.f32.mrb[15].mxu1  ;;  %v4009_v0 = vcombine.high %v1731_v57, %v1735_v58  ;;  %v1776_v37 = vld [vmem:[#allocation4 + $0x1a8] sm:$0xff]  ;;  %v4049_v46 = vcombine.high %v1771_v34, %v1775_v35  ;;  %v4048_v54 = vcombine.low %v1771_v34, %v1775_v35  ;;  %v1787_v58 = vld [vmem:[#allocation4 + $0x200] sm:$0xff] }
 0x542   : > { %v5209_v49 = vadd.f32 %v1670_v43, %v5055_v45  ;;  %v4011_v45 = vcombine.high %v1732_v61, %v1736_v62  ;;  %v4042_v43 = vcombine.low %v1764_v28, %v1768_v29  ;;  %v4051_v48 = vcombine.high %v1772_v36, %v1776_v37  ;;  %v1811_v28 = vld [vmem:[#allocation4 + $0x2c0] sm:$0xff] }
 0x543   : > { %2535 = vmatprep.subr.bf16.mxu0 %v4009_v0  ;;  %v4050_v55 = vcombine.low %v1772_v36, %v1776_v37  ;;  %v4059_v57 = vcombine.high %v1780_v52, %v1784_v53  ;;  %v1792_v0 = vld [vmem:[#allocation4 + $0x228] sm:$0xff]  ;;  %v4058_v62 = vcombine.low %v1780_v52, %v1784_v53  ;;  %v4065_v63 = vcombine.high %v1787_v58, %v1791_v59  ;;  %v1815_v29 = vld [vmem:[#allocation4 + $0x2e0] sm:$0xff] }
 0x544   : > { %v1678_v50 = vadd.f32 %v5209_v49, %v5206_v47  ;;  %2576 = vmatprep.subr.bf16.mxu1 %v4011_v45  ;;  %2536 = vmatpush1.bf16.msra.mxu0 %v4008_v6  ;;  %v4067_v45 = vcombine.high %v1788_v60, %v1792_v0  ;;  %v1800_v6 = vld [vmem:[#allocation4 + $0x268] sm:$0xff]  ;;  %v1823_v35 = vld [vmem:[#allocation4 + $0x320] sm:$0xff] }
 0x545   : > { %2577 = vmatpush1.bf16.msra.mxu1 %v4010_v7  ;;  %2537 = vmatprep.subr.bf16.mxu0 %v4017_v8  ;;  %v4064_v7 = vcombine.low %v1787_v58, %v1791_v59  ;;  %v4066_v8 = vcombine.low %v1788_v60, %v1792_v0  ;;  %v4075_v10 = vcombine.high %v1796_v5, %v1800_v6  ;;  %v1820_v36 = vld [vmem:[#allocation4 + $0x308] sm:$0xff]  ;;  %v1835_v58 = vld [vmem:[#allocation4 + $0x380] sm:$0xff] }
 0x546   : > { %1679 = vadd.xlane.f32.xlu0 %v1678_v50  ;;  %2578 = vmatprep.subr.bf16.mxu1 %v4019_v9  ;;  %v1779_v50 = vld [vmem:[#allocation4 + $0x1c0] sm:$0xff]  ;;  %v4073_v9 = vcombine.high %v1795_v1, %v1799_v4  ;;  %v1828_v52 = vld [vmem:[#allocation4 + $0x348] sm:$0xff] }
 0x547   : > { %v4057_v56 = vcombine.high %v1779_v50, %v1783_v51  ;;  %v4056_v61 = vcombine.low %v1779_v50, %v1783_v51  ;;  %v1827_v50 = vld [vmem:[#allocation4 + $0x340] sm:$0xff]  ;;  %v1836_v60 = vld [vmem:[#allocation4 + $0x388] sm:$0xff] }
 0x548   : > { %2538 = vmatpush1.bf16.msra.mxu0 %v4016_v14  ;;  %v1808_v14 = vld [vmem:[#allocation4 + $0x2a8] sm:$0xff]  ;;  %v1831_v51 = vld [vmem:[#allocation4 + $0x360] sm:$0xff] }
 0x549   : > { %2579 = vmatpush1.bf16.msra.mxu1 %v4018_v15  ;;  %2539 = vmatprep.subr.bf16.mxu0 %v4025_v16  ;;  %v4072_v15 = vcombine.low %v1795_v1, %v1799_v4  ;;  %v4074_v16 = vcombine.low %v1796_v5, %v1800_v6  ;;  %v4083_v18 = vcombine.high %v1804_v13, %v1808_v14  ;;  %v1839_v59 = vld [vmem:[#allocation4 + $0x3a0] sm:$0xff]  ;;  %v1844_v5 = vld [vmem:[#allocation4 + $0x3c8] sm:$0xff] }
 0x54a   : > { %2580 = vmatprep.subr.bf16.mxu1 %v4027_v17  ;;  %v4081_v17 = vcombine.high %v1803_v11, %v1807_v12  ;;  %v4082_v20 = vcombine.low %v1804_v13, %v1808_v14  ;;  %v4105_v53 = vcombine.high %v1827_v50, %v1831_v51  ;;  %v4113_v0 = vcombine.high %v1835_v58, %v1839_v59  ;;  %v1843_v1 = vld [vmem:[#allocation4 + $0x3c0] sm:$0xff]  ;;  %v1725_v11 = vld [vmem:[#allocation4 + $0x10] sm:$0xff]  ;;  %v1726_v13 = vld [vmem:[#allocation4 + $0x18] sm:$0xff] }
 0x54b   : > { %v1847_v4 = vld [vmem:[#allocation4 + $0x3e0] sm:$0xff]  ;;  %v1729_v12 = vld [vmem:[#allocation4 + $0x30] sm:$0xff] }
 0x54c   : > { %2540 = vmatpush1.bf16.msra.mxu0 %v4024_v22  ;;  %v4120_v6 = vcombine.low %v1843_v1, %v1847_v4  ;;  %v4005_v14 = vcombine.high %v1725_v11, %v1729_v12 }
 0x54d   : > { %2581 = vmatpush1.bf16.msra.mxu1 %v4026_v23  ;;  %2541 = vmatprep.subr.bf16.mxu0 %v4033_v24 }
 0x54e   : > { %2582 = vmatprep.subr.bf16.mxu1 %v4035_v25 }
 0x550   : > { %2542 = vmatpush1.bf16.msra.mxu0 %v4032_v30  ;;  %v1812_v30 = vld [vmem:[#allocation4 + $0x2c8] sm:$0xff] }
 0x551   : > { %2583 = vmatpush1.bf16.msra.mxu1 %v4034_v31  ;;  %2543 = vmatprep.subr.bf16.mxu0 %v4041_v32  ;;  %v4089_v31 = vcombine.high %v1811_v28, %v1815_v29  ;;  %v1816_v32 = vld [vmem:[#allocation4 + $0x2e8] sm:$0xff] }
 0x552   : > { %2584 = vmatprep.subr.bf16.mxu1 %v4043_v33  ;;  %v4088_v33 = vcombine.low %v1811_v28, %v1815_v29  ;;  %v4090_v34 = vcombine.low %v1812_v30, %v1816_v32 }
 0x554   : > { %2544 = vmatpush1.bf16.msra.mxu0 %v4040_v40  ;;  %v1824_v40 = vld [vmem:[#allocation4 + $0x328] sm:$0xff] }
 0x555   : > { %2585 = vmatpush1.bf16.msra.mxu1 %v4042_v43  ;;  %2545 = vmatprep.subr.bf16.mxu0 %v4049_v46  ;;  %v4098_v46 = vcombine.low %v1820_v36, %v1824_v40 }
 0x556   : > { %2586 = vmatprep.subr.bf16.mxu1 %v4051_v48  ;;  %v4099_v48 = vcombine.high %v1820_v36, %v1824_v40  ;;  %v1737_v36 = vld [vmem:[#allocation4 + $0x70] sm:$0xff]  ;;  %v1738_v40 = vld [vmem:[#allocation4 + $0x78] sm:$0xff] }
 0x558   : > { %2546 = vmatpush1.bf16.msra.mxu0 %v4048_v54  ;;  %v1832_v54 = vld [vmem:[#allocation4 + $0x368] sm:$0xff] }
 0x559   : > { %2587 = vmatpush1.bf16.msra.mxu1 %v4050_v55  ;;  %2547 = vmatprep.subr.bf16.mxu0 %v4057_v56  ;;  %v4104_v55 = vcombine.low %v1827_v50, %v1831_v51  ;;  %v4106_v56 = vcombine.low %v1828_v52, %v1832_v54  ;;  %v1745_v50 = vld [vmem:[#allocation4 + $0xb0] sm:$0xff]  ;;  %v1742_v51 = vld [vmem:[#allocation4 + $0x98] sm:$0xff] }
 0x55a   : > { %2588 = vmatprep.subr.bf16.mxu1 %v4059_v57  ;;  %v4107_v57 = vcombine.high %v1828_v52, %v1832_v54  ;;  %v1746_v52 = vld [vmem:[#allocation4 + $0xb8] sm:$0xff] }
 0x55c   : > { %2548 = vmatpush1.bf16.msra.mxu0 %v4056_v61  ;;  %v1840_v61 = vld [vmem:[#allocation4 + $0x3a8] sm:$0xff] }
 0x55d   : > { %2589 = vmatpush1.bf16.msra.mxu1 %v4058_v62  ;;  %2549 = vmatprep.subr.bf16.mxu0 %v4065_v63  ;;  %v4112_v62 = vcombine.low %v1835_v58, %v1839_v59  ;;  %v4114_v63 = vcombine.low %v1836_v60, %v1840_v61  ;;  %v1753_v58 = vld [vmem:[#allocation4 + $0xf0] sm:$0xff]  ;;  %v1750_v59 = vld [vmem:[#allocation4 + $0xd8] sm:$0xff] }
 0x55e   : > { %2590 = vmatprep.subr.bf16.mxu1 %v4067_v45  ;;  %v4115_v45 = vcombine.high %v1836_v60, %v1840_v61  ;;  %v1754_v60 = vld [vmem:[#allocation4 + $0xf8] sm:$0xff]  ;;  %v4022_v61 = vcombine.low %v1742_v51, %v1746_v52 }
 0x560   : > { %2550 = vmatpush1.bf16.msra.mxu0 %v4064_v7  ;;  %v4121_v7 = vcombine.high %v1843_v1, %v1847_v4  ;;  %v1761_v1 = vld [vmem:[#allocation4 + $0x130] sm:$0xff]  ;;  %v1758_v4 = vld [vmem:[#allocation4 + $0x118] sm:$0xff] }
 0x561   : > { %2591 = vmatpush1.bf16.msra.mxu1 %v4066_v8  ;;  %2551 = vmatprep.subr.bf16.mxu0 %v4073_v9  ;;  %v1848_v8 = vld [vmem:[#allocation4 + $0x3e8] sm:$0xff] }
 0x562   : > { %2592 = vmatprep.subr.bf16.mxu1 %v4075_v10  ;;  %v4122_v9 = vcombine.low %v1844_v5, %v1848_v8  ;;  %v4123_v10 = vcombine.high %v1844_v5, %v1848_v8  ;;  %v1762_v5 = vld [vmem:[#allocation4 + $0x138] sm:$0xff] }
 0x564   : > { %2552 = vmatpush1.bf16.msra.mxu0 %v4072_v15  ;;  %v1730_v15 = vld [vmem:[#allocation4 + $0x38] sm:$0xff] }
 0x565   : > { %2593 = vmatpush1.bf16.msra.mxu1 %v4074_v16  ;;  %2553 = vmatprep.subr.bf16.mxu0 %v4081_v17  ;;  %v4004_v16 = vcombine.low %v1725_v11, %v1729_v12  ;;  %v4006_v17 = vcombine.low %v1726_v13, %v1730_v15  ;;  %v1769_v11 = vld [vmem:[#allocation4 + $0x170] sm:$0xff]  ;;  %v1766_v12 = vld [vmem:[#allocation4 + $0x158] sm:$0xff] }
 0x566   : > { %2594 = vmatprep.subr.bf16.mxu1 %v4083_v18  ;;  %v4007_v18 = vcombine.high %v1726_v13, %v1730_v15  ;;  %v1770_v13 = vld [vmem:[#allocation4 + $0x178] sm:$0xff]  ;;  %v4038_v15 = vcombine.low %v1758_v4, %v1762_v5 }
 0x568   : > { %2554 = vmatpush1.bf16.msra.mxu0 %v4080_v19 }
 0x569   : > { %2595 = vmatpush1.bf16.msra.mxu1 %v4082_v20  ;;  %2555 = vmatprep.subr.bf16.mxu0 %v4089_v31 }
 0x56c   : > { %2556 = vmatpush1.bf16.msra.mxu0 %v4088_v33 }
 0x5d3   : > { %v1680_v21 = vpop.xlane.xlu0 %1679 }
 0x5d4   : > { %v1682_v22 = vmul.f32 0.00390625, %v1680_v21 }
 0x5d6   : > { %v5214_v23 = vsub.f32 %v5206_v47, %v1682_v22  ;;  %v5217_v24 = vsub.f32 %v5209_v49, %v1682_v22  ;;  %v4091_v47 = vcombine.high %v1812_v30, %v1816_v32  ;;  %v1819_v49 = vld [vmem:[#allocation4 + $0x300] sm:$0xff] }
 0x5d7   : > { %v4097_v37 = vcombine.high %v1819_v49, %v1823_v35  ;;  %v4096_v43 = vcombine.low %v1819_v49, %v1823_v35  ;;  %v1676_v22 = vld [vmem:[%s5332_s5] sm:$0x3]  ;;  %v1733_v35 = vld [vmem:[#allocation4 + $0x50] sm:$0xff] }
 0x5d8   : > { %v1685_v25 = vmul.f32 %v5214_v23, %v5214_v23  ;;  %v1686_v26 = vmul.f32 %v5217_v24, %v5217_v24  ;;  %2596 = vmatprep.subr.bf16.mxu1 %v4091_v47 }
 0x5d9   : > { %2597 = vmatpush1.bf16.msra.mxu1 %v4090_v34  ;;  %2557 = vmatprep.subr.bf16.mxu0 %v4097_v37  ;;  %v1734_v37 = vld [vmem:[#allocation4 + $0x58] sm:$0xff] }
 0x5da   : > { %v1687_v27 = vadd.f32 %v1686_v26, %v1685_v25  ;;  %2598 = vmatprep.subr.bf16.mxu1 %v4099_v48  ;;  %2558 = vmatpush1.bf16.msra.mxu0 %v4096_v43  ;;  %v1677_v25 = vld [vmem:[%s5333_s6] sm:$0x3]  ;;  %v1703_v26 = vrot.slane %v1676_v22, %v5084_v44  ;;  %v4015_v48 = vcombine.high %v1734_v37, %v1738_v40 }
 0x5db   : > { %2559 = vmatprep.subr.bf16.mxu0 %v4105_v53  ;;  %v1716_v31 = vrot.slane %v1677_v25, %v5084_v44  ;;  %v1712_v32 = vrot.slane %v1677_v25, %v5079_v42  ;;  %v4012_v53 = vcombine.low %v1733_v35, %v1737_v36  ;;  %v4014_v54 = vcombine.low %v1734_v37, %v1738_v40  ;;  %v1793_v37 = vld [vmem:[#allocation4 + $0x230] sm:$0xff]  ;;  %v1790_v40 = vld [vmem:[#allocation4 + $0x218] sm:$0xff] }
 0x5dc   : > { %1688 = vadd.xlane.f32.xlu1 %v1687_v27  ;;  %v1699_v27 = vrot.slane %v1676_v22, %v5079_v42  ;;  %v4046_v25 = vcombine.low %v1766_v12, %v1770_v13 }
 0x5dd   : > { %2599 = vmatpush1.bf16.msra.mxu1 %v4098_v46  ;;  %v4013_v46 = vcombine.high %v1733_v35, %v1737_v36  ;;  %v1789_v36 = vld [vmem:[#allocation4 + $0x210] sm:$0xff] }
 0x5de   : > { %2600 = vmatprep.subr.bf16.mxu1 %v4107_v57  ;;  %2560 = vmatpush1.bf16.msra.mxu0 %v4104_v55  ;;  %v1749_v57 = vld [vmem:[#allocation4 + $0xd0] sm:$0xff] }
 0x5df   : > { %2561 = vmatprep.subr.bf16.mxu0 %v4113_v0 }
 0x5e1   : > { %2601 = vmatpush1.bf16.msra.mxu1 %v4106_v56  ;;  %v4023_v56 = vcombine.high %v1742_v51, %v1746_v52  ;;  %v1797_v51 = vld [vmem:[#allocation4 + $0x250] sm:$0xff] }
 0x5e2   : > { %2602 = vmatprep.subr.bf16.mxu1 %v4115_v45  ;;  %2562 = vmatpush1.bf16.msra.mxu0 %v4112_v62  ;;  %v4029_v62 = vcombine.high %v1749_v57, %v1753_v58  ;;  %v1757_v45 = vld [vmem:[#allocation4 + $0x110] sm:$0xff] }
 0x5e3   : > { %2563 = vmatprep.subr.bf16.mxu0 %v4121_v7  ;;  %v4030_v7 = vcombine.low %v1750_v59, %v1754_v60  ;;  %v4037_v8 = vcombine.high %v1757_v45, %v1761_v1  ;;  %v1801_v52 = vld [vmem:[#allocation4 + $0x270] sm:$0xff] }
 0x5e5   : > { %2603 = vmatpush1.bf16.msra.mxu1 %v4114_v63  ;;  %v4031_v63 = vcombine.high %v1750_v59, %v1754_v60  ;;  %v1805_v59 = vld [vmem:[#allocation4 + $0x290] sm:$0xff] }
 0x5e6   : > { %2604 = vmatprep.subr.bf16.mxu1 %v4123_v10  ;;  %2564 = vmatpush1.bf16.msra.mxu0 %v4120_v6  ;;  %v4028_v6 = vcombine.low %v1749_v57, %v1753_v58  ;;  %v1765_v10 = vld [vmem:[#allocation4 + $0x150] sm:$0xff]  ;;  %v4077_v57 = vcombine.high %v1797_v51, %v1801_v52 }
 0x5e7   : > { %2615 = vmatprep.subr.bf16.mxu0 %v4005_v14  ;;  %v4036_v14 = vcombine.low %v1757_v45, %v1761_v1  ;;  %v4044_v22 = vcombine.low %v1765_v10, %v1769_v11  ;;  %v1809_v60 = vld [vmem:[#allocation4 + $0x2b0] sm:$0xff] }
 0x5e8   : > { %v4085_v45 = vcombine.high %v1805_v59, %v1809_v60 }
 0x5e9   : > { %2605 = vmatpush1.bf16.msra.mxu1 %v4122_v9  ;;  %v4039_v9 = vcombine.high %v1758_v4, %v1762_v5  ;;  %v1813_v4 = vld [vmem:[#allocation4 + $0x2d0] sm:$0xff] }
 0x5ea   : > { %2656 = vmatprep.subr.bf16.mxu1 %v4007_v18  ;;  %v1773_v18 = vld [vmem:[#allocation4 + $0x190] sm:$0xff] }
 0x5eb   : > { %v1817_v5 = vld [vmem:[#allocation4 + $0x2f0] sm:$0xff] }
 0x669   : > { %v1689_v19 = vpop.xlane.xlu1 %1688 }
 0x66a   : > { %v1690_v20 = vmul.f32 0.00390625, %v1689_v19  ;;  %v1777_v19 = vld [vmem:[#allocation4 + $0x1b0] sm:$0xff] }
 0x66c   : > { %v1691_v21 = vadd.f32 1e-12, %v1690_v20  ;;  %v1774_v20 = vld [vmem:[#allocation4 + $0x198] sm:$0xff] }
 0x66e   : > { %4731 = vrsqrt.f32 %v1691_v21  ;;  %v1778_v21 = vld [vmem:[#allocation4 + $0x1b8] sm:$0xff] }
 0x678   : > { %v4732_v28 = vpop.eup %4731 }
 0x679   : > { %v1693_v29 = vmul.f32 %v4732_v28, %v5214_v23  ;;  %v1694_v30 = vmul.f32 %v4732_v28, %v5217_v24  ;;  %v1741_v24 = vld [vmem:[#allocation4 + $0x90] sm:$0xff] }
 0x67a   : > { %v4021_v55 = vcombine.high %v1741_v24, %v1745_v50  ;;  %v4020_v0 = vcombine.low %v1741_v24, %v1745_v50  ;;  %v1781_v28 = vld [vmem:[#allocation4 + $0x1d0] sm:$0xff] }
 0x67b   : > { %v1707_v33 = vmul.f32 %v1703_v26, %v1694_v30  ;;  %v1706_v34 = vmul.f32 %v1699_v27, %v1693_v29  ;;  %v4053_v26 = vcombine.high %v1773_v18, %v1777_v19  ;;  %v4055_v27 = vcombine.high %v1774_v20, %v1778_v21  ;;  %v1785_v29 = vld [vmem:[#allocation4 + $0x1f0] sm:$0xff]  ;;  %v1782_v30 = vld [vmem:[#allocation4 + $0x1d8] sm:$0xff] }
 0x67c   : > { %v4060_v24 = vcombine.low %v1781_v28, %v1785_v29 }
 0x67d   : > { %v5235_v47 = vadd.f32 %v1716_v31, %v1707_v33  ;;  %v5237_v49 = vadd.f32 %v1712_v32, %v1706_v34  ;;  %v1786_v31 = vld [vmem:[#allocation4 + $0x1f8] sm:$0xff]  ;;  %v4052_v32 = vcombine.low %v1773_v18, %v1777_v19  ;;  %v4054_v33 = vcombine.low %v1774_v20, %v1778_v21  ;;  %v1829_v20 = vld [vmem:[#allocation4 + $0x350] sm:$0xff] }
 0x67e   : > { %v4061_v34 = vcombine.high %v1781_v28, %v1785_v29  ;;  %v4063_v35 = vcombine.high %v1782_v30, %v1786_v31  ;;  %v1833_v21 = vld [vmem:[#allocation4 + $0x370] sm:$0xff] }
 0x67f   : > { %v1722_v43 = vpack.c.bf16 %v5235_v47, %v5235_v47  ;;  %v5243_v23 = vpack.c.bf16 %v5237_v49, %v5237_v49  ;;  %v4109_v28 = vcombine.high %v1829_v20, %v1833_v21 }
 0x681   : > { %2565 = vmatprep.mubr.bf16.mxu0 %v1722_v43  ;;  %2606 = vmatprep.mubr.bf16.mxu1 %v1722_v43 }
 0x682   : > { %2566 = vmatmul.mubr.bf16.vlgmr.msra.gmra.mrb[16].mxu0 %v5243_v23  ;;  %2607 = vmatmul.mubr.bf16.vlgmr.msra.gmra.mrb[16].mxu1 %v5243_v23 }
 0x683   : > { %2616 = vmatpush1.bf16.msra.mxu0 %v4004_v16  ;;  %2657 = vmatpush1.bf16.msra.mxu1 %v4006_v17  ;;  %v4045_v16 = vcombine.high %v1765_v10, %v1769_v11  ;;  %v4047_v17 = vcombine.high %v1766_v12, %v1770_v13  ;;  %v4093_v10 = vcombine.high %v1813_v4, %v1817_v5  ;;  %v1821_v12 = vld [vmem:[#allocation4 + $0x310] sm:$0xff] }
 0x684   : > { %2647 = vmatprep.mubr.bf16.mxu0 %v1722_v43  ;;  %2688 = vmatprep.mubr.bf16.mxu1 %v1722_v43  ;;  %v1794_v43 = vld [vmem:[#allocation4 + $0x238] sm:$0xff]  ;;  %v1825_v13 = vld [vmem:[#allocation4 + $0x330] sm:$0xff] }
 0x685   : > { %2617 = vmatprep.subr.bf16.mxu0 %v4013_v46  ;;  %2658 = vmatprep.subr.bf16.mxu1 %v4015_v48  ;;  %v4062_v46 = vcombine.low %v1782_v30, %v1786_v31  ;;  %v4069_v48 = vcombine.high %v1789_v36, %v1793_v37  ;;  %v4071_v50 = vcombine.high %v1790_v40, %v1794_v43  ;;  %v1837_v30 = vld [vmem:[#allocation4 + $0x390] sm:$0xff] }
 0x686   : > { %v4101_v18 = vcombine.high %v1821_v12, %v1825_v13  ;;  %v1841_v31 = vld [vmem:[#allocation4 + $0x3b0] sm:$0xff] }
 0x687   : > { %2618 = vmatpush1.bf16.msra.mxu0 %v4012_v53  ;;  %2659 = vmatpush1.bf16.msra.mxu1 %v4014_v54  ;;  %v1798_v53 = vld [vmem:[#allocation4 + $0x258] sm:$0xff] }
 0x688   : > { %2619 = vmatprep.subr.bf16.mxu0 %v4021_v55  ;;  %2660 = vmatprep.subr.bf16.mxu1 %v4023_v56  ;;  %v1802_v54 = vld [vmem:[#allocation4 + $0x278] sm:$0xff]  ;;  %v4068_v55 = vcombine.low %v1789_v36, %v1793_v37  ;;  %v4070_v56 = vcombine.low %v1790_v40, %v1794_v43  ;;  %v4117_v36 = vcombine.high %v1837_v30, %v1841_v31  ;;  %v1845_v40 = vld [vmem:[#allocation4 + $0x3d0] sm:$0xff] }
 0x689   : > { %v4079_v58 = vcombine.high %v1798_v53, %v1802_v54  ;;  %v1849_v43 = vld [vmem:[#allocation4 + $0x3f0] sm:$0xff] }
 0x68b   : > { %2620 = vmatpush1.bf16.msra.mxu0 %v4020_v0  ;;  %2661 = vmatpush1.bf16.msra.mxu1 %v4022_v61  ;;  %v1806_v0 = vld [vmem:[#allocation4 + $0x298] sm:$0xff] }
 0x68c   : > { %2621 = vmatprep.subr.bf16.mxu0 %v4029_v62  ;;  %2662 = vmatprep.subr.bf16.mxu1 %v4031_v63  ;;  %v1810_v61 = vld [vmem:[#allocation4 + $0x2b8] sm:$0xff]  ;;  %v4076_v62 = vcombine.low %v1797_v51, %v1801_v52  ;;  %v4078_v63 = vcombine.low %v1798_v53, %v1802_v54  ;;  %v4125_v51 = vcombine.high %v1845_v40, %v1849_v43 }
 0x68d   : > { %v4087_v1 = vcombine.high %v1806_v0, %v1810_v61  ;;  %v4124_v53 = vcombine.low %v1845_v40, %v1849_v43  ;;  %v4602_v40 = vld [vmem:[#allocation6 + $0x1b4] ss:$8 sps:$4 sm:$0xff]   ;;  %v4597_v43 = vld [vmem:[#allocation6 + $0xb0] ss:$8 sps:$4 sm:$0xff]  }
 0x68f   : > { %2622 = vmatpush1.bf16.msra.mxu0 %v4028_v6  ;;  %2663 = vmatpush1.bf16.msra.mxu1 %v4030_v7  ;;  %v1814_v6 = vld [vmem:[#allocation4 + $0x2d8] sm:$0xff] }
 0x690   : > { %2623 = vmatprep.subr.bf16.mxu0 %v4037_v8  ;;  %2664 = vmatprep.subr.bf16.mxu1 %v4039_v9  ;;  %v1818_v7 = vld [vmem:[#allocation4 + $0x2f8] sm:$0xff]  ;;  %v4084_v8 = vcombine.low %v1805_v59, %v1809_v60  ;;  %v4086_v9 = vcombine.low %v1806_v0, %v1810_v61 }
 0x691   : > { %v4095_v11 = vcombine.high %v1814_v6, %v1818_v7  ;;  %v4539_v59 = vld [vmem:[#allocation6 + $0x14] ss:$8 sps:$4 sm:$0xff]   ;;  %v4537_v0 = vld [vmem:[#allocation6 + $0x10] ss:$8 sps:$4 sm:$0xff]  }
 0x692   : > { %v4542_v60 = vld [vmem:[#allocation6 + $0x114] ss:$8 sps:$4 sm:$0xff]   ;;  %v4540_v61 = vld [vmem:[#allocation6 + $0x110] ss:$8 sps:$4 sm:$0xff]  }
 0x693   : > { %2624 = vmatpush1.bf16.msra.mxu0 %v4036_v14  ;;  %2665 = vmatpush1.bf16.msra.mxu1 %v4038_v15  ;;  %v1822_v14 = vld [vmem:[#allocation4 + $0x318] sm:$0xff] }
 0x694   : > { %2625 = vmatprep.subr.bf16.mxu0 %v4045_v16  ;;  %2666 = vmatprep.subr.bf16.mxu1 %v4047_v17  ;;  %v1826_v15 = vld [vmem:[#allocation4 + $0x338] sm:$0xff]  ;;  %v4092_v16 = vcombine.low %v1813_v4, %v1817_v5  ;;  %v4094_v17 = vcombine.low %v1814_v6, %v1818_v7  ;;  %v4557_v7 = vld [vmem:[#allocation6 + $0x44] ss:$8 sps:$4 sm:$0xff]  }
 0x695   : > { %v4103_v19 = vcombine.high %v1822_v14, %v1826_v15  ;;  %v4551_v4 = vld [vmem:[#allocation6 + $0x34] ss:$8 sps:$4 sm:$0xff]   ;;  %v4549_v6 = vld [vmem:[#allocation6 + $0x30] ss:$8 sps:$4 sm:$0xff]  }
 0x696   : > { %v4554_v5 = vld [vmem:[#allocation6 + $0x134] ss:$8 sps:$4 sm:$0xff]  }
 0x697   : > { %2626 = vmatpush1.bf16.msra.mxu0 %v4044_v22  ;;  %2667 = vmatpush1.bf16.msra.mxu1 %v4046_v25  ;;  %v1830_v22 = vld [vmem:[#allocation4 + $0x358] sm:$0xff] }
 0x698   : > { %2627 = vmatprep.subr.bf16.mxu0 %v4053_v26  ;;  %2668 = vmatprep.subr.bf16.mxu1 %v4055_v27  ;;  %v1834_v25 = vld [vmem:[#allocation4 + $0x378] sm:$0xff]  ;;  %v4100_v26 = vcombine.low %v1821_v12, %v1825_v13  ;;  %v4102_v27 = vcombine.low %v1822_v14, %v1826_v15  ;;  %v4569_v15 = vld [vmem:[#allocation6 + $0x64] ss:$8 sps:$4 sm:$0xff]  }
 0x699   : > { %v4111_v29 = vcombine.high %v1830_v22, %v1834_v25  ;;  %v4566_v12 = vld [vmem:[#allocation6 + $0x154] ss:$8 sps:$4 sm:$0xff]   ;;  %v4561_v13 = vld [vmem:[#allocation6 + $0x50] ss:$8 sps:$4 sm:$0xff]  }
 0x69a   : > { %v4564_v14 = vld [vmem:[#allocation6 + $0x150] ss:$8 sps:$4 sm:$0xff]  }
 0x69b   : > { %2628 = vmatpush1.bf16.msra.mxu0 %v4052_v32  ;;  %2669 = vmatpush1.bf16.msra.mxu1 %v4054_v33  ;;  %v1838_v32 = vld [vmem:[#allocation4 + $0x398] sm:$0xff] }
 0x69c   : > { %2629 = vmatprep.subr.bf16.mxu0 %v4061_v34  ;;  %2670 = vmatprep.subr.bf16.mxu1 %v4063_v35  ;;  %v1842_v33 = vld [vmem:[#allocation4 + $0x3b8] sm:$0xff]  ;;  %v4108_v34 = vcombine.low %v1829_v20, %v1833_v21  ;;  %v4110_v35 = vcombine.low %v1830_v22, %v1834_v25  ;;  %v4581_v25 = vld [vmem:[#allocation6 + $0x84] ss:$8 sps:$4 sm:$0xff]  }
 0x69d   : > { %v4119_v37 = vcombine.high %v1838_v32, %v1842_v33  ;;  %v4578_v20 = vld [vmem:[#allocation6 + $0x174] ss:$8 sps:$4 sm:$0xff]   ;;  %v4573_v21 = vld [vmem:[#allocation6 + $0x70] ss:$8 sps:$4 sm:$0xff]  }
 0x69e   : > { %v4576_v22 = vld [vmem:[#allocation6 + $0x170] ss:$8 sps:$4 sm:$0xff]  }
 0x69f   : > { %2630 = vmatpush1.bf16.msra.mxu0 %v4060_v24  ;;  %2671 = vmatpush1.bf16.msra.mxu1 %v4062_v46  ;;  %v1846_v24 = vld [vmem:[#allocation4 + $0x3d8] sm:$0xff] }
 0x6a0   : > { %2631 = vmatprep.subr.bf16.mxu0 %v4069_v48  ;;  %2672 = vmatprep.subr.bf16.mxu1 %v4071_v50  ;;  %v1850_v46 = vld [vmem:[#allocation4 + $0x3f8] sm:$0xff]  ;;  %v4116_v48 = vcombine.low %v1837_v30, %v1841_v31  ;;  %v4118_v50 = vcombine.low %v1838_v32, %v1842_v33  ;;  %v4593_v33 = vld [vmem:[#allocation6 + $0xa4] ss:$8 sps:$4 sm:$0xff]  }
 0x6a1   : > { %v4127_v52 = vcombine.high %v1846_v24, %v1850_v46  ;;  %v4126_v54 = vcombine.low %v1846_v24, %v1850_v46  ;;  %v4590_v30 = vld [vmem:[#allocation6 + $0x194] ss:$8 sps:$4 sm:$0xff]   ;;  %v4585_v31 = vld [vmem:[#allocation6 + $0x90] ss:$8 sps:$4 sm:$0xff]   ;;  %v4605_v46 = vld [vmem:[#allocation6 + $0xc4] ss:$8 sps:$4 sm:$0xff]  }
 0x6a2   : > { %v4588_v32 = vld [vmem:[#allocation6 + $0x190] ss:$8 sps:$4 sm:$0xff]  }
 0x6a3   : > { %2632 = vmatpush1.bf16.msra.mxu0 %v4068_v55  ;;  %2673 = vmatpush1.bf16.msra.mxu1 %v4070_v56  ;;  %v4533_v55 = vld [vmem:[#allocation6 + $0x4] ss:$8 sps:$4 sm:$0xff]   ;;  %v4600_v24 = vld [vmem:[#allocation6 + $0x1b0] ss:$8 sps:$4 sm:$0xff]  }
 0x6a4   : > { %2633 = vmatprep.subr.bf16.mxu0 %v4077_v57  ;;  %2674 = vmatprep.subr.bf16.mxu1 %v4079_v58  ;;  %v4536_v56 = vld [vmem:[#allocation6 + $0x104] ss:$8 sps:$4 sm:$0xff]   ;;  %v4531_v57 = vld [vmem:[#allocation6] ss:$8 sps:$4 sm:$0xff]  }
 0x6a5   : > { %v4534_v58 = vld [vmem:[#allocation6 + $0x100] ss:$8 sps:$4 sm:$0xff]  }
 0x6a7   : > { %2634 = vmatpush1.bf16.msra.mxu0 %v4076_v62  ;;  %2675 = vmatpush1.bf16.msra.mxu1 %v4078_v63  ;;  %v4545_v62 = vld [vmem:[#allocation6 + $0x24] ss:$8 sps:$4 sm:$0xff]  }
 0x6a8   : > { %2635 = vmatprep.subr.bf16.mxu0 %v4085_v45  ;;  %2676 = vmatprep.subr.bf16.mxu1 %v4087_v1  ;;  %v4548_v63 = vld [vmem:[#allocation6 + $0x124] ss:$8 sps:$4 sm:$0xff]   ;;  %v4543_v45 = vld [vmem:[#allocation6 + $0x20] ss:$8 sps:$4 sm:$0xff]  }
 0x6a9   : > { %v4546_v1 = vld [vmem:[#allocation6 + $0x120] ss:$8 sps:$4 sm:$0xff]  }
 0x6ab   : > { %2636 = vmatpush1.bf16.msra.mxu0 %v4084_v8  ;;  %2677 = vmatpush1.bf16.msra.mxu1 %v4086_v9  ;;  %v4560_v8 = vld [vmem:[#allocation6 + $0x144] ss:$8 sps:$4 sm:$0xff]   ;;  %v4555_v9 = vld [vmem:[#allocation6 + $0x40] ss:$8 sps:$4 sm:$0xff]  }
 0x6ac   : > { %2637 = vmatprep.subr.bf16.mxu0 %v4093_v10  ;;  %2678 = vmatprep.subr.bf16.mxu1 %v4095_v11  ;;  %v4558_v10 = vld [vmem:[#allocation6 + $0x140] ss:$8 sps:$4 sm:$0xff]   ;;  %v4563_v11 = vld [vmem:[#allocation6 + $0x54] ss:$8 sps:$4 sm:$0xff]  }
 0x6af   : > { %2638 = vmatpush1.bf16.msra.mxu0 %v4092_v16  ;;  %2679 = vmatpush1.bf16.msra.mxu1 %v4094_v17  ;;  %v4572_v16 = vld [vmem:[#allocation6 + $0x164] ss:$8 sps:$4 sm:$0xff]   ;;  %v4567_v17 = vld [vmem:[#allocation6 + $0x60] ss:$8 sps:$4 sm:$0xff]  }
 0x6b0   : > { %2639 = vmatprep.subr.bf16.mxu0 %v4101_v18  ;;  %2680 = vmatprep.subr.bf16.mxu1 %v4103_v19  ;;  %v4570_v18 = vld [vmem:[#allocation6 + $0x160] ss:$8 sps:$4 sm:$0xff]   ;;  %v4575_v19 = vld [vmem:[#allocation6 + $0x74] ss:$8 sps:$4 sm:$0xff]  }
 0x6b3   : > { %2640 = vmatpush1.bf16.msra.mxu0 %v4100_v26  ;;  %2681 = vmatpush1.bf16.msra.mxu1 %v4102_v27  ;;  %v4584_v26 = vld [vmem:[#allocation6 + $0x184] ss:$8 sps:$4 sm:$0xff]   ;;  %v4579_v27 = vld [vmem:[#allocation6 + $0x80] ss:$8 sps:$4 sm:$0xff]  }
 0x6b4   : > { %2641 = vmatprep.subr.bf16.mxu0 %v4109_v28  ;;  %2682 = vmatprep.subr.bf16.mxu1 %v4111_v29  ;;  %v4582_v28 = vld [vmem:[#allocation6 + $0x180] ss:$8 sps:$4 sm:$0xff]   ;;  %v4587_v29 = vld [vmem:[#allocation6 + $0x94] ss:$8 sps:$4 sm:$0xff]  }
 0x6b7   : > { %2642 = vmatpush1.bf16.msra.mxu0 %v4108_v34  ;;  %2683 = vmatpush1.bf16.msra.mxu1 %v4110_v35  ;;  %v4596_v34 = vld [vmem:[#allocation6 + $0x1a4] ss:$8 sps:$4 sm:$0xff]   ;;  %v4591_v35 = vld [vmem:[#allocation6 + $0xa0] ss:$8 sps:$4 sm:$0xff]  }
 0x6b8   : > { %2643 = vmatprep.subr.bf16.mxu0 %v4117_v36  ;;  %2684 = vmatprep.subr.bf16.mxu1 %v4119_v37  ;;  %v4594_v36 = vld [vmem:[#allocation6 + $0x1a0] ss:$8 sps:$4 sm:$0xff]   ;;  %v4599_v37 = vld [vmem:[#allocation6 + $0xb4] ss:$8 sps:$4 sm:$0xff]  }
 0x6bb   : > { %2644 = vmatpush1.bf16.msra.mxu0 %v4116_v48  ;;  %2685 = vmatpush1.bf16.msra.mxu1 %v4118_v50  ;;  %v4608_v48 = vld [vmem:[#allocation6 + $0x1c4] ss:$8 sps:$4 sm:$0xff]   ;;  %v4603_v50 = vld [vmem:[#allocation6 + $0xc0] ss:$8 sps:$4 sm:$0xff]  }
 0x6bc   : > { %2645 = vmatprep.subr.bf16.mxu0 %v4125_v51  ;;  %2686 = vmatprep.subr.bf16.mxu1 %v4127_v52  ;;  %v4606_v51 = vld [vmem:[#allocation6 + $0x1c0] ss:$8 sps:$4 sm:$0xff]   ;;  %v4611_v52 = vld [vmem:[#allocation6 + $0xd4] ss:$8 sps:$4 sm:$0xff]  }
 0x6bf   : > { %2646 = vmatpush1.bf16.msra.mxu0 %v4124_v53  ;;  %2687 = vmatpush1.bf16.msra.mxu1 %v4126_v54  ;;  %v4614_v53 = vld [vmem:[#allocation6 + $0x1d4] ss:$8 sps:$4 sm:$0xff]   ;;  %v4609_v54 = vld [vmem:[#allocation6 + $0xd0] ss:$8 sps:$4 sm:$0xff]  }
 0x6c0   : > { %3557 = vmatprep.subr.bf16.mxu0 %v4533_v55  ;;  %3598 = vmatprep.subr.bf16.mxu1 %v4536_v56  ;;  %v4612_v55 = vld [vmem:[#allocation6 + $0x1d0] ss:$8 sps:$4 sm:$0xff]   ;;  %v4617_v56 = vld [vmem:[#allocation6 + $0xe4] ss:$8 sps:$4 sm:$0xff]  }
 0x6c2   : > { %2648 = vmatmul.mubr.bf16.vlgmr.msra.gmra.mrb[20].mxu0 %v5243_v23  ;;  %2689 = vmatmul.mubr.bf16.vlgmr.msra.gmra.mrb[20].mxu1 %v5243_v23  ;;  %v4552_v23 = vld [vmem:[#allocation6 + $0x130] ss:$8 sps:$4 sm:$0xff]  }
 0x6c3   : > { %3558 = vmatpush1.bf16.msra.mxu0 %v4531_v57  ;;  %3599 = vmatpush1.bf16.msra.mxu1 %v4534_v58  ;;  %v4620_v57 = vld [vmem:[#allocation6 + $0x1e4] ss:$8 sps:$4 sm:$0xff]   ;;  %v4615_v58 = vld [vmem:[#allocation6 + $0xe0] ss:$8 sps:$4 sm:$0xff]  }
 0x6c4   : > { %3559 = vmatprep.subr.bf16.mxu0 %v4539_v59  ;;  %3600 = vmatprep.subr.bf16.mxu1 %v4542_v60  ;;  %v4618_v59 = vld [vmem:[#allocation6 + $0x1e0] ss:$8 sps:$4 sm:$0xff]   ;;  %v4623_v60 = vld [vmem:[#allocation6 + $0xf4] ss:$8 sps:$4 sm:$0xff]  }
 0x6c7   : > { %3560 = vmatpush1.bf16.msra.mxu0 %v4537_v0  ;;  %3601 = vmatpush1.bf16.msra.mxu1 %v4540_v61  ;;  %v4626_v0 = vld [vmem:[#allocation6 + $0x1f4] ss:$8 sps:$4 sm:$0xff]   ;;  %v4621_v61 = vld [vmem:[#allocation6 + $0xf0] ss:$8 sps:$4 sm:$0xff]  }
 0x6c8   : > { %3561 = vmatprep.subr.bf16.mxu0 %v4545_v62  ;;  %3602 = vmatprep.subr.bf16.mxu1 %v4548_v63  ;;  %v4624_v62 = vld [vmem:[#allocation6 + $0x1f0] ss:$8 sps:$4 sm:$0xff]   ;;  %v4629_v63 = vld [vmem:[#allocation6 + $0x204] ss:$8 sps:$4 sm:$0xff]  }
 0x6cb   : > { %3562 = vmatpush1.bf16.msra.mxu0 %v4543_v45  ;;  %3603 = vmatpush1.bf16.msra.mxu1 %v4546_v1  ;;  %v4632_v45 = vld [vmem:[#allocation6 + $0x304] ss:$8 sps:$4 sm:$0xff]  }
 0x6cc   : > { %3563 = vmatprep.subr.bf16.mxu0 %v4551_v4  ;;  %3604 = vmatprep.subr.bf16.mxu1 %v4554_v5  ;;  %v5252_v1 = vld [vmem:[%s5335_s8] sm:$0xff] }
 0x6cd   : > { %v1856_v4 = vrot.slane %v5252_v1, %v5079_v42  ;;  %v1864_v5 = vrot.slane %v5252_v1, %v598_v39 }
 0x6cf   : > { %3564 = vmatpush1.bf16.msra.mxu0 %v4549_v6  ;;  %3605 = vmatpush1.bf16.msra.mxu1 %v4552_v23  ;;  %v1860_v6 = vrot.slane %v5252_v1, %v5084_v44  ;;  %v1868_v23 = vrot.slane %v5252_v1, %v602_v41 }
 0x6d0   : > { %3565 = vmatprep.subr.bf16.mxu0 %v4557_v7  ;;  %3606 = vmatprep.subr.bf16.mxu1 %v4560_v8 }
 0x6d3   : > { %3566 = vmatpush1.bf16.msra.mxu0 %v4555_v9  ;;  %3607 = vmatpush1.bf16.msra.mxu1 %v4558_v10 }
 0x6d4   : > { %3567 = vmatprep.subr.bf16.mxu0 %v4563_v11  ;;  %3608 = vmatprep.subr.bf16.mxu1 %v4566_v12 }
 0x6d7   : > { %3568 = vmatpush1.bf16.msra.mxu0 %v4561_v13  ;;  %3609 = vmatpush1.bf16.msra.mxu1 %v4564_v14 }
 0x6d8   : > { %3569 = vmatprep.subr.bf16.mxu0 %v4569_v15  ;;  %3610 = vmatprep.subr.bf16.mxu1 %v4572_v16 }
 0x6db   : > { %3570 = vmatpush1.bf16.msra.mxu0 %v4567_v17  ;;  %3611 = vmatpush1.bf16.msra.mxu1 %v4570_v18 }
 0x6dc   : > { %3571 = vmatprep.subr.bf16.mxu0 %v4575_v19  ;;  %3612 = vmatprep.subr.bf16.mxu1 %v4578_v20 }
 0x6df   : > { %3572 = vmatpush1.bf16.msra.mxu0 %v4573_v21  ;;  %3613 = vmatpush1.bf16.msra.mxu1 %v4576_v22 }
 0x6e0   : > { %3573 = vmatprep.subr.bf16.mxu0 %v4581_v25  ;;  %3614 = vmatprep.subr.bf16.mxu1 %v4584_v26 }
 0x6e3   : > { %3574 = vmatpush1.bf16.msra.mxu0 %v4579_v27  ;;  %3615 = vmatpush1.bf16.msra.mxu1 %v4582_v28 }
 0x6e4   : > { %3575 = vmatprep.subr.bf16.mxu0 %v4587_v29  ;;  %3616 = vmatprep.subr.bf16.mxu1 %v4590_v30 }
 0x6e7   : > { %3576 = vmatpush1.bf16.msra.mxu0 %v4585_v31  ;;  %3617 = vmatpush1.bf16.msra.mxu1 %v4588_v32 }
 0x6e8   : > { %3577 = vmatprep.subr.bf16.mxu0 %v4593_v33  ;;  %3618 = vmatprep.subr.bf16.mxu1 %v4596_v34 }
 0x6eb   : > { %3578 = vmatpush1.bf16.msra.mxu0 %v4591_v35  ;;  %3619 = vmatpush1.bf16.msra.mxu1 %v4594_v36 }
 0x6ec   : > { %3579 = vmatprep.subr.bf16.mxu0 %v4599_v37  ;;  %3620 = vmatprep.subr.bf16.mxu1 %v4602_v40 }
 0x6ef   : > { %3580 = vmatpush1.bf16.msra.mxu0 %v4597_v43  ;;  %3621 = vmatpush1.bf16.msra.mxu1 %v4600_v24 }
 0x6f0   : > { %3581 = vmatprep.subr.bf16.mxu0 %v4605_v46  ;;  %3622 = vmatprep.subr.bf16.mxu1 %v4608_v48 }
 0x6f3   : > { %3582 = vmatpush1.bf16.msra.mxu0 %v4603_v50  ;;  %3623 = vmatpush1.bf16.msra.mxu1 %v4606_v51 }
 0x6f4   : > { %3583 = vmatprep.subr.bf16.mxu0 %v4611_v52  ;;  %3624 = vmatprep.subr.bf16.mxu1 %v4614_v53 }
 0x6f7   : > { %3584 = vmatpush1.bf16.msra.mxu0 %v4609_v54  ;;  %3625 = vmatpush1.bf16.msra.mxu1 %v4612_v55 }
 0x6f8   : > { %3585 = vmatprep.subr.bf16.mxu0 %v4617_v56  ;;  %3626 = vmatprep.subr.bf16.mxu1 %v4620_v57 }
 0x6fb   : > { %3586 = vmatpush1.bf16.msra.mxu0 %v4615_v58  ;;  %3627 = vmatpush1.bf16.msra.mxu1 %v4618_v59 }
 0x6fc   : > { %3587 = vmatprep.subr.bf16.mxu0 %v4623_v60  ;;  %3628 = vmatprep.subr.bf16.mxu1 %v4626_v0 }
 0x6ff   : > { %3588 = vmatpush1.bf16.msra.mxu0 %v4621_v61  ;;  %3629 = vmatpush1.bf16.msra.mxu1 %v4624_v62  ;;  %v4627_v61 = vld [vmem:[#allocation6 + $0x200] ss:$8 sps:$4 sm:$0xff]  }
 0x700   : > { %3639 = vmatprep.subr.bf16.mxu0 %v4629_v63  ;;  %3680 = vmatprep.subr.bf16.mxu1 %v4632_v45  ;;  %v4630_v45 = vld [vmem:[#allocation6 + $0x300] ss:$8 sps:$4 sm:$0xff]  }
 0x755   : > { %v2567_v7 = vpop.f32.mrb[16].mxu0  ;;  %v2608_v8 = vpop.f32.mrb[16].mxu1 }
 0x756   : > { %v2568_v9 = vadd.f32 %v2567_v7, %v1856_v4  ;;  %v2609_v10 = vadd.f32 %v2608_v8, %v1864_v5  ;;  %v2569_v11 = vpop.f32.mrb[17].mxu0  ;;  %v2610_v12 = vpop.f32.mrb[17].mxu1  ;;  %v4635_v5 = vld [vmem:[#allocation6 + $0x214] ss:$8 sps:$4 sm:$0xff]   ;;  %v4633_v7 = vld [vmem:[#allocation6 + $0x210] ss:$8 sps:$4 sm:$0xff]  }
 0x757   : > { %v2570_v13 = vadd.f32 %v2569_v11, %v1860_v6  ;;  %v2611_v14 = vadd.f32 %v2610_v12, %v1868_v23  ;;  %v2571_v15 = vpop.f32.mrb[18].mxu0  ;;  %v2612_v16 = vpop.f32.mrb[18].mxu1  ;;  %v4638_v23 = vld [vmem:[#allocation6 + $0x314] ss:$8 sps:$4 sm:$0xff]   ;;  %v4636_v8 = vld [vmem:[#allocation6 + $0x310] ss:$8 sps:$4 sm:$0xff]  }
 0x758   : > { %v2705_v17 = vmul.f32 0.044715, %v2568_v9  ;;  %v2707_v18 = vmul.f32 0.044715, %v2609_v10  ;;  %v2572_v39 = vpop.f32.mrb[19].mxu0  ;;  %v2613_v19 = vpop.f32.mrb[19].mxu1 }
 0x759   : > { %v2706_v20 = vmul.f32 0.044715, %v2570_v13  ;;  %v2708_v21 = vmul.f32 0.044715, %v2611_v14  ;;  %v2697_v46 = vmul.f32 0.5, %v2568_v9  ;;  %v2698_v51 = vmul.f32 0.5, %v2570_v13 }
 0x75a   : > { %v2713_v22 = vmul.f32 %v2705_v17, %v2568_v9  ;;  %v2715_v25 = vmul.f32 %v2707_v18, %v2609_v10  ;;  %v2700_v54 = vmul.f32 0.5, %v2611_v14  ;;  %v2699_v58 = vmul.f32 0.5, %v2609_v10  ;;  %v4639_v11 = vld [vmem:[#allocation6 + $0x220] ss:$8 sps:$4 sm:$0xff]   ;;  %v4645_v15 = vld [vmem:[#allocation6 + $0x230] ss:$8 sps:$4 sm:$0xff]  }
 0x75b   : > { %v2714_v26 = vmul.f32 %v2706_v20, %v2570_v13  ;;  %v2716_v41 = vmul.f32 %v2708_v21, %v2611_v14  ;;  %v4642_v12 = vld [vmem:[#allocation6 + $0x320] ss:$8 sps:$4 sm:$0xff]   ;;  %v4648_v16 = vld [vmem:[#allocation6 + $0x330] ss:$8 sps:$4 sm:$0xff]   ;;  %v4653_v17 = vld [vmem:[#allocation6 + $0x244] ss:$8 sps:$4 sm:$0xff]  }
 0x75c   : > { %v2721_v27 = vmul.f32 %v2713_v22, %v2568_v9  ;;  %v2723_v28 = vmul.f32 %v2715_v25, %v2609_v10  ;;  %v4656_v18 = vld [vmem:[#allocation6 + $0x344] ss:$8 sps:$4 sm:$0xff]   ;;  %v4651_v39 = vld [vmem:[#allocation6 + $0x240] ss:$8 sps:$4 sm:$0xff]   ;;  %v4659_v20 = vld [vmem:[#allocation6 + $0x254] ss:$8 sps:$4 sm:$0xff]  }
 0x75d   : > { %v2722_v29 = vmul.f32 %v2714_v26, %v2570_v13  ;;  %v2724_v30 = vmul.f32 %v2716_v41, %v2611_v14  ;;  %v4654_v19 = vld [vmem:[#allocation6 + $0x340] ss:$8 sps:$4 sm:$0xff]   ;;  %v4662_v21 = vld [vmem:[#allocation6 + $0x354] ss:$8 sps:$4 sm:$0xff]   ;;  %v4657_v22 = vld [vmem:[#allocation6 + $0x250] ss:$8 sps:$4 sm:$0xff]  }
 0x75e   : > { %v2729_v31 = vadd.f32 %v2721_v27, %v2568_v9  ;;  %v2731_v32 = vadd.f32 %v2723_v28, %v2609_v10  ;;  %v4641_v9 = vld [vmem:[#allocation6 + $0x224] ss:$8 sps:$4 sm:$0xff]   ;;  %v4660_v25 = vld [vmem:[#allocation6 + $0x350] ss:$8 sps:$4 sm:$0xff]   ;;  %v4663_v27 = vld [vmem:[#allocation6 + $0x260] ss:$8 sps:$4 sm:$0xff]  }
 0x75f   : > { %v2730_v33 = vadd.f32 %v2722_v29, %v2570_v13  ;;  %v2732_v34 = vadd.f32 %v2724_v30, %v2611_v14  ;;  %v4644_v10 = vld [vmem:[#allocation6 + $0x324] ss:$8 sps:$4 sm:$0xff]   ;;  %v4647_v13 = vld [vmem:[#allocation6 + $0x234] ss:$8 sps:$4 sm:$0xff]   ;;  %v4666_v28 = vld [vmem:[#allocation6 + $0x360] ss:$8 sps:$4 sm:$0xff]  }
 0x760   : > { %v2737_v35 = vmul.f32 0.7978846, %v2729_v31  ;;  %v2739_v40 = vmul.f32 0.7978846, %v2731_v32  ;;  %v4650_v14 = vld [vmem:[#allocation6 + $0x334] ss:$8 sps:$4 sm:$0xff]  }
 0x761   : > { %v2738_v36 = vmul.f32 0.7978846, %v2730_v33  ;;  %v2740_v37 = vmul.f32 0.7978846, %v2732_v34  ;;  %v4665_v26 = vld [vmem:[#allocation6 + $0x264] ss:$8 sps:$4 sm:$0xff]  }
 0x762   : > { %4733 = vtanh.f32 %v2737_v35  ;;  %v4668_v41 = vld [vmem:[#allocation6 + $0x364] ss:$8 sps:$4 sm:$0xff]   ;;  %v4671_v29 = vld [vmem:[#allocation6 + $0x274] ss:$8 sps:$4 sm:$0xff]   ;;  %v4669_v31 = vld [vmem:[#allocation6 + $0x270] ss:$8 sps:$4 sm:$0xff]  }
 0x763   : > { %4735 = vtanh.f32 %v2738_v36  ;;  %v4674_v30 = vld [vmem:[#allocation6 + $0x374] ss:$8 sps:$4 sm:$0xff]   ;;  %v1879_v32 = vsub.s32 6, %v5071_v38  ;;  %v4672_v33 = vld [vmem:[#allocation6 + $0x370] ss:$8 sps:$4 sm:$0xff]   ;;  %v1883_v35 = vsub.s32 7, %v5071_v38 }
 0x764   : > { %4737 = vtanh.f32 %v2740_v37  ;;  %v4677_v34 = vld [vmem:[#allocation6 + $0x284] ss:$8 sps:$4 sm:$0xff]   ;;  %v1872_v37 = vrot.slane %v5252_v1, %v606_v2 }
 0x765   : > { %4739 = vtanh.f32 %v2739_v40  ;;  %v4680_v36 = vld [vmem:[#allocation6 + $0x384] ss:$8 sps:$4 sm:$0xff]   ;;  %v1880_v40 = vrot.slane %v5252_v1, %v1879_v32  ;;  %v4710_v32 = vld [vmem:[#allocation6 + $0x3d4] ss:$8 sps:$4 sm:$0xff]  }
 0x76c   : > { %v4734_v43 = vpop.eup %4733 }
 0x76d   : > { %v4736_v24 = vpop.eup %4735  ;;  %v2753_v48 = vadd.f32 1.0, %v4734_v43  ;;  %v4675_v43 = vld [vmem:[#allocation6 + $0x280] ss:$8 sps:$4 sm:$0xff]  }
 0x76e   : > { %v4738_v50 = vpop.eup %4737  ;;  %v2754_v52 = vadd.f32 1.0, %v4736_v24  ;;  %v4678_v24 = vld [vmem:[#allocation6 + $0x380] ss:$8 sps:$4 sm:$0xff]  }
 0x76f   : > { %v4740_v53 = vpop.eup %4739  ;;  %v2756_v55 = vadd.f32 1.0, %v4738_v50  ;;  %v2761_v56 = vmul.f32 %v2753_v48, %v2697_v46  ;;  %v1876_v46 = vrot.slane %v5252_v1, %v610_v3  ;;  %v1884_v48 = vrot.slane %v5252_v1, %v1883_v35  ;;  %v4683_v50 = vld [vmem:[#allocation6 + $0x294] ss:$8 sps:$4 sm:$0xff]   ;;  %v4713_v35 = vld [vmem:[#allocation6 + $0x2e4] ss:$8 sps:$4 sm:$0xff]  }
 0x770   : > { %v2762_v57 = vmul.f32 %v2754_v52, %v2698_v51  ;;  %v2755_v59 = vadd.f32 1.0, %v4740_v53  ;;  %v4686_v51 = vld [vmem:[#allocation6 + $0x394] ss:$8 sps:$4 sm:$0xff]  }
 0x771   : > { %v2764_v60 = vmul.f32 %v2756_v55, %v2700_v54  ;;  %v2769_v4 = vpack.c.bf16 %v2761_v56, %v2761_v56 }
 0x772   : > { %v2770_v0 = vpack.c.bf16 %v2762_v57, %v2762_v57  ;;  %v2763_v62 = vmul.f32 %v2755_v59, %v2699_v58  ;;  %v4681_v57 = vld [vmem:[#allocation6 + $0x290] ss:$8 sps:$4 sm:$0xff]  }
 0x773   : > { %v2772_v63 = vpack.c.bf16 %v2764_v60, %v2764_v60  ;;  %v4684_v58 = vld [vmem:[#allocation6 + $0x390] ss:$8 sps:$4 sm:$0xff]   ;;  %v4689_v60 = vld [vmem:[#allocation6 + $0x2a4] ss:$8 sps:$4 sm:$0xff]  }
 0x774   : > { %3589 = vmatprep.mubr.bf16.mxu0 %v2770_v0  ;;  %v2771_v6 = vpack.c.bf16 %v2763_v62, %v2763_v62  ;;  %v4692_v0 = vld [vmem:[#allocation6 + $0x3a4] ss:$8 sps:$4 sm:$0xff]  }
 0x775   : > { %3630 = vmatprep.mubr.bf16.mxu1 %v2772_v63  ;;  %3590 = vmatmul.mubr.bf16.vlgmr.msra.gmra.mrb[24].mxu0 %v2769_v4 }
 0x776   : > { %3631 = vmatmul.mubr.bf16.vlgmr.msra.gmra.mrb[24].mxu1 %v2771_v6  ;;  %3640 = vmatpush1.bf16.msra.mxu0 %v4627_v61 }
 0x777   : > { %3681 = vmatpush1.bf16.msra.mxu1 %v4630_v45  ;;  %3641 = vmatprep.subr.bf16.mxu0 %v4635_v5 }
 0x778   : > { %3682 = vmatprep.subr.bf16.mxu1 %v4638_v23 }
 0x77a   : > { %3642 = vmatpush1.bf16.msra.mxu0 %v4633_v7  ;;  %v4687_v7 = vld [vmem:[#allocation6 + $0x2a0] ss:$8 sps:$4 sm:$0xff]  }
 0x77b   : > { %3683 = vmatpush1.bf16.msra.mxu1 %v4636_v8  ;;  %3643 = vmatprep.subr.bf16.mxu0 %v4641_v9 }
 0x77c   : > { %3684 = vmatprep.subr.bf16.mxu1 %v4644_v10  ;;  %v4690_v10 = vld [vmem:[#allocation6 + $0x3a0] ss:$8 sps:$4 sm:$0xff]  }
 0x77e   : > { %3644 = vmatpush1.bf16.msra.mxu0 %v4639_v11  ;;  %v4695_v11 = vld [vmem:[#allocation6 + $0x2b4] ss:$8 sps:$4 sm:$0xff]  }
 0x77f   : > { %3685 = vmatpush1.bf16.msra.mxu1 %v4642_v12  ;;  %3645 = vmatprep.subr.bf16.mxu0 %v4647_v13 }
 0x780   : > { %3686 = vmatprep.subr.bf16.mxu1 %v4650_v14  ;;  %v4698_v14 = vld [vmem:[#allocation6 + $0x3b4] ss:$8 sps:$4 sm:$0xff]  }
 0x782   : > { %3646 = vmatpush1.bf16.msra.mxu0 %v4645_v15 }
 0x783   : > { %3687 = vmatpush1.bf16.msra.mxu1 %v4648_v16  ;;  %3647 = vmatprep.subr.bf16.mxu0 %v4653_v17 }
 0x784   : > { %3688 = vmatprep.subr.bf16.mxu1 %v4656_v18 }
 0x786   : > { %3648 = vmatpush1.bf16.msra.mxu0 %v4651_v39  ;;  %v4693_v39 = vld [vmem:[#allocation6 + $0x2b0] ss:$8 sps:$4 sm:$0xff]  }
 0x787   : > { %3689 = vmatpush1.bf16.msra.mxu1 %v4654_v19  ;;  %3649 = vmatprep.subr.bf16.mxu0 %v4659_v20  ;;  %v4696_v19 = vld [vmem:[#allocation6 + $0x3b0] ss:$8 sps:$4 sm:$0xff]   ;;  %v4701_v20 = vld [vmem:[#allocation6 + $0x2c4] ss:$8 sps:$4 sm:$0xff]  }
 0x788   : > { %3690 = vmatprep.subr.bf16.mxu1 %v4662_v21 }
 0x78a   : > { %3650 = vmatpush1.bf16.msra.mxu0 %v4657_v22 }
 0x78b   : > { %3691 = vmatpush1.bf16.msra.mxu1 %v4660_v25  ;;  %3651 = vmatprep.subr.bf16.mxu0 %v4665_v26  ;;  %v4704_v25 = vld [vmem:[#allocation6 + $0x3c4] ss:$8 sps:$4 sm:$0xff]  }
 0x78c   : > { %3692 = vmatprep.subr.bf16.mxu1 %v4668_v41 }
 0x78e   : > { %3652 = vmatpush1.bf16.msra.mxu0 %v4663_v27 }
 0x78f   : > { %3693 = vmatpush1.bf16.msra.mxu1 %v4666_v28  ;;  %3653 = vmatprep.subr.bf16.mxu0 %v4671_v29  ;;  %v4699_v29 = vld [vmem:[#allocation6 + $0x2c0] ss:$8 sps:$4 sm:$0xff]  }
 0x790   : > { %3694 = vmatprep.subr.bf16.mxu1 %v4674_v30  ;;  %v4702_v30 = vld [vmem:[#allocation6 + $0x3c0] ss:$8 sps:$4 sm:$0xff]  }
 0x792   : > { %3654 = vmatpush1.bf16.msra.mxu0 %v4669_v31  ;;  %v4707_v31 = vld [vmem:[#allocation6 + $0x2d4] ss:$8 sps:$4 sm:$0xff]  }
 0x793   : > { %3695 = vmatpush1.bf16.msra.mxu1 %v4672_v33  ;;  %3655 = vmatprep.subr.bf16.mxu0 %v4677_v34  ;;  %v4705_v33 = vld [vmem:[#allocation6 + $0x2d0] ss:$8 sps:$4 sm:$0xff]  }
 0x794   : > { %3696 = vmatprep.subr.bf16.mxu1 %v4680_v36  ;;  %v4708_v34 = vld [vmem:[#allocation6 + $0x3d0] ss:$8 sps:$4 sm:$0xff]   ;;  %v4716_v36 = vld [vmem:[#allocation6 + $0x3e4] ss:$8 sps:$4 sm:$0xff]  }
 0x795   : > { %v2649_v52 = vpop.f32.mrb[20].mxu0  ;;  %v2690_v53 = vpop.f32.mrb[20].mxu1 }
 0x796   : > { %v5274_v54 = vadd.f32 %v2649_v52, %v1872_v37  ;;  %v5276_v2 = vadd.f32 %v2690_v53, %v1880_v40  ;;  %v2651_v55 = vpop.f32.mrb[21].mxu0  ;;  %v2692_v56 = vpop.f32.mrb[21].mxu1  ;;  %3656 = vmatpush1.bf16.msra.mxu0 %v4675_v43  ;;  %v4711_v37 = vld [vmem:[#allocation6 + $0x2e0] ss:$8 sps:$4 sm:$0xff]   ;;  %v4719_v43 = vld [vmem:[#allocation6 + $0x2f4] ss:$8 sps:$4 sm:$0xff]  }
 0x797   : > { %v5278_v59 = vadd.f32 %v2651_v55, %v1876_v46  ;;  %v5280_v38 = vadd.f32 %v2692_v56, %v1884_v48  ;;  %3697 = vmatpush1.bf16.msra.mxu1 %v4678_v24  ;;  %v2653_v3 = vpop.f32.mrb[22].mxu0  ;;  %v2694_v1 = vpop.f32.mrb[22].mxu1  ;;  %3657 = vmatprep.subr.bf16.mxu0 %v4683_v50  ;;  %v4714_v40 = vld [vmem:[#allocation6 + $0x3e0] ss:$8 sps:$4 sm:$0xff]   ;;  %v4722_v46 = vld [vmem:[#allocation6 + $0x3f4] ss:$8 sps:$4 sm:$0xff]  }
 0x798   : > { %v2709_v61 = vmul.f32 0.044715, %v5274_v54  ;;  %v2711_v62 = vmul.f32 0.044715, %v5276_v2  ;;  %v2654_v63 = vpop.f32.mrb[23].mxu0  ;;  %v2695_v45 = vpop.f32.mrb[23].mxu1  ;;  %3698 = vmatprep.subr.bf16.mxu1 %v4686_v51 }
 0x799   : > { %v2710_v4 = vmul.f32 0.044715, %v5278_v59  ;;  %v2712_v5 = vmul.f32 0.044715, %v5280_v38  ;;  %v2701_v50 = vmul.f32 0.5, %v5274_v54  ;;  %v2702_v55 = vmul.f32 0.5, %v5278_v59 }
 0x79a   : > { %v2717_v6 = vmul.f32 %v2709_v61, %v5274_v54  ;;  %v2719_v23 = vmul.f32 %v2711_v62, %v5276_v2  ;;  %3658 = vmatpush1.bf16.msra.mxu0 %v4681_v57  ;;  %v4717_v53 = vld [vmem:[#allocation6 + $0x2f0] ss:$8 sps:$4 sm:$0xff]   ;;  %v2704_v3 = vmul.f32 0.5, %v5280_v38  ;;  %v2703_v61 = vmul.f32 0.5, %v5276_v2 }
 0x79b   : > { %v2718_v8 = vmul.f32 %v2710_v4, %v5278_v59  ;;  %v2720_v9 = vmul.f32 %v2712_v5, %v5280_v38  ;;  %3699 = vmatpush1.bf16.msra.mxu1 %v4684_v58  ;;  %3659 = vmatprep.subr.bf16.mxu0 %v4689_v60  ;;  %v4720_v58 = vld [vmem:[#allocation6 + $0x3f0] ss:$8 sps:$4 sm:$0xff]  }
 0x79c   : > { %v2725_v12 = vmul.f32 %v2717_v6, %v5274_v54  ;;  %v2727_v13 = vmul.f32 %v2719_v23, %v5276_v2  ;;  %3700 = vmatprep.subr.bf16.mxu1 %v4692_v0 }
 0x79d   : > { %v2726_v15 = vmul.f32 %v2718_v8, %v5278_v59  ;;  %v2728_v16 = vmul.f32 %v2720_v9, %v5280_v38 }
 0x79e   : > { %v2733_v17 = vadd.f32 %v2725_v12, %v5274_v54  ;;  %v2735_v18 = vadd.f32 %v2727_v13, %v5276_v2  ;;  %3660 = vmatpush1.bf16.msra.mxu0 %v4687_v7 }
 0x79f   : > { %3701 = vmatpush1.bf16.msra.mxu1 %v4690_v10  ;;  %3661 = vmatprep.subr.bf16.mxu0 %v4695_v11  ;;  %v2734_v21 = vadd.f32 %v2726_v15, %v5278_v59  ;;  %v2736_v22 = vadd.f32 %v2728_v16, %v5280_v38  ;;  %v2905_v38 = vld [vmem:[%s5337_s10] sm:$0x3] }
 0x7a0   : > { %3702 = vmatprep.subr.bf16.mxu1 %v4698_v14  ;;  %v2741_v26 = vmul.f32 0.7978846, %v2733_v17  ;;  %v2743_v28 = vmul.f32 0.7978846, %v2735_v18  ;;  %v2910_v6 = vrot.slane %v2905_v38, %v5079_v42  ;;  %v2914_v2 = vrot.slane %v2905_v38, %v5084_v44 }
 0x7a1   : > { %v2742_v41 = vmul.f32 0.7978846, %v2734_v21  ;;  %v2744_v27 = vmul.f32 0.7978846, %v2736_v22 }
 0x7a2   : > { %3662 = vmatpush1.bf16.msra.mxu0 %v4693_v39  ;;  %4741 = vtanh.f32 %v2741_v26 }
 0x7a3   : > { %3703 = vmatpush1.bf16.msra.mxu1 %v4696_v19  ;;  %3663 = vmatprep.subr.bf16.mxu0 %v4701_v20  ;;  %4743 = vtanh.f32 %v2742_v41 }
 0x7a4   : > { %3704 = vmatprep.subr.bf16.mxu1 %v4704_v25  ;;  %4745 = vtanh.f32 %v2744_v27 }
 0x7a5   : > { %4747 = vtanh.f32 %v2743_v28 }
 0x7a6   : > { %3664 = vmatpush1.bf16.msra.mxu0 %v4699_v29 }
 0x7a7   : > { %3705 = vmatpush1.bf16.msra.mxu1 %v4702_v30  ;;  %3665 = vmatprep.subr.bf16.mxu0 %v4707_v31 }
 0x7a8   : > { %3706 = vmatprep.subr.bf16.mxu1 %v4710_v32 }
 0x7aa   : > { %3666 = vmatpush1.bf16.msra.mxu0 %v4705_v33 }
 0x7ab   : > { %3707 = vmatpush1.bf16.msra.mxu1 %v4708_v34  ;;  %3667 = vmatprep.subr.bf16.mxu0 %v4713_v35 }
 0x7ac   : > { %v4742_v24 = vpop.eup %4741  ;;  %3708 = vmatprep.subr.bf16.mxu1 %v4716_v36 }
 0x7ad   : > { %v4744_v48 = vpop.eup %4743  ;;  %v2757_v51 = vadd.f32 1.0, %v4742_v24 }
 0x7ae   : > { %v4746_v52 = vpop.eup %4745  ;;  %3668 = vmatpush1.bf16.msra.mxu0 %v4711_v37  ;;  %v2758_v56 = vadd.f32 1.0, %v4744_v48 }
 0x7af   : > { %v4748_v57 = vpop.eup %4747  ;;  %3709 = vmatpush1.bf16.msra.mxu1 %v4714_v40  ;;  %3669 = vmatprep.subr.bf16.mxu0 %v4719_v43  ;;  %v2760_v1 = vadd.f32 1.0, %v4746_v52  ;;  %v2765_v60 = vmul.f32 %v2757_v51, %v2701_v50 }
 0x7b0   : > { %3710 = vmatprep.subr.bf16.mxu1 %v4722_v46  ;;  %v2766_v0 = vmul.f32 %v2758_v56, %v2702_v55  ;;  %v2759_v54 = vadd.f32 1.0, %v4748_v57 }
 0x7b1   : > { %v2768_v62 = vmul.f32 %v2760_v1, %v2704_v3  ;;  %v2773_v4 = vpack.c.bf16 %v2765_v60, %v2765_v60 }
 0x7b2   : > { %3670 = vmatpush1.bf16.msra.mxu0 %v4717_v53  ;;  %v2774_v63 = vpack.c.bf16 %v2766_v0, %v2766_v0  ;;  %v2767_v45 = vmul.f32 %v2759_v54, %v2703_v61 }
 0x7b3   : > { %3711 = vmatpush1.bf16.msra.mxu1 %v4720_v58  ;;  %v2776_v59 = vpack.c.bf16 %v2768_v62, %v2768_v62 }
 0x7b4   : > { %3671 = vmatprep.mubr.bf16.mxu0 %v2774_v63  ;;  %v2775_v5 = vpack.c.bf16 %v2767_v45, %v2767_v45 }
 0x7b5   : > { %3712 = vmatprep.mubr.bf16.mxu1 %v2776_v59  ;;  %3672 = vmatmul.mubr.bf16.vlgmr.msra.gmra.mrb[28].mxu0 %v2773_v4 }
 0x7b6   : > { %3713 = vmatmul.mubr.bf16.vlgmr.msra.gmra.mrb[28].mxu1 %v2775_v5 }
 0x848   : > { %v3591_v23 = vpop.f32.mrb[24].mxu0 }
 0x849   : > { %v3592_v7 = vadd.f32 %v3591_v23, %v2910_v6  ;;  %v3632_v8 = vpop.f32.mrb[24].mxu1  ;;  %v3593_v9 = vpop.f32.mrb[25].mxu0 }
 0x84a   : > { %v3594_v10 = vadd.f32 %v3593_v9, %v2914_v2  ;;  %v3634_v11 = vpop.f32.mrb[25].mxu1  ;;  %v3595_v12 = vpop.f32.mrb[26].mxu0 }
 0x84b   : > { %v3633_v13 = vadd.f32 %v3632_v8, %v3592_v7  ;;  %v3636_v14 = vpop.f32.mrb[26].mxu1  ;;  %v3596_v15 = vpop.f32.mrb[27].mxu0 }
 0x84c   : > { %v3635_v16 = vadd.f32 %v3634_v11, %v3594_v10  ;;  %v3637_v17 = vpop.f32.mrb[27].mxu1 }
 0x888   : > { %v3673_v18 = vpop.f32.mrb[28].mxu0 }
 0x889   : > { %v3674_v39 = vadd.f32 %v3673_v18, %v3633_v13  ;;  %v3714_v19 = vpop.f32.mrb[28].mxu1  ;;  %v3675_v20 = vpop.f32.mrb[29].mxu0 }
 0x88a   : > { %v3676_v21 = vadd.f32 %v3675_v20, %v3635_v16  ;;  %v3716_v22 = vpop.f32.mrb[29].mxu1  ;;  %v3677_v25 = vpop.f32.mrb[30].mxu0 }
 0x88b   : > { %v3715_v26 = vadd.f32 %v3714_v19, %v3674_v39  ;;  %v3718_v41 = vpop.f32.mrb[30].mxu1  ;;  %v3678_v27 = vpop.f32.mrb[31].mxu0 }
 0x88c   : > { %v3717_v28 = vadd.f32 %v3716_v22, %v3676_v21  ;;  %v3719_v29 = vpop.f32.mrb[31].mxu1 }
 0x88d   : > { %v3721_v30 = vadd.f32 %v3715_v26, %v5237_v49  ;;  %v3723_v49 = vld [vmem:[%s5338_s11] sm:$0x3] }
 0x88e   : > { %v3722_v31 = vadd.f32 %v3717_v28, %v5235_v47  ;;  %v3724_v47 = vld [vmem:[%s5339_s12] sm:$0x3]  ;;  %v3745_v50 = vrot.slane %v3723_v49, %v5079_v42  ;;  %v3749_v51 = vrot.slane %v3723_v49, %v5084_v44 }
 0x88f   : > { %v3758_v53 = vrot.slane %v3724_v47, %v5079_v42  ;;  %v3762_v55 = vrot.slane %v3724_v47, %v5084_v44 }
 0x890   : > { %v3725_v32 = vadd.f32 %v3722_v31, %v3721_v30 }
 0x892   : > { %3726 = vadd.xlane.f32.xlu0 %v3725_v32 }
 0x91f   : > { %v3727_v33 = vpop.xlane.xlu0 %3726 }
 0x920   : > { %v3728_v34 = vmul.f32 0.00390625, %v3727_v33 }
 0x922   : > { %v3729_v35 = vsub.f32 %v3721_v30, %v3728_v34  ;;  %v3730_v36 = vsub.f32 %v3722_v31, %v3728_v34 }
 0x924   : > { %v3731_v37 = vmul.f32 %v3729_v35, %v3729_v35  ;;  %v3732_v40 = vmul.f32 %v3730_v36, %v3730_v36 }
 0x926   : > { %v3733_v43 = vadd.f32 %v3732_v40, %v3731_v37 }
 0x928   : > { %3734 = vadd.xlane.f32.xlu1 %v3733_v43 }
 0x9b5   : > { %v3735_v24 = vpop.xlane.xlu1 %3734 }
 0x9b6   : > { %v3736_v46 = vmul.f32 0.00390625, %v3735_v24 }
 0x9b8   : > { %v3737_v48 = vadd.f32 1e-12, %v3736_v46 }
 0x9ba   : > { %4749 = vrsqrt.f32 %v3737_v48 }
 0x9c4   : > { %v4750_v52 = vpop.eup %4749 }
 0x9c5   : > { %v3739_v56 = vmul.f32 %v4750_v52, %v3729_v35  ;;  %v3740_v57 = vmul.f32 %v4750_v52, %v3730_v36 }
 0x9c7   : > { %v3752_v58 = vmul.f32 %v3745_v50, %v3739_v56  ;;  %v3753_v3 = vmul.f32 %v3749_v51, %v3740_v57 }
 0x9c9   : > { %v3765_v1 = vadd.f32 %v3758_v53, %v3752_v58  ;;  %v3766_v60 = vadd.f32 %v3762_v55, %v3753_v3 }
 0x9cb   : > { %3767 = vst [vmem:[%s484_s21] sm:$0xff] %v3765_v1  ;;  %3768 = vst [vmem:[%s484_s21 + $0x8] sm:$0xff] %v3766_v60 }
 0x9cc PF: > { %s5355_s22 = sld [smem:[#allocation9_spill]] }
 0x9d2   : > { %s25_s25 = sadd.s32 1, %s5355_s22  }
 0x9d3   : > { %p22_p13 = scmp.ge.s32.totalorder %s25_s25, 4  }
 0x9d5   :  { %24 = sbr.rel (!%p22_p13) target bundleno = 4 (0x4), region = 115 }
 0x9dc   :  { %3790 = vsyncpa [#allocation3], 1 }
 0x9dd   :  { %3792 = vsyncpa [#allocation3 + $0x1], 1 }
 0x9de   :  { %3793 = vsyncpa [#allocation5], 1 }

</bundles_post_ra>
